<compile_context>
chip_gen: v7x
topology: tpu7x:2x2x1
jax: 0.10.0
libtpu: 0.0.40
codegen_flags: <defaults>
</compile_context>

<pallas_src>
import functools
import math

import jax
import jax.numpy as jnp
from jax.experimental import pallas as pl
from jax.experimental.pallas import tpu as pltpu


def _encoder_layer_kernel(nhead, head_dim, eps, tb, seq, emb, dff, f_chunk,
                          x_ref, wq_ref, wk_ref, wv_ref, bq_ref, bk_ref, bv_ref,
                          wo_ref, bo_ref, w1_ref, b1_ref, w2_ref, b2_ref,
                          g1_ref, be1_ref, g2_ref, be2_ref, o_ref):
    rows = tb * seq
    inv_emb = 1.0 / emb

    def layer_norm(xv, g, b):
        # Fused single-pass LN: sum and sum-of-squares from one pass over xv,
        # var = E[x^2] - mean^2 (clamped for fp rounding).  Halves the LN epilogue
        # work vs. mean -> center -> mean((x-mu)^2).
        s = jnp.sum(xv, axis=-1, keepdims=True)
        ss = jnp.sum(xv * xv, axis=-1, keepdims=True)
        mu = s * inv_emb
        var = jnp.maximum(ss * inv_emb - mu * mu, 0.0)
        return (xv - mu) * jax.lax.rsqrt(var + eps) * g + b

    # (TB, S, E) block -> flatten rows; leading-dim merge is layout-trivial.
    x = x_ref[...].reshape(rows, emb)                    # f32
    xb = x.astype(jnp.bfloat16)

    # ---- fused in_proj: Q/K/V (bf16 operands, f32 accumulation on the MXU) ----
    q = jnp.dot(xb, wq_ref[...], preferred_element_type=jnp.float32) + bq_ref[...]
    k = jnp.dot(xb, wk_ref[...], preferred_element_type=jnp.float32) + bk_ref[...]
    v = jnp.dot(xb, wv_ref[...], preferred_element_type=jnp.float32) + bv_ref[...]

    scale = 1.0 / math.sqrt(head_dim)
    qb = (q * scale).astype(jnp.bfloat16).reshape(tb, seq, emb)
    kb = k.astype(jnp.bfloat16).reshape(tb, seq, emb)
    vb = v.astype(jnp.bfloat16).reshape(tb, seq, emb)

    # ---- attention: per-head batched einsums (single leading batch dim -> supported
    # dot_general form).  The per-head context feeds the output projection directly
    # via the matching Wo row-block: no scratch, no masked sub-lane stores, no concat.
    acc = jnp.zeros((rows, emb), jnp.float32)
    for h in range(nhead):
        lo = h * head_dim
        qh = qb[:, :, lo:lo + head_dim]                                   # (TB, S, hd)
        kh = kb[:, :, lo:lo + head_dim]
        vh = vb[:, :, lo:lo + head_dim]
        sc = jnp.einsum('bqd,bkd->bqk', qh, kh,
                        preferred_element_type=jnp.float32)               # (TB, S, S)
        sc = sc - jnp.max(sc, axis=-1, keepdims=True)
        p = jnp.exp(sc)
        p = p * pl.reciprocal(jnp.sum(p, axis=-1, keepdims=True), approx=True)
        ctx = jnp.einsum('bqk,bkd->bqd', p.astype(jnp.bfloat16), vh,
                         preferred_element_type=jnp.float32)              # (TB, S, hd)
        acc = acc + jnp.dot(ctx.reshape(rows, head_dim).astype(jnp.bfloat16),
                            wo_ref[lo:lo + head_dim, :],
                            preferred_element_type=jnp.float32)           # (rows, E)

    # ---- residual + LayerNorm1 (post-norm, as in the PyTorch module) ----
    src1 = layer_norm(x + acc + bo_ref[...], g1_ref[...], be1_ref[...])

    # ---- FFN: linear1 -> exact GELU (erf) -> linear2, chunked along F so the f32
    # (rows, F) intermediate never exceeds rows x f_chunk (VMEM / vreg pressure). ----
    src1b = src1.astype(jnp.bfloat16)
    inv_sqrt2 = 1.0 / math.sqrt(2.0)
    ff = jnp.zeros((rows, emb), jnp.float32)
    for f0 in range(0, dff, f_chunk):
        f1 = min(f0 + f_chunk, dff)
        h1 = jnp.dot(src1b, w1_ref[:, f0:f1],
                     preferred_element_type=jnp.float32) + b1_ref[:, f0:f1]
        h1 = 0.5 * h1 * (1.0 + jax.lax.erf(h1 * inv_sqrt2))
        ff = ff + jnp.dot(h1.astype(jnp.bfloat16), w2_ref[f0:f1, :],
                          preferred_element_type=jnp.float32)

    # ---- residual + LayerNorm2 ----
    out = layer_norm(src1 + ff + b2_ref[...], g2_ref[...], be2_ref[...])
    o_ref[...] = out.reshape(tb, seq, emb).astype(o_ref.dtype)


def _tpu_vmem_capacity_bytes(default=128 * 1024 * 1024):
    try:
        return int(pltpu.get_tpu_info().vmem_capacity_bytes)
    except Exception:
        return default


def _pick_batch_block(batch, seq, *, target_rows, min_grid_steps):
    """Largest divisor TB of `batch` with TB*seq <= target_rows, preferring TB*seq a
    multiple of 256 (then 128) for MXU-aligned M, while keeping at least
    `min_grid_steps` grid steps (so both TensorCores get work on 2-TC parts)."""
    def feasible(min_steps):
        return [c for c in range(1, batch + 1)
                if batch % c == 0 and c * seq <= target_rows and batch // c >= min_steps]

    cands = feasible(min_grid_steps) or feasible(1)
    if not cands:
        # No divisor keeps the block under target_rows (prime batch / very long seq):
        # fall back to one sequence per grid step.
        # TODO(synk): also tile the sequence axis when seq alone exceeds the VMEM budget.
        return 1
    return max(cands, key=lambda c: (c * seq % 256 == 0, c * seq % 128 == 0, c * seq))


def transformer_encoder_layer(src, params, *, nhead, eps=1e-5):
    """src: (S, B, E) float32 — same layout as PyTorch nn.TransformerEncoderLayer."""
    S, B, E = src.shape
    assert E % nhead == 0, "d_model must be divisible by nhead"
    head_dim = E // nhead
    dff = params["w1"].shape[1]

    # Generation-aware budgets: 64 MiB VMEM parts (v7x class, 2 TensorCores) get a
    # smaller scoped-VMEM limit / block and a grid of >= 2 parallel steps; 128 MiB
    # parts (v5e/v6e) keep the larger, more MXU-efficient block.
    vmem_cap = _tpu_vmem_capacity_bytes()
    small_vmem = vmem_cap <= 64 * 1024 * 1024
    target_rows = 256 if small_vmem else 512
    min_grid_steps = 2 if small_vmem else 1
    vmem_limit = (40 if small_vmem else 48) * 1024 * 1024
    f_chunk = min(dff, 512 if small_vmem else 1024)

    TB = _pick_batch_block(B, S, target_rows=target_rows, min_grid_steps=min_grid_steps)

    # One XLA transpose to batch-major so each grid step grabs a (TB, S, E) slab.
    # TODO(synk): gridding the middle (B) axis of (S, B, E) in place would drop this
    # HBM round-trip, but it needs an in-kernel (S,TB,E)<->(TB,S,E) transpose which
    # Mosaic only lowers for the two minormost dims; keep the single XLA transpose.
    x = jnp.transpose(src, (1, 0, 2))  # (B, S, E)

    kern = functools.partial(_encoder_layer_kernel, nhead, head_dim, eps, TB, S, E,
                             dff, f_chunk)

    weight_order = ["wq", "wk", "wv", "bq", "bk", "bv", "wo", "bo",
                    "w1", "b1", "w2", "b2", "g1", "be1", "g2", "be2"]
    matmul_weights = {"wq", "wk", "wv", "wo", "w1", "w2"}
    # matmul operands in bf16 (f32 accumulation in-kernel); biases / LN affine stay f32
    weight_args = [params[n].astype(jnp.bfloat16) if n in matmul_weights
                   else params[n].astype(jnp.float32)
                   for n in weight_order]

    def run(single_buffer_weights):
        def wspec(arr):
            if single_buffer_weights:
                # Grid-invariant index_map: double buffering buys nothing -> halve
                # the weights' VMEM footprint.
                return pl.BlockSpec(arr.shape, lambda b: (0, 0),
                                    pipeline_mode=pl.Buffered(1))
            return pl.BlockSpec(arr.shape, lambda b: (0, 0))

        return pl.pallas_call(
            kern,
            out_shape=jax.ShapeDtypeStruct((B, S, E), src.dtype),
            grid_spec=pltpu.PrefetchScalarGridSpec(
                num_scalar_prefetch=0,
                grid=(B // TB,),
                in_specs=[pl.BlockSpec((TB, S, E), lambda b: (b, 0, 0))]
                         + [wspec(a) for a in weight_args],
                out_specs=pl.BlockSpec((TB, S, E), lambda b: (b, 0, 0)),
            ),
            compiler_params=pltpu.CompilerParams(
                dimension_semantics=("parallel",),
                vmem_limit_bytes=vmem_limit),
        )(x, *weight_args)

    try:
        out = run(True)
    except Exception:
        # pipeline_mode / Buffered(1) not supported by this jax build: fall back to the
        # default double-buffered weight pipeline (numerically identical).
        out = run(False)

    return jnp.transpose(out, (1, 0, 2))  # back to (S, B, E)


def init_params(key, d_model, nhead, dim_feedforward):
    """Deterministic synthetic parameters matching the nn.Module's shapes."""
    ks = jax.random.split(key, 8)
    s = 0.05
    E, F = d_model, dim_feedforward
    # nn.MultiheadAttention: in_proj_weight (3E, E); pre-split and pre-transposed
    in_proj_w = s * jax.random.normal(ks[0], (3 * E, E), jnp.float32)
    in_proj_b = s * jax.random.normal(ks[1], (3 * E,), jnp.float32)
    out_proj_w = s * jax.random.normal(ks[2], (E, E), jnp.float32)   # (E_out, E_in)
    out_proj_b = s * jax.random.normal(ks[3], (E,), jnp.float32)
    lin1_w = s * jax.random.normal(ks[4], (F, E), jnp.float32)       # (F, E)
    lin1_b = s * jax.random.normal(ks[5], (F,), jnp.float32)
    lin2_w = s * jax.random.normal(ks[6], (E, F), jnp.float32)       # (E, F)
    lin2_b = s * jax.random.normal(ks[7], (E,), jnp.float32)

    wq, wk, wv = in_proj_w[:E], in_proj_w[E:2 * E], in_proj_w[2 * E:]
    bq, bk, bv = in_proj_b[:E], in_proj_b[E:2 * E], in_proj_b[2 * E:]

    r2 = lambda v: v.reshape(1, -1)
    return {
        # pre-transposed so the kernel does x @ W  (equivalent to x @ W_torch.T)
        "wq": wq.T, "wk": wk.T, "wv": wv.T,
        "bq": r2(bq), "bk": r2(bk), "bv": r2(bv),
        "wo": out_proj_w.T, "bo": r2(out_proj_b),
        "w1": lin1_w.T, "b1": r2(lin1_b),
        "w2": lin2_w.T, "b2": r2(lin2_b),
        # LayerNorm affine params (PyTorch default: weight=1, bias=0)
        "g1": jnp.ones((1, E), jnp.float32), "be1": jnp.zeros((1, E), jnp.float32),
        "g2": jnp.ones((1, E), jnp.float32), "be2": jnp.zeros((1, E), jnp.float32),
    }


if __name__ == "__main__":
    S, B, E = 8, 2, 32
    NHEAD = 4
    DFF = 64

    key = jax.random.PRNGKey(0)
    k_src, k_par = jax.random.split(key)
    src = jax.random.normal(k_src, (S, B, E), jnp.float32)
    params = init_params(k_par, E, NHEAD, DFF)

    out = transformer_encoder_layer(src, params, nhead=NHEAD)
    out = jax.block_until_ready(out)
    assert out.shape == (S, B, E)
    assert jnp.all(jnp.isfinite(out))
    print("KERNEL_OK")
</pallas_src>

<mosaic_0001>
module attributes {stable_mosaic.version = 11 : i64} {
  func.func @_encoder_layer_kernel(%arg0: i32, %arg1: memref<2x8x32xf32, #tpu.memory_space<vmem>>, %arg2: memref<32x32xbf16, #tpu.memory_space<vmem>>, %arg3: memref<32x32xbf16, #tpu.memory_space<vmem>>, %arg4: memref<32x32xbf16, #tpu.memory_space<vmem>>, %arg5: memref<1x32xf32, #tpu.memory_space<vmem>>, %arg6: memref<1x32xf32, #tpu.memory_space<vmem>>, %arg7: memref<1x32xf32, #tpu.memory_space<vmem>>, %arg8: memref<32x32xbf16, #tpu.memory_space<vmem>>, %arg9: memref<1x32xf32, #tpu.memory_space<vmem>>, %arg10: memref<32x64xbf16, #tpu.memory_space<vmem>>, %arg11: memref<1x64xf32, #tpu.memory_space<vmem>>, %arg12: memref<64x32xbf16, #tpu.memory_space<vmem>>, %arg13: memref<1x32xf32, #tpu.memory_space<vmem>>, %arg14: memref<1x32xf32, #tpu.memory_space<vmem>>, %arg15: memref<1x32xf32, #tpu.memory_space<vmem>>, %arg16: memref<1x32xf32, #tpu.memory_space<vmem>>, %arg17: memref<1x32xf32, #tpu.memory_space<vmem>>, %arg18: memref<2x8x32xf32, #tpu.memory_space<vmem>>) attributes {dimension_semantics = [#tpu.dimension_semantics<parallel>], iteration_bounds = array<i64: 1>, scalar_prefetch = 0 : i64, scratch_operands = 0 : i64, tpu.core_type = #tpu.core_type<tc>, window_params = [{transform_indices = @transform_0, window_bounds = array<i64: 2, 8, 32>}, {pipeline_mode = #tpu.pipeline_mode<synchronous>, transform_indices = @transform_1, window_bounds = array<i64: 32, 32>}, {pipeline_mode = #tpu.pipeline_mode<synchronous>, transform_indices = @transform_2, window_bounds = array<i64: 32, 32>}, {pipeline_mode = #tpu.pipeline_mode<synchronous>, transform_indices = @transform_3, window_bounds = array<i64: 32, 32>}, {pipeline_mode = #tpu.pipeline_mode<synchronous>, transform_indices = @transform_4, window_bounds = array<i64: 1, 32>}, {pipeline_mode = #tpu.pipeline_mode<synchronous>, transform_indices = @transform_5, window_bounds = array<i64: 1, 32>}, {pipeline_mode = #tpu.pipeline_mode<synchronous>, transform_indices = @transform_6, window_bounds = array<i64: 1, 32>}, {pipeline_mode = #tpu.pipeline_mode<synchronous>, transform_indices = @transform_7, window_bounds = array<i64: 32, 32>}, {pipeline_mode = #tpu.pipeline_mode<synchronous>, transform_indices = @transform_8, window_bounds = array<i64: 1, 32>}, {pipeline_mode = #tpu.pipeline_mode<synchronous>, transform_indices = @transform_9, window_bounds = array<i64: 32, 64>}, {pipeline_mode = #tpu.pipeline_mode<synchronous>, transform_indices = @transform_10, window_bounds = array<i64: 1, 64>}, {pipeline_mode = #tpu.pipeline_mode<synchronous>, transform_indices = @transform_11, window_bounds = array<i64: 64, 32>}, {pipeline_mode = #tpu.pipeline_mode<synchronous>, transform_indices = @transform_12, window_bounds = array<i64: 1, 32>}, {pipeline_mode = #tpu.pipeline_mode<synchronous>, transform_indices = @transform_13, window_bounds = array<i64: 1, 32>}, {pipeline_mode = #tpu.pipeline_mode<synchronous>, transform_indices = @transform_14, window_bounds = array<i64: 1, 32>}, {pipeline_mode = #tpu.pipeline_mode<synchronous>, transform_indices = @transform_15, window_bounds = array<i64: 1, 32>}, {pipeline_mode = #tpu.pipeline_mode<synchronous>, transform_indices = @transform_16, window_bounds = array<i64: 1, 32>}, {transform_indices = @transform_17, window_bounds = array<i64: 2, 8, 32>}]} {
    %c0 = arith.constant 0 : index
    %c0_0 = arith.constant 0 : index
    %c0_1 = arith.constant 0 : index
    %0 = vector.load %arg1[%c0, %c0_0, %c0_1] : memref<2x8x32xf32, #tpu.memory_space<vmem>>, vector<2x8x32xf32>
    %1 = vector.shape_cast %0 : vector<2x8x32xf32> to vector<16x32xf32>
    %2 = arith.truncf %1 : vector<16x32xf32> to vector<16x32xbf16>
    %c0_2 = arith.constant 0 : index
    %c0_3 = arith.constant 0 : index
    %3 = vector.load %arg2[%c0_2, %c0_3] : memref<32x32xbf16, #tpu.memory_space<vmem>>, vector<32x32xbf16>
    %cst = arith.constant dense<0.000000e+00> : vector<16x32xf32>
    %4 = tpu.matmul %2, %3, %cst {dimension_numbers = #tpu.dot_dimension_numbers<[1], [0], [0], [1], [0, 0, 1, 1], [], []>} : vector<16x32xbf16>, vector<32x32xbf16>, vector<16x32xf32> -> vector<16x32xf32>
    %c0_4 = arith.constant 0 : index
    %c0_5 = arith.constant 0 : index
    %5 = vector.load %arg5[%c0_4, %c0_5] : memref<1x32xf32, #tpu.memory_space<vmem>>, vector<1x32xf32>
    %6 = vector.broadcast %5 : vector<1x32xf32> to vector<16x32xf32>
    %7 = arith.addf %4, %6 : vector<16x32xf32>
    %c0_6 = arith.constant 0 : index
    %c0_7 = arith.constant 0 : index
    %8 = vector.load %arg3[%c0_6, %c0_7] : memref<32x32xbf16, #tpu.memory_space<vmem>>, vector<32x32xbf16>
    %cst_8 = arith.constant dense<0.000000e+00> : vector<16x32xf32>
    %9 = tpu.matmul %2, %8, %cst_8 {dimension_numbers = #tpu.dot_dimension_numbers<[1], [0], [0], [1], [0, 0, 1, 1], [], []>} : vector<16x32xbf16>, vector<32x32xbf16>, vector<16x32xf32> -> vector<16x32xf32>
    %c0_9 = arith.constant 0 : index
    %c0_10 = arith.constant 0 : index
    %10 = vector.load %arg6[%c0_9, %c0_10] : memref<1x32xf32, #tpu.memory_space<vmem>>, vector<1x32xf32>
    %11 = vector.broadcast %10 : vector<1x32xf32> to vector<16x32xf32>
    %12 = arith.addf %9, %11 : vector<16x32xf32>
    %c0_11 = arith.constant 0 : index
    %c0_12 = arith.constant 0 : index
    %13 = vector.load %arg4[%c0_11, %c0_12] : memref<32x32xbf16, #tpu.memory_space<vmem>>, vector<32x32xbf16>
    %cst_13 = arith.constant dense<0.000000e+00> : vector<16x32xf32>
    %14 = tpu.matmul %2, %13, %cst_13 {dimension_numbers = #tpu.dot_dimension_numbers<[1], [0], [0], [1], [0, 0, 1, 1], [], []>} : vector<16x32xbf16>, vector<32x32xbf16>, vector<16x32xf32> -> vector<16x32xf32>
    %c0_14 = arith.constant 0 : index
    %c0_15 = arith.constant 0 : index
    %15 = vector.load %arg7[%c0_14, %c0_15] : memref<1x32xf32, #tpu.memory_space<vmem>>, vector<1x32xf32>
    %16 = vector.broadcast %15 : vector<1x32xf32> to vector<16x32xf32>
    %17 = arith.addf %14, %16 : vector<16x32xf32>
    %cst_16 = arith.constant 0.353553385 : f32
    %18 = vector.broadcast %cst_16 : f32 to vector<16x32xf32>
    %19 = arith.mulf %7, %18 : vector<16x32xf32>
    %20 = arith.truncf %19 : vector<16x32xf32> to vector<16x32xbf16>
    %21 = vector.shape_cast %20 : vector<16x32xbf16> to vector<2x8x32xbf16>
    %22 = arith.truncf %12 : vector<16x32xf32> to vector<16x32xbf16>
    %23 = vector.shape_cast %22 : vector<16x32xbf16> to vector<2x8x32xbf16>
    %24 = arith.truncf %17 : vector<16x32xf32> to vector<16x32xbf16>
    %25 = vector.shape_cast %24 : vector<16x32xbf16> to vector<2x8x32xbf16>
    %cst_17 = arith.constant 0.000000e+00 : f32
    %26 = vector.broadcast %cst_17 : f32 to vector<16x32xf32>
    %27 = vector.extract_strided_slice %21 {offsets = [0, 0, 0], sizes = [2, 8, 8], strides = [1, 1, 1]} : vector<2x8x32xbf16> to vector<2x8x8xbf16>
    %28 = vector.extract_strided_slice %23 {offsets = [0, 0, 0], sizes = [2, 8, 8], strides = [1, 1, 1]} : vector<2x8x32xbf16> to vector<2x8x8xbf16>
    %29 = vector.extract_strided_slice %25 {offsets = [0, 0, 0], sizes = [2, 8, 8], strides = [1, 1, 1]} : vector<2x8x32xbf16> to vector<2x8x8xbf16>
    "tpu.trace_start"() <{level = 10 : i32, message = "bqd,bkd->bqk"}> : () -> ()
    %cst_18 = arith.constant dense<0.000000e+00> : vector<2x8x8xf32>
    %30 = tpu.matmul %27, %28, %cst_18 {dimension_numbers = #tpu.dot_dimension_numbers<[2], [2], [1], [1], [0, 0, 0, 1, 1, 1], [0], [0]>} : vector<2x8x8xbf16>, vector<2x8x8xbf16>, vector<2x8x8xf32> -> vector<2x8x8xf32>
    "tpu.trace_stop"() : () -> ()
    %cst_19 = arith.constant dense<0xFF800000> : vector<2x8xf32>
    %31 = vector.multi_reduction <maximumf>, %30, %cst_19 [2] : vector<2x8x8xf32> to vector<2x8xf32>
    %32 = vector.shape_cast %31 : vector<2x8xf32> to vector<2x8x1xf32>
    %33 = vector.broadcast %32 : vector<2x8x1xf32> to vector<2x8x8xf32>
    %34 = arith.subf %30, %33 : vector<2x8x8xf32>
    %35 = math.exp %34 : vector<2x8x8xf32>
    %cst_20 = arith.constant dense<0.000000e+00> : vector<2x8xf32>
    %36 = vector.multi_reduction <add>, %35, %cst_20 [2] : vector<2x8x8xf32> to vector<2x8xf32>
    %37 = vector.shape_cast %36 : vector<2x8xf32> to vector<2x8x1xf32>
    %38 = tpu.reciprocal %37 {approx = true} : vector<2x8x1xf32> -> vector<2x8x1xf32>
    %39 = vector.broadcast %38 : vector<2x8x1xf32> to vector<2x8x8xf32>
    %40 = arith.mulf %35, %39 : vector<2x8x8xf32>
    %41 = arith.truncf %40 : vector<2x8x8xf32> to vector<2x8x8xbf16>
    "tpu.trace_start"() <{level = 10 : i32, message = "bqk,bkd->bqd"}> : () -> ()
    %cst_21 = arith.constant dense<0.000000e+00> : vector<2x8x8xf32>
    %42 = tpu.matmul %41, %29, %cst_21 {dimension_numbers = #tpu.dot_dimension_numbers<[2], [1], [1], [2], [0, 0, 0, 1, 1, 2], [0], [0]>} : vector<2x8x8xbf16>, vector<2x8x8xbf16>, vector<2x8x8xf32> -> vector<2x8x8xf32>
    "tpu.trace_stop"() : () -> ()
    %43 = vector.shape_cast %42 : vector<2x8x8xf32> to vector<16x8xf32>
    %44 = arith.truncf %43 : vector<16x8xf32> to vector<16x8xbf16>
    %c0_22 = arith.constant 0 : index
    %c0_23 = arith.constant 0 : index
    %45 = vector.load %arg8[%c0_22, %c0_23] : memref<32x32xbf16, #tpu.memory_space<vmem>>, vector<8x32xbf16>
    %cst_24 = arith.constant dense<0.000000e+00> : vector<16x32xf32>
    %46 = tpu.matmul %44, %45, %cst_24 {dimension_numbers = #tpu.dot_dimension_numbers<[1], [0], [0], [1], [0, 0, 1, 1], [], []>} : vector<16x8xbf16>, vector<8x32xbf16>, vector<16x32xf32> -> vector<16x32xf32>
    %47 = arith.addf %26, %46 : vector<16x32xf32>
    %48 = vector.extract_strided_slice %21 {offsets = [0, 0, 8], sizes = [2, 8, 8], strides = [1, 1, 1]} : vector<2x8x32xbf16> to vector<2x8x8xbf16>
    %49 = vector.extract_strided_slice %23 {offsets = [0, 0, 8], sizes = [2, 8, 8], strides = [1, 1, 1]} : vector<2x8x32xbf16> to vector<2x8x8xbf16>
    %50 = vector.extract_strided_slice %25 {offsets = [0, 0, 8], sizes = [2, 8, 8], strides = [1, 1, 1]} : vector<2x8x32xbf16> to vector<2x8x8xbf16>
    "tpu.trace_start"() <{level = 10 : i32, message = "bqd,bkd->bqk"}> : () -> ()
    %cst_25 = arith.constant dense<0.000000e+00> : vector<2x8x8xf32>
    %51 = tpu.matmul %48, %49, %cst_25 {dimension_numbers = #tpu.dot_dimension_numbers<[2], [2], [1], [1], [0, 0, 0, 1, 1, 1], [0], [0]>} : vector<2x8x8xbf16>, vector<2x8x8xbf16>, vector<2x8x8xf32> -> vector<2x8x8xf32>
    "tpu.trace_stop"() : () -> ()
    %cst_26 = arith.constant dense<0xFF800000> : vector<2x8xf32>
    %52 = vector.multi_reduction <maximumf>, %51, %cst_26 [2] : vector<2x8x8xf32> to vector<2x8xf32>
    %53 = vector.shape_cast %52 : vector<2x8xf32> to vector<2x8x1xf32>
    %54 = vector.broadcast %53 : vector<2x8x1xf32> to vector<2x8x8xf32>
    %55 = arith.subf %51, %54 : vector<2x8x8xf32>
    %56 = math.exp %55 : vector<2x8x8xf32>
    %cst_27 = arith.constant dense<0.000000e+00> : vector<2x8xf32>
    %57 = vector.multi_reduction <add>, %56, %cst_27 [2] : vector<2x8x8xf32> to vector<2x8xf32>
    %58 = vector.shape_cast %57 : vector<2x8xf32> to vector<2x8x1xf32>
    %59 = tpu.reciprocal %58 {approx = true} : vector<2x8x1xf32> -> vector<2x8x1xf32>
    %60 = vector.broadcast %59 : vector<2x8x1xf32> to vector<2x8x8xf32>
    %61 = arith.mulf %56, %60 : vector<2x8x8xf32>
    %62 = arith.truncf %61 : vector<2x8x8xf32> to vector<2x8x8xbf16>
    "tpu.trace_start"() <{level = 10 : i32, message = "bqk,bkd->bqd"}> : () -> ()
    %cst_28 = arith.constant dense<0.000000e+00> : vector<2x8x8xf32>
    %63 = tpu.matmul %62, %50, %cst_28 {dimension_numbers = #tpu.dot_dimension_numbers<[2], [1], [1], [2], [0, 0, 0, 1, 1, 2], [0], [0]>} : vector<2x8x8xbf16>, vector<2x8x8xbf16>, vector<2x8x8xf32> -> vector<2x8x8xf32>
    "tpu.trace_stop"() : () -> ()
    %64 = vector.shape_cast %63 : vector<2x8x8xf32> to vector<16x8xf32>
    %65 = arith.truncf %64 : vector<16x8xf32> to vector<16x8xbf16>
    %c8 = arith.constant 8 : index
    %c0_29 = arith.constant 0 : index
    %66 = vector.load %arg8[%c8, %c0_29] : memref<32x32xbf16, #tpu.memory_space<vmem>>, vector<8x32xbf16>
    %cst_30 = arith.constant dense<0.000000e+00> : vector<16x32xf32>
    %67 = tpu.matmul %65, %66, %cst_30 {dimension_numbers = #tpu.dot_dimension_numbers<[1], [0], [0], [1], [0, 0, 1, 1], [], []>} : vector<16x8xbf16>, vector<8x32xbf16>, vector<16x32xf32> -> vector<16x32xf32>
    %68 = arith.addf %47, %67 : vector<16x32xf32>
    %69 = vector.extract_strided_slice %21 {offsets = [0, 0, 16], sizes = [2, 8, 8], strides = [1, 1, 1]} : vector<2x8x32xbf16> to vector<2x8x8xbf16>
    %70 = vector.extract_strided_slice %23 {offsets = [0, 0, 16], sizes = [2, 8, 8], strides = [1, 1, 1]} : vector<2x8x32xbf16> to vector<2x8x8xbf16>
    %71 = vector.extract_strided_slice %25 {offsets = [0, 0, 16], sizes = [2, 8, 8], strides = [1, 1, 1]} : vector<2x8x32xbf16> to vector<2x8x8xbf16>
    "tpu.trace_start"() <{level = 10 : i32, message = "bqd,bkd->bqk"}> : () -> ()
    %cst_31 = arith.constant dense<0.000000e+00> : vector<2x8x8xf32>
    %72 = tpu.matmul %69, %70, %cst_31 {dimension_numbers = #tpu.dot_dimension_numbers<[2], [2], [1], [1], [0, 0, 0, 1, 1, 1], [0], [0]>} : vector<2x8x8xbf16>, vector<2x8x8xbf16>, vector<2x8x8xf32> -> vector<2x8x8xf32>
    "tpu.trace_stop"() : () -> ()
    %cst_32 = arith.constant dense<0xFF800000> : vector<2x8xf32>
    %73 = vector.multi_reduction <maximumf>, %72, %cst_32 [2] : vector<2x8x8xf32> to vector<2x8xf32>
    %74 = vector.shape_cast %73 : vector<2x8xf32> to vector<2x8x1xf32>
    %75 = vector.broadcast %74 : vector<2x8x1xf32> to vector<2x8x8xf32>
    %76 = arith.subf %72, %75 : vector<2x8x8xf32>
    %77 = math.exp %76 : vector<2x8x8xf32>
    %cst_33 = arith.constant dense<0.000000e+00> : vector<2x8xf32>
    %78 = vector.multi_reduction <add>, %77, %cst_33 [2] : vector<2x8x8xf32> to vector<2x8xf32>
    %79 = vector.shape_cast %78 : vector<2x8xf32> to vector<2x8x1xf32>
    %80 = tpu.reciprocal %79 {approx = true} : vector<2x8x1xf32> -> vector<2x8x1xf32>
    %81 = vector.broadcast %80 : vector<2x8x1xf32> to vector<2x8x8xf32>
    %82 = arith.mulf %77, %81 : vector<2x8x8xf32>
    %83 = arith.truncf %82 : vector<2x8x8xf32> to vector<2x8x8xbf16>
    "tpu.trace_start"() <{level = 10 : i32, message = "bqk,bkd->bqd"}> : () -> ()
    %cst_34 = arith.constant dense<0.000000e+00> : vector<2x8x8xf32>
    %84 = tpu.matmul %83, %71, %cst_34 {dimension_numbers = #tpu.dot_dimension_numbers<[2], [1], [1], [2], [0, 0, 0, 1, 1, 2], [0], [0]>} : vector<2x8x8xbf16>, vector<2x8x8xbf16>, vector<2x8x8xf32> -> vector<2x8x8xf32>
    "tpu.trace_stop"() : () -> ()
    %85 = vector.shape_cast %84 : vector<2x8x8xf32> to vector<16x8xf32>
    %86 = arith.truncf %85 : vector<16x8xf32> to vector<16x8xbf16>
    %c16 = arith.constant 16 : index
    %c0_35 = arith.constant 0 : index
    %87 = vector.load %arg8[%c16, %c0_35] : memref<32x32xbf16, #tpu.memory_space<vmem>>, vector<8x32xbf16>
    %cst_36 = arith.constant dense<0.000000e+00> : vector<16x32xf32>
    %88 = tpu.matmul %86, %87, %cst_36 {dimension_numbers = #tpu.dot_dimension_numbers<[1], [0], [0], [1], [0, 0, 1, 1], [], []>} : vector<16x8xbf16>, vector<8x32xbf16>, vector<16x32xf32> -> vector<16x32xf32>
    %89 = arith.addf %68, %88 : vector<16x32xf32>
    %90 = vector.extract_strided_slice %21 {offsets = [0, 0, 24], sizes = [2, 8, 8], strides = [1, 1, 1]} : vector<2x8x32xbf16> to vector<2x8x8xbf16>
    %91 = vector.extract_strided_slice %23 {offsets = [0, 0, 24], sizes = [2, 8, 8], strides = [1, 1, 1]} : vector<2x8x32xbf16> to vector<2x8x8xbf16>
    %92 = vector.extract_strided_slice %25 {offsets = [0, 0, 24], sizes = [2, 8, 8], strides = [1, 1, 1]} : vector<2x8x32xbf16> to vector<2x8x8xbf16>
    "tpu.trace_start"() <{level = 10 : i32, message = "bqd,bkd->bqk"}> : () -> ()
    %cst_37 = arith.constant dense<0.000000e+00> : vector<2x8x8xf32>
    %93 = tpu.matmul %90, %91, %cst_37 {dimension_numbers = #tpu.dot_dimension_numbers<[2], [2], [1], [1], [0, 0, 0, 1, 1, 1], [0], [0]>} : vector<2x8x8xbf16>, vector<2x8x8xbf16>, vector<2x8x8xf32> -> vector<2x8x8xf32>
    "tpu.trace_stop"() : () -> ()
    %cst_38 = arith.constant dense<0xFF800000> : vector<2x8xf32>
    %94 = vector.multi_reduction <maximumf>, %93, %cst_38 [2] : vector<2x8x8xf32> to vector<2x8xf32>
    %95 = vector.shape_cast %94 : vector<2x8xf32> to vector<2x8x1xf32>
    %96 = vector.broadcast %95 : vector<2x8x1xf32> to vector<2x8x8xf32>
    %97 = arith.subf %93, %96 : vector<2x8x8xf32>
    %98 = math.exp %97 : vector<2x8x8xf32>
    %cst_39 = arith.constant dense<0.000000e+00> : vector<2x8xf32>
    %99 = vector.multi_reduction <add>, %98, %cst_39 [2] : vector<2x8x8xf32> to vector<2x8xf32>
    %100 = vector.shape_cast %99 : vector<2x8xf32> to vector<2x8x1xf32>
    %101 = tpu.reciprocal %100 {approx = true} : vector<2x8x1xf32> -> vector<2x8x1xf32>
    %102 = vector.broadcast %101 : vector<2x8x1xf32> to vector<2x8x8xf32>
    %103 = arith.mulf %98, %102 : vector<2x8x8xf32>
    %104 = arith.truncf %103 : vector<2x8x8xf32> to vector<2x8x8xbf16>
    "tpu.trace_start"() <{level = 10 : i32, message = "bqk,bkd->bqd"}> : () -> ()
    %cst_40 = arith.constant dense<0.000000e+00> : vector<2x8x8xf32>
    %105 = tpu.matmul %104, %92, %cst_40 {dimension_numbers = #tpu.dot_dimension_numbers<[2], [1], [1], [2], [0, 0, 0, 1, 1, 2], [0], [0]>} : vector<2x8x8xbf16>, vector<2x8x8xbf16>, vector<2x8x8xf32> -> vector<2x8x8xf32>
    "tpu.trace_stop"() : () -> ()
    %106 = vector.shape_cast %105 : vector<2x8x8xf32> to vector<16x8xf32>
    %107 = arith.truncf %106 : vector<16x8xf32> to vector<16x8xbf16>
    %c24 = arith.constant 24 : index
    %c0_41 = arith.constant 0 : index
    %108 = vector.load %arg8[%c24, %c0_41] : memref<32x32xbf16, #tpu.memory_space<vmem>>, vector<8x32xbf16>
    %cst_42 = arith.constant dense<0.000000e+00> : vector<16x32xf32>
    %109 = tpu.matmul %107, %108, %cst_42 {dimension_numbers = #tpu.dot_dimension_numbers<[1], [0], [0], [1], [0, 0, 1, 1], [], []>} : vector<16x8xbf16>, vector<8x32xbf16>, vector<16x32xf32> -> vector<16x32xf32>
    %110 = arith.addf %89, %109 : vector<16x32xf32>
    %111 = arith.addf %1, %110 : vector<16x32xf32>
    %c0_43 = arith.constant 0 : index
    %c0_44 = arith.constant 0 : index
    %112 = vector.load %arg9[%c0_43, %c0_44] : memref<1x32xf32, #tpu.memory_space<vmem>>, vector<1x32xf32>
    %113 = vector.broadcast %112 : vector<1x32xf32> to vector<16x32xf32>
    %114 = arith.addf %111, %113 : vector<16x32xf32>
    %c0_45 = arith.constant 0 : index
    %c0_46 = arith.constant 0 : index
    %115 = vector.load %arg14[%c0_45, %c0_46] : memref<1x32xf32, #tpu.memory_space<vmem>>, vector<1x32xf32>
    %c0_47 = arith.constant 0 : index
    %c0_48 = arith.constant 0 : index
    %116 = vector.load %arg15[%c0_47, %c0_48] : memref<1x32xf32, #tpu.memory_space<vmem>>, vector<1x32xf32>
    %cst_49 = arith.constant dense<0.000000e+00> : vector<16xf32>
    %117 = vector.multi_reduction <add>, %114, %cst_49 [1] : vector<16x32xf32> to vector<16xf32>
    %118 = vector.shape_cast %117 : vector<16xf32> to vector<16x1xf32>
    %119 = arith.mulf %114, %114 : vector<16x32xf32>
    %cst_50 = arith.constant dense<0.000000e+00> : vector<16xf32>
    %120 = vector.multi_reduction <add>, %119, %cst_50 [1] : vector<16x32xf32> to vector<16xf32>
    %121 = vector.shape_cast %120 : vector<16xf32> to vector<16x1xf32>
    %cst_51 = arith.constant 3.125000e-02 : f32
    %122 = vector.broadcast %cst_51 : f32 to vector<16x1xf32>
    %123 = arith.mulf %118, %122 : vector<16x1xf32>
    %cst_52 = arith.constant 3.125000e-02 : f32
    %124 = vector.broadcast %cst_52 : f32 to vector<16x1xf32>
    %125 = arith.mulf %121, %124 : vector<16x1xf32>
    %126 = arith.mulf %123, %123 : vector<16x1xf32>
    %127 = arith.subf %125, %126 : vector<16x1xf32>
    %cst_53 = arith.constant 0.000000e+00 : f32
    %128 = vector.broadcast %cst_53 : f32 to vector<16x1xf32>
    %129 = arith.maximumf %127, %128 : vector<16x1xf32>
    %130 = vector.broadcast %123 : vector<16x1xf32> to vector<16x32xf32>
    %131 = arith.subf %114, %130 : vector<16x32xf32>
    %cst_54 = arith.constant 9.99999974E-6 : f32
    %132 = vector.broadcast %cst_54 : f32 to vector<16x1xf32>
    %133 = arith.addf %129, %132 : vector<16x1xf32>
    %134 = math.rsqrt %133 : vector<16x1xf32>
    %135 = vector.broadcast %134 : vector<16x1xf32> to vector<16x32xf32>
    %136 = arith.mulf %131, %135 : vector<16x32xf32>
    %137 = vector.broadcast %115 : vector<1x32xf32> to vector<16x32xf32>
    %138 = arith.mulf %136, %137 : vector<16x32xf32>
    %139 = vector.broadcast %116 : vector<1x32xf32> to vector<16x32xf32>
    %140 = arith.addf %138, %139 : vector<16x32xf32>
    %141 = arith.truncf %140 : vector<16x32xf32> to vector<16x32xbf16>
    %cst_55 = arith.constant 0.000000e+00 : f32
    %142 = vector.broadcast %cst_55 : f32 to vector<16x32xf32>
    %c0_56 = arith.constant 0 : index
    %c0_57 = arith.constant 0 : index
    %143 = vector.load %arg10[%c0_56, %c0_57] : memref<32x64xbf16, #tpu.memory_space<vmem>>, vector<32x64xbf16>
    %cst_58 = arith.constant dense<0.000000e+00> : vector<16x64xf32>
    %144 = tpu.matmul %141, %143, %cst_58 {dimension_numbers = #tpu.dot_dimension_numbers<[1], [0], [0], [1], [0, 0, 1, 1], [], []>} : vector<16x32xbf16>, vector<32x64xbf16>, vector<16x64xf32> -> vector<16x64xf32>
    %c0_59 = arith.constant 0 : index
    %c0_60 = arith.constant 0 : index
    %145 = vector.load %arg11[%c0_59, %c0_60] : memref<1x64xf32, #tpu.memory_space<vmem>>, vector<1x64xf32>
    %146 = vector.broadcast %145 : vector<1x64xf32> to vector<16x64xf32>
    %147 = arith.addf %144, %146 : vector<16x64xf32>
    %cst_61 = arith.constant 5.000000e-01 : f32
    %148 = vector.broadcast %cst_61 : f32 to vector<16x64xf32>
    %149 = arith.mulf %148, %147 : vector<16x64xf32>
    %cst_62 = arith.constant 0.707106769 : f32
    %150 = vector.broadcast %cst_62 : f32 to vector<16x64xf32>
    %151 = arith.mulf %147, %150 : vector<16x64xf32>
    %152 = math.erf %151 : vector<16x64xf32>
    %cst_63 = arith.constant 1.000000e+00 : f32
    %153 = vector.broadcast %cst_63 : f32 to vector<16x64xf32>
    %154 = arith.addf %153, %152 : vector<16x64xf32>
    %155 = arith.mulf %149, %154 : vector<16x64xf32>
    %156 = arith.truncf %155 : vector<16x64xf32> to vector<16x64xbf16>
    %c0_64 = arith.constant 0 : index
    %c0_65 = arith.constant 0 : index
    %157 = vector.load %arg12[%c0_64, %c0_65] : memref<64x32xbf16, #tpu.memory_space<vmem>>, vector<64x32xbf16>
    %cst_66 = arith.constant dense<0.000000e+00> : vector<16x32xf32>
    %158 = tpu.matmul %156, %157, %cst_66 {dimension_numbers = #tpu.dot_dimension_numbers<[1], [0], [0], [1], [0, 0, 1, 1], [], []>} : vector<16x64xbf16>, vector<64x32xbf16>, vector<16x32xf32> -> vector<16x32xf32>
    %159 = arith.addf %142, %158 : vector<16x32xf32>
    %160 = arith.addf %140, %159 : vector<16x32xf32>
    %c0_67 = arith.constant 0 : index
    %c0_68 = arith.constant 0 : index
    %161 = vector.load %arg13[%c0_67, %c0_68] : memref<1x32xf32, #tpu.memory_space<vmem>>, vector<1x32xf32>
    %162 = vector.broadcast %161 : vector<1x32xf32> to vector<16x32xf32>
    %163 = arith.addf %160, %162 : vector<16x32xf32>
    %c0_69 = arith.constant 0 : index
    %c0_70 = arith.constant 0 : index
    %164 = vector.load %arg16[%c0_69, %c0_70] : memref<1x32xf32, #tpu.memory_space<vmem>>, vector<1x32xf32>
    %c0_71 = arith.constant 0 : index
    %c0_72 = arith.constant 0 : index
    %165 = vector.load %arg17[%c0_71, %c0_72] : memref<1x32xf32, #tpu.memory_space<vmem>>, vector<1x32xf32>
    %cst_73 = arith.constant dense<0.000000e+00> : vector<16xf32>
    %166 = vector.multi_reduction <add>, %163, %cst_73 [1] : vector<16x32xf32> to vector<16xf32>
    %167 = vector.shape_cast %166 : vector<16xf32> to vector<16x1xf32>
    %168 = arith.mulf %163, %163 : vector<16x32xf32>
    %cst_74 = arith.constant dense<0.000000e+00> : vector<16xf32>
    %169 = vector.multi_reduction <add>, %168, %cst_74 [1] : vector<16x32xf32> to vector<16xf32>
    %170 = vector.shape_cast %169 : vector<16xf32> to vector<16x1xf32>
    %cst_75 = arith.constant 3.125000e-02 : f32
    %171 = vector.broadcast %cst_75 : f32 to vector<16x1xf32>
    %172 = arith.mulf %167, %171 : vector<16x1xf32>
    %cst_76 = arith.constant 3.125000e-02 : f32
    %173 = vector.broadcast %cst_76 : f32 to vector<16x1xf32>
    %174 = arith.mulf %170, %173 : vector<16x1xf32>
    %175 = arith.mulf %172, %172 : vector<16x1xf32>
    %176 = arith.subf %174, %175 : vector<16x1xf32>
    %cst_77 = arith.constant 0.000000e+00 : f32
    %177 = vector.broadcast %cst_77 : f32 to vector<16x1xf32>
    %178 = arith.maximumf %176, %177 : vector<16x1xf32>
    %179 = vector.broadcast %172 : vector<16x1xf32> to vector<16x32xf32>
    %180 = arith.subf %163, %179 : vector<16x32xf32>
    %cst_78 = arith.constant 9.99999974E-6 : f32
    %181 = vector.broadcast %cst_78 : f32 to vector<16x1xf32>
    %182 = arith.addf %178, %181 : vector<16x1xf32>
    %183 = math.rsqrt %182 : vector<16x1xf32>
    %184 = vector.broadcast %183 : vector<16x1xf32> to vector<16x32xf32>
    %185 = arith.mulf %180, %184 : vector<16x32xf32>
    %186 = vector.broadcast %164 : vector<1x32xf32> to vector<16x32xf32>
    %187 = arith.mulf %185, %186 : vector<16x32xf32>
    %188 = vector.broadcast %165 : vector<1x32xf32> to vector<16x32xf32>
    %189 = arith.addf %187, %188 : vector<16x32xf32>
    %190 = vector.shape_cast %189 : vector<16x32xf32> to vector<2x8x32xf32>
    %c0_79 = arith.constant 0 : index
    %c0_80 = arith.constant 0 : index
    %c0_81 = arith.constant 0 : index
    %191 = vector.load %arg18[%c0_79, %c0_80, %c0_81] : memref<2x8x32xf32, #tpu.memory_space<vmem>>, vector<2x8x32xf32>
    tpu.vector_store %arg18[%c0_79, %c0_80, %c0_81], %190 {strides = array<i32>} : memref<2x8x32xf32, #tpu.memory_space<vmem>>, vector<2x8x32xf32>,
    return
  }
  func.func @transform_0(%arg0: i32) -> (i32, i32, i32) {
    %c0_i32 = arith.constant 0 : i32
    %c0_i32_0 = arith.constant 0 : i32
    %c0_i32_1 = arith.constant 0 : i32
    return %arg0, %c0_i32, %c0_i32_0 : i32, i32, i32
  }
  func.func @transform_1(%arg0: i32) -> (i32, i32) {
    %c0_i32 = arith.constant 0 : i32
    %c0_i32_0 = arith.constant 0 : i32
    %c0_i32_1 = arith.constant 0 : i32
    return %c0_i32, %c0_i32_0 : i32, i32
  }
  func.func @transform_2(%arg0: i32) -> (i32, i32) {
    %c0_i32 = arith.constant 0 : i32
    %c0_i32_0 = arith.constant 0 : i32
    %c0_i32_1 = arith.constant 0 : i32
    return %c0_i32, %c0_i32_0 : i32, i32
  }
  func.func @transform_3(%arg0: i32) -> (i32, i32) {
    %c0_i32 = arith.constant 0 : i32
    %c0_i32_0 = arith.constant 0 : i32
    %c0_i32_1 = arith.constant 0 : i32
    return %c0_i32, %c0_i32_0 : i32, i32
  }
  func.func @transform_4(%arg0: i32) -> (i32, i32) {
    %c0_i32 = arith.constant 0 : i32
    %c0_i32_0 = arith.constant 0 : i32
    %c0_i32_1 = arith.constant 0 : i32
    return %c0_i32, %c0_i32_0 : i32, i32
  }
  func.func @transform_5(%arg0: i32) -> (i32, i32) {
    %c0_i32 = arith.constant 0 : i32
    %c0_i32_0 = arith.constant 0 : i32
    %c0_i32_1 = arith.constant 0 : i32
    return %c0_i32, %c0_i32_0 : i32, i32
  }
  func.func @transform_6(%arg0: i32) -> (i32, i32) {
    %c0_i32 = arith.constant 0 : i32
    %c0_i32_0 = arith.constant 0 : i32
    %c0_i32_1 = arith.constant 0 : i32
    return %c0_i32, %c0_i32_0 : i32, i32
  }
  func.func @transform_7(%arg0: i32) -> (i32, i32) {
    %c0_i32 = arith.constant 0 : i32
    %c0_i32_0 = arith.constant 0 : i32
    %c0_i32_1 = arith.constant 0 : i32
    return %c0_i32, %c0_i32_0 : i32, i32
  }
  func.func @transform_8(%arg0: i32) -> (i32, i32) {
    %c0_i32 = arith.constant 0 : i32
    %c0_i32_0 = arith.constant 0 : i32
    %c0_i32_1 = arith.constant 0 : i32
    return %c0_i32, %c0_i32_0 : i32, i32
  }
  func.func @transform_9(%arg0: i32) -> (i32, i32) {
    %c0_i32 = arith.constant 0 : i32
    %c0_i32_0 = arith.constant 0 : i32
    %c0_i32_1 = arith.constant 0 : i32
    return %c0_i32, %c0_i32_0 : i32, i32
  }
  func.func @transform_10(%arg0: i32) -> (i32, i32) {
    %c0_i32 = arith.constant 0 : i32
    %c0_i32_0 = arith.constant 0 : i32
    %c0_i32_1 = arith.constant 0 : i32
    return %c0_i32, %c0_i32_0 : i32, i32
  }
  func.func @transform_11(%arg0: i32) -> (i32, i32) {
    %c0_i32 = arith.constant 0 : i32
    %c0_i32_0 = arith.constant 0 : i32
    %c0_i32_1 = arith.constant 0 : i32
    return %c0_i32, %c0_i32_0 : i32, i32
  }
  func.func @transform_12(%arg0: i32) -> (i32, i32) {
    %c0_i32 = arith.constant 0 : i32
    %c0_i32_0 = arith.constant 0 : i32
    %c0_i32_1 = arith.constant 0 : i32
    return %c0_i32, %c0_i32_0 : i32, i32
  }
  func.func @transform_13(%arg0: i32) -> (i32, i32) {
    %c0_i32 = arith.constant 0 : i32
    %c0_i32_0 = arith.constant 0 : i32
    %c0_i32_1 = arith.constant 0 : i32
    return %c0_i32, %c0_i32_0 : i32, i32
  }
  func.func @transform_14(%arg0: i32) -> (i32, i32) {
    %c0_i32 = arith.constant 0 : i32
    %c0_i32_0 = arith.constant 0 : i32
    %c0_i32_1 = arith.constant 0 : i32
    return %c0_i32, %c0_i32_0 : i32, i32
  }
  func.func @transform_15(%arg0: i32) -> (i32, i32) {
    %c0_i32 = arith.constant 0 : i32
    %c0_i32_0 = arith.constant 0 : i32
    %c0_i32_1 = arith.constant 0 : i32
    return %c0_i32, %c0_i32_0 : i32, i32
  }
  func.func @transform_16(%arg0: i32) -> (i32, i32) {
    %c0_i32 = arith.constant 0 : i32
    %c0_i32_0 = arith.constant 0 : i32
    %c0_i32_1 = arith.constant 0 : i32
    return %c0_i32, %c0_i32_0 : i32, i32
  }
  func.func @transform_17(%arg0: i32) -> (i32, i32, i32) {
    %c0_i32 = arith.constant 0 : i32
    %c0_i32_0 = arith.constant 0 : i32
    %c0_i32_1 = arith.constant 0 : i32
    return %arg0, %c0_i32, %c0_i32_0 : i32, i32, i32
  }
}

module attributes {stable_mosaic.version = 11 : i64} {
  func.func @_encoder_layer_kernel(%arg0: i32, %arg1: memref<2x8x32xf32, #tpu.memory_space<vmem>>, %arg2: memref<32x32xbf16, #tpu.memory_space<vmem>>, %arg3: memref<32x32xbf16, #tpu.memory_space<vmem>>, %arg4: memref<32x32xbf16, #tpu.memory_space<vmem>>, %arg5: memref<1x32xf32, #tpu.memory_space<vmem>>, %arg6: memref<1x32xf32, #tpu.memory_space<vmem>>, %arg7: memref<1x32xf32, #tpu.memory_space<vmem>>, %arg8: memref<32x32xbf16, #tpu.memory_space<vmem>>, %arg9: memref<1x32xf32, #tpu.memory_space<vmem>>, %arg10: memref<32x64xbf16, #tpu.memory_space<vmem>>, %arg11: memref<1x64xf32, #tpu.memory_space<vmem>>, %arg12: memref<64x32xbf16, #tpu.memory_space<vmem>>, %arg13: memref<1x32xf32, #tpu.memory_space<vmem>>, %arg14: memref<1x32xf32, #tpu.memory_space<vmem>>, %arg15: memref<1x32xf32, #tpu.memory_space<vmem>>, %arg16: memref<1x32xf32, #tpu.memory_space<vmem>>, %arg17: memref<1x32xf32, #tpu.memory_space<vmem>>, %arg18: memref<2x8x32xf32, #tpu.memory_space<vmem>>) attributes {dimension_semantics = [#tpu.dimension_semantics<parallel>], iteration_bounds = array<i64: 1>, scalar_prefetch = 0 : i64, scratch_operands = 0 : i64, tpu.core_type = #tpu.core_type<tc>, window_params = [{transform_indices = @transform_0, window_bounds = array<i64: 2, 8, 32>}, {pipeline_mode = #tpu.pipeline_mode<synchronous>, transform_indices = @transform_1, window_bounds = array<i64: 32, 32>}, {pipeline_mode = #tpu.pipeline_mode<synchronous>, transform_indices = @transform_2, window_bounds = array<i64: 32, 32>}, {pipeline_mode = #tpu.pipeline_mode<synchronous>, transform_indices = @transform_3, window_bounds = array<i64: 32, 32>}, {pipeline_mode = #tpu.pipeline_mode<synchronous>, transform_indices = @transform_4, window_bounds = array<i64: 1, 32>}, {pipeline_mode = #tpu.pipeline_mode<synchronous>, transform_indices = @transform_5, window_bounds = array<i64: 1, 32>}, {pipeline_mode = #tpu.pipeline_mode<synchronous>, transform_indices = @transform_6, window_bounds = array<i64: 1, 32>}, {pipeline_mode = #tpu.pipeline_mode<synchronous>, transform_indices = @transform_7, window_bounds = array<i64: 32, 32>}, {pipeline_mode = #tpu.pipeline_mode<synchronous>, transform_indices = @transform_8, window_bounds = array<i64: 1, 32>}, {pipeline_mode = #tpu.pipeline_mode<synchronous>, transform_indices = @transform_9, window_bounds = array<i64: 32, 64>}, {pipeline_mode = #tpu.pipeline_mode<synchronous>, transform_indices = @transform_10, window_bounds = array<i64: 1, 64>}, {pipeline_mode = #tpu.pipeline_mode<synchronous>, transform_indices = @transform_11, window_bounds = array<i64: 64, 32>}, {pipeline_mode = #tpu.pipeline_mode<synchronous>, transform_indices = @transform_12, window_bounds = array<i64: 1, 32>}, {pipeline_mode = #tpu.pipeline_mode<synchronous>, transform_indices = @transform_13, window_bounds = array<i64: 1, 32>}, {pipeline_mode = #tpu.pipeline_mode<synchronous>, transform_indices = @transform_14, window_bounds = array<i64: 1, 32>}, {pipeline_mode = #tpu.pipeline_mode<synchronous>, transform_indices = @transform_15, window_bounds = array<i64: 1, 32>}, {pipeline_mode = #tpu.pipeline_mode<synchronous>, transform_indices = @transform_16, window_bounds = array<i64: 1, 32>}, {transform_indices = @transform_17, window_bounds = array<i64: 2, 8, 32>}]} {
    %c0 = arith.constant 0 : index
    %c0_0 = arith.constant 0 : index
    %c0_1 = arith.constant 0 : index
    %0 = vector.load %arg1[%c0, %c0_0, %c0_1] : memref<2x8x32xf32, #tpu.memory_space<vmem>>, vector<2x8x32xf32>
    %1 = vector.shape_cast %0 : vector<2x8x32xf32> to vector<16x32xf32>
    %2 = arith.truncf %1 : vector<16x32xf32> to vector<16x32xbf16>
    %c0_2 = arith.constant 0 : index
    %c0_3 = arith.constant 0 : index
    %3 = vector.load %arg2[%c0_2, %c0_3] : memref<32x32xbf16, #tpu.memory_space<vmem>>, vector<32x32xbf16>
    %cst = arith.constant dense<0.000000e+00> : vector<16x32xf32>
    %4 = tpu.matmul %2, %3, %cst {dimension_numbers = #tpu.dot_dimension_numbers<[1], [0], [0], [1], [0, 0, 1, 1], [], []>} : vector<16x32xbf16>, vector<32x32xbf16>, vector<16x32xf32> -> vector<16x32xf32>
    %c0_4 = arith.constant 0 : index
    %c0_5 = arith.constant 0 : index
    %5 = vector.load %arg5[%c0_4, %c0_5] : memref<1x32xf32, #tpu.memory_space<vmem>>, vector<1x32xf32>
    %6 = vector.broadcast %5 : vector<1x32xf32> to vector<16x32xf32>
    %7 = arith.addf %4, %6 : vector<16x32xf32>
    %c0_6 = arith.constant 0 : index
    %c0_7 = arith.constant 0 : index
    %8 = vector.load %arg3[%c0_6, %c0_7] : memref<32x32xbf16, #tpu.memory_space<vmem>>, vector<32x32xbf16>
    %cst_8 = arith.constant dense<0.000000e+00> : vector<16x32xf32>
    %9 = tpu.matmul %2, %8, %cst_8 {dimension_numbers = #tpu.dot_dimension_numbers<[1], [0], [0], [1], [0, 0, 1, 1], [], []>} : vector<16x32xbf16>, vector<32x32xbf16>, vector<16x32xf32> -> vector<16x32xf32>
    %c0_9 = arith.constant 0 : index
    %c0_10 = arith.constant 0 : index
    %10 = vector.load %arg6[%c0_9, %c0_10] : memref<1x32xf32, #tpu.memory_space<vmem>>, vector<1x32xf32>
    %11 = vector.broadcast %10 : vector<1x32xf32> to vector<16x32xf32>
    %12 = arith.addf %9, %11 : vector<16x32xf32>
    %c0_11 = arith.constant 0 : index
    %c0_12 = arith.constant 0 : index
    %13 = vector.load %arg4[%c0_11, %c0_12] : memref<32x32xbf16, #tpu.memory_space<vmem>>, vector<32x32xbf16>
    %cst_13 = arith.constant dense<0.000000e+00> : vector<16x32xf32>
    %14 = tpu.matmul %2, %13, %cst_13 {dimension_numbers = #tpu.dot_dimension_numbers<[1], [0], [0], [1], [0, 0, 1, 1], [], []>} : vector<16x32xbf16>, vector<32x32xbf16>, vector<16x32xf32> -> vector<16x32xf32>
    %c0_14 = arith.constant 0 : index
    %c0_15 = arith.constant 0 : index
    %15 = vector.load %arg7[%c0_14, %c0_15] : memref<1x32xf32, #tpu.memory_space<vmem>>, vector<1x32xf32>
    %16 = vector.broadcast %15 : vector<1x32xf32> to vector<16x32xf32>
    %17 = arith.addf %14, %16 : vector<16x32xf32>
    %cst_16 = arith.constant 0.353553385 : f32
    %18 = vector.broadcast %cst_16 : f32 to vector<16x32xf32>
    %19 = arith.mulf %7, %18 : vector<16x32xf32>
    %20 = arith.truncf %19 : vector<16x32xf32> to vector<16x32xbf16>
    %21 = vector.shape_cast %20 : vector<16x32xbf16> to vector<2x8x32xbf16>
    %22 = arith.truncf %12 : vector<16x32xf32> to vector<16x32xbf16>
    %23 = vector.shape_cast %22 : vector<16x32xbf16> to vector<2x8x32xbf16>
    %24 = arith.truncf %17 : vector<16x32xf32> to vector<16x32xbf16>
    %25 = vector.shape_cast %24 : vector<16x32xbf16> to vector<2x8x32xbf16>
    %cst_17 = arith.constant 0.000000e+00 : f32
    %26 = vector.broadcast %cst_17 : f32 to vector<16x32xf32>
    %27 = vector.extract_strided_slice %21 {offsets = [0, 0, 0], sizes = [2, 8, 8], strides = [1, 1, 1]} : vector<2x8x32xbf16> to vector<2x8x8xbf16>
    %28 = vector.extract_strided_slice %23 {offsets = [0, 0, 0], sizes = [2, 8, 8], strides = [1, 1, 1]} : vector<2x8x32xbf16> to vector<2x8x8xbf16>
    %29 = vector.extract_strided_slice %25 {offsets = [0, 0, 0], sizes = [2, 8, 8], strides = [1, 1, 1]} : vector<2x8x32xbf16> to vector<2x8x8xbf16>
    "tpu.trace_start"() <{level = 10 : i32, message = "bqd,bkd->bqk"}> : () -> ()
    %cst_18 = arith.constant dense<0.000000e+00> : vector<2x8x8xf32>
    %30 = tpu.matmul %27, %28, %cst_18 {dimension_numbers = #tpu.dot_dimension_numbers<[2], [2], [1], [1], [0, 0, 0, 1, 1, 1], [0], [0]>} : vector<2x8x8xbf16>, vector<2x8x8xbf16>, vector<2x8x8xf32> -> vector<2x8x8xf32>
    "tpu.trace_stop"() : () -> ()
    %cst_19 = arith.constant dense<0xFF800000> : vector<2x8xf32>
    %31 = vector.multi_reduction <maximumf>, %30, %cst_19 [2] : vector<2x8x8xf32> to vector<2x8xf32>
    %32 = vector.shape_cast %31 : vector<2x8xf32> to vector<2x8x1xf32>
    %33 = vector.broadcast %32 : vector<2x8x1xf32> to vector<2x8x8xf32>
    %34 = arith.subf %30, %33 : vector<2x8x8xf32>
    %35 = math.exp %34 : vector<2x8x8xf32>
    %cst_20 = arith.constant dense<0.000000e+00> : vector<2x8xf32>
    %36 = vector.multi_reduction <add>, %35, %cst_20 [2] : vector<2x8x8xf32> to vector<2x8xf32>
    %37 = vector.shape_cast %36 : vector<2x8xf32> to vector<2x8x1xf32>
    %38 = tpu.reciprocal %37 {approx = true} : vector<2x8x1xf32> -> vector<2x8x1xf32>
    %39 = vector.broadcast %38 : vector<2x8x1xf32> to vector<2x8x8xf32>
    %40 = arith.mulf %35, %39 : vector<2x8x8xf32>
    %41 = arith.truncf %40 : vector<2x8x8xf32> to vector<2x8x8xbf16>
    "tpu.trace_start"() <{level = 10 : i32, message = "bqk,bkd->bqd"}> : () -> ()
    %cst_21 = arith.constant dense<0.000000e+00> : vector<2x8x8xf32>
    %42 = tpu.matmul %41, %29, %cst_21 {dimension_numbers = #tpu.dot_dimension_numbers<[2], [1], [1], [2], [0, 0, 0, 1, 1, 2], [0], [0]>} : vector<2x8x8xbf16>, vector<2x8x8xbf16>, vector<2x8x8xf32> -> vector<2x8x8xf32>
    "tpu.trace_stop"() : () -> ()
    %43 = vector.shape_cast %42 : vector<2x8x8xf32> to vector<16x8xf32>
    %44 = arith.truncf %43 : vector<16x8xf32> to vector<16x8xbf16>
    %c0_22 = arith.constant 0 : index
    %c0_23 = arith.constant 0 : index
    %45 = vector.load %arg8[%c0_22, %c0_23] : memref<32x32xbf16, #tpu.memory_space<vmem>>, vector<8x32xbf16>
    %cst_24 = arith.constant dense<0.000000e+00> : vector<16x32xf32>
    %46 = tpu.matmul %44, %45, %cst_24 {dimension_numbers = #tpu.dot_dimension_numbers<[1], [0], [0], [1], [0, 0, 1, 1], [], []>} : vector<16x8xbf16>, vector<8x32xbf16>, vector<16x32xf32> -> vector<16x32xf32>
    %47 = arith.addf %26, %46 : vector<16x32xf32>
    %48 = vector.extract_strided_slice %21 {offsets = [0, 0, 8], sizes = [2, 8, 8], strides = [1, 1, 1]} : vector<2x8x32xbf16> to vector<2x8x8xbf16>
    %49 = vector.extract_strided_slice %23 {offsets = [0, 0, 8], sizes = [2, 8, 8], strides = [1, 1, 1]} : vector<2x8x32xbf16> to vector<2x8x8xbf16>
    %50 = vector.extract_strided_slice %25 {offsets = [0, 0, 8], sizes = [2, 8, 8], strides = [1, 1, 1]} : vector<2x8x32xbf16> to vector<2x8x8xbf16>
    "tpu.trace_start"() <{level = 10 : i32, message = "bqd,bkd->bqk"}> : () -> ()
    %cst_25 = arith.constant dense<0.000000e+00> : vector<2x8x8xf32>
    %51 = tpu.matmul %48, %49, %cst_25 {dimension_numbers = #tpu.dot_dimension_numbers<[2], [2], [1], [1], [0, 0, 0, 1, 1, 1], [0], [0]>} : vector<2x8x8xbf16>, vector<2x8x8xbf16>, vector<2x8x8xf32> -> vector<2x8x8xf32>
    "tpu.trace_stop"() : () -> ()
    %cst_26 = arith.constant dense<0xFF800000> : vector<2x8xf32>
    %52 = vector.multi_reduction <maximumf>, %51, %cst_26 [2] : vector<2x8x8xf32> to vector<2x8xf32>
    %53 = vector.shape_cast %52 : vector<2x8xf32> to vector<2x8x1xf32>
    %54 = vector.broadcast %53 : vector<2x8x1xf32> to vector<2x8x8xf32>
    %55 = arith.subf %51, %54 : vector<2x8x8xf32>
    %56 = math.exp %55 : vector<2x8x8xf32>
    %cst_27 = arith.constant dense<0.000000e+00> : vector<2x8xf32>
    %57 = vector.multi_reduction <add>, %56, %cst_27 [2] : vector<2x8x8xf32> to vector<2x8xf32>
    %58 = vector.shape_cast %57 : vector<2x8xf32> to vector<2x8x1xf32>
    %59 = tpu.reciprocal %58 {approx = true} : vector<2x8x1xf32> -> vector<2x8x1xf32>
    %60 = vector.broadcast %59 : vector<2x8x1xf32> to vector<2x8x8xf32>
    %61 = arith.mulf %56, %60 : vector<2x8x8xf32>
    %62 = arith.truncf %61 : vector<2x8x8xf32> to vector<2x8x8xbf16>
    "tpu.trace_start"() <{level = 10 : i32, message = "bqk,bkd->bqd"}> : () -> ()
    %cst_28 = arith.constant dense<0.000000e+00> : vector<2x8x8xf32>
    %63 = tpu.matmul %62, %50, %cst_28 {dimension_numbers = #tpu.dot_dimension_numbers<[2], [1], [1], [2], [0, 0, 0, 1, 1, 2], [0], [0]>} : vector<2x8x8xbf16>, vector<2x8x8xbf16>, vector<2x8x8xf32> -> vector<2x8x8xf32>
    "tpu.trace_stop"() : () -> ()
    %64 = vector.shape_cast %63 : vector<2x8x8xf32> to vector<16x8xf32>
    %65 = arith.truncf %64 : vector<16x8xf32> to vector<16x8xbf16>
    %c8 = arith.constant 8 : index
    %c0_29 = arith.constant 0 : index
    %66 = vector.load %arg8[%c8, %c0_29] : memref<32x32xbf16, #tpu.memory_space<vmem>>, vector<8x32xbf16>
    %cst_30 = arith.constant dense<0.000000e+00> : vector<16x32xf32>
    %67 = tpu.matmul %65, %66, %cst_30 {dimension_numbers = #tpu.dot_dimension_numbers<[1], [0], [0], [1], [0, 0, 1, 1], [], []>} : vector<16x8xbf16>, vector<8x32xbf16>, vector<16x32xf32> -> vector<16x32xf32>
    %68 = arith.addf %47, %67 : vector<16x32xf32>
    %69 = vector.extract_strided_slice %21 {offsets = [0, 0, 16], sizes = [2, 8, 8], strides = [1, 1, 1]} : vector<2x8x32xbf16> to vector<2x8x8xbf16>
    %70 = vector.extract_strided_slice %23 {offsets = [0, 0, 16], sizes = [2, 8, 8], strides = [1, 1, 1]} : vector<2x8x32xbf16> to vector<2x8x8xbf16>
    %71 = vector.extract_strided_slice %25 {offsets = [0, 0, 16], sizes = [2, 8, 8], strides = [1, 1, 1]} : vector<2x8x32xbf16> to vector<2x8x8xbf16>
    "tpu.trace_start"() <{level = 10 : i32, message = "bqd,bkd->bqk"}> : () -> ()
    %cst_31 = arith.constant dense<0.000000e+00> : vector<2x8x8xf32>
    %72 = tpu.matmul %69, %70, %cst_31 {dimension_numbers = #tpu.dot_dimension_numbers<[2], [2], [1], [1], [0, 0, 0, 1, 1, 1], [0], [0]>} : vector<2x8x8xbf16>, vector<2x8x8xbf16>, vector<2x8x8xf32> -> vector<2x8x8xf32>
    "tpu.trace_stop"() : () -> ()
    %cst_32 = arith.constant dense<0xFF800000> : vector<2x8xf32>
    %73 = vector.multi_reduction <maximumf>, %72, %cst_32 [2] : vector<2x8x8xf32> to vector<2x8xf32>
    %74 = vector.shape_cast %73 : vector<2x8xf32> to vector<2x8x1xf32>
    %75 = vector.broadcast %74 : vector<2x8x1xf32> to vector<2x8x8xf32>
    %76 = arith.subf %72, %75 : vector<2x8x8xf32>
    %77 = math.exp %76 : vector<2x8x8xf32>
    %cst_33 = arith.constant dense<0.000000e+00> : vector<2x8xf32>
    %78 = vector.multi_reduction <add>, %77, %cst_33 [2] : vector<2x8x8xf32> to vector<2x8xf32>
    %79 = vector.shape_cast %78 : vector<2x8xf32> to vector<2x8x1xf32>
    %80 = tpu.reciprocal %79 {approx = true} : vector<2x8x1xf32> -> vector<2x8x1xf32>
    %81 = vector.broadcast %80 : vector<2x8x1xf32> to vector<2x8x8xf32>
    %82 = arith.mulf %77, %81 : vector<2x8x8xf32>
    %83 = arith.truncf %82 : vector<2x8x8xf32> to vector<2x8x8xbf16>
    "tpu.trace_start"() <{level = 10 : i32, message = "bqk,bkd->bqd"}> : () -> ()
    %cst_34 = arith.constant dense<0.000000e+00> : vector<2x8x8xf32>
    %84 = tpu.matmul %83, %71, %cst_34 {dimension_numbers = #tpu.dot_dimension_numbers<[2], [1], [1], [2], [0, 0, 0, 1, 1, 2], [0], [0]>} : vector<2x8x8xbf16>, vector<2x8x8xbf16>, vector<2x8x8xf32> -> vector<2x8x8xf32>
    "tpu.trace_stop"() : () -> ()
    %85 = vector.shape_cast %84 : vector<2x8x8xf32> to vector<16x8xf32>
    %86 = arith.truncf %85 : vector<16x8xf32> to vector<16x8xbf16>
    %c16 = arith.constant 16 : index
    %c0_35 = arith.constant 0 : index
    %87 = vector.load %arg8[%c16, %c0_35] : memref<32x32xbf16, #tpu.memory_space<vmem>>, vector<8x32xbf16>
    %cst_36 = arith.constant dense<0.000000e+00> : vector<16x32xf32>
    %88 = tpu.matmul %86, %87, %cst_36 {dimension_numbers = #tpu.dot_dimension_numbers<[1], [0], [0], [1], [0, 0, 1, 1], [], []>} : vector<16x8xbf16>, vector<8x32xbf16>, vector<16x32xf32> -> vector<16x32xf32>
    %89 = arith.addf %68, %88 : vector<16x32xf32>
    %90 = vector.extract_strided_slice %21 {offsets = [0, 0, 24], sizes = [2, 8, 8], strides = [1, 1, 1]} : vector<2x8x32xbf16> to vector<2x8x8xbf16>
    %91 = vector.extract_strided_slice %23 {offsets = [0, 0, 24], sizes = [2, 8, 8], strides = [1, 1, 1]} : vector<2x8x32xbf16> to vector<2x8x8xbf16>
    %92 = vector.extract_strided_slice %25 {offsets = [0, 0, 24], sizes = [2, 8, 8], strides = [1, 1, 1]} : vector<2x8x32xbf16> to vector<2x8x8xbf16>
    "tpu.trace_start"() <{level = 10 : i32, message = "bqd,bkd->bqk"}> : () -> ()
    %cst_37 = arith.constant dense<0.000000e+00> : vector<2x8x8xf32>
    %93 = tpu.matmul %90, %91, %cst_37 {dimension_numbers = #tpu.dot_dimension_numbers<[2], [2], [1], [1], [0, 0, 0, 1, 1, 1], [0], [0]>} : vector<2x8x8xbf16>, vector<2x8x8xbf16>, vector<2x8x8xf32> -> vector<2x8x8xf32>
    "tpu.trace_stop"() : () -> ()
    %cst_38 = arith.constant dense<0xFF800000> : vector<2x8xf32>
    %94 = vector.multi_reduction <maximumf>, %93, %cst_38 [2] : vector<2x8x8xf32> to vector<2x8xf32>
    %95 = vector.shape_cast %94 : vector<2x8xf32> to vector<2x8x1xf32>
    %96 = vector.broadcast %95 : vector<2x8x1xf32> to vector<2x8x8xf32>
    %97 = arith.subf %93, %96 : vector<2x8x8xf32>
    %98 = math.exp %97 : vector<2x8x8xf32>
    %cst_39 = arith.constant dense<0.000000e+00> : vector<2x8xf32>
    %99 = vector.multi_reduction <add>, %98, %cst_39 [2] : vector<2x8x8xf32> to vector<2x8xf32>
    %100 = vector.shape_cast %99 : vector<2x8xf32> to vector<2x8x1xf32>
    %101 = tpu.reciprocal %100 {approx = true} : vector<2x8x1xf32> -> vector<2x8x1xf32>
    %102 = vector.broadcast %101 : vector<2x8x1xf32> to vector<2x8x8xf32>
    %103 = arith.mulf %98, %102 : vector<2x8x8xf32>
    %104 = arith.truncf %103 : vector<2x8x8xf32> to vector<2x8x8xbf16>
    "tpu.trace_start"() <{level = 10 : i32, message = "bqk,bkd->bqd"}> : () -> ()
    %cst_40 = arith.constant dense<0.000000e+00> : vector<2x8x8xf32>
    %105 = tpu.matmul %104, %92, %cst_40 {dimension_numbers = #tpu.dot_dimension_numbers<[2], [1], [1], [2], [0, 0, 0, 1, 1, 2], [0], [0]>} : vector<2x8x8xbf16>, vector<2x8x8xbf16>, vector<2x8x8xf32> -> vector<2x8x8xf32>
    "tpu.trace_stop"() : () -> ()
    %106 = vector.shape_cast %105 : vector<2x8x8xf32> to vector<16x8xf32>
    %107 = arith.truncf %106 : vector<16x8xf32> to vector<16x8xbf16>
    %c24 = arith.constant 24 : index
    %c0_41 = arith.constant 0 : index
    %108 = vector.load %arg8[%c24, %c0_41] : memref<32x32xbf16, #tpu.memory_space<vmem>>, vector<8x32xbf16>
    %cst_42 = arith.constant dense<0.000000e+00> : vector<16x32xf32>
    %109 = tpu.matmul %107, %108, %cst_42 {dimension_numbers = #tpu.dot_dimension_numbers<[1], [0], [0], [1], [0, 0, 1, 1], [], []>} : vector<16x8xbf16>, vector<8x32xbf16>, vector<16x32xf32> -> vector<16x32xf32>
    %110 = arith.addf %89, %109 : vector<16x32xf32>
    %111 = arith.addf %1, %110 : vector<16x32xf32>
    %c0_43 = arith.constant 0 : index
    %c0_44 = arith.constant 0 : index
    %112 = vector.load %arg9[%c0_43, %c0_44] : memref<1x32xf32, #tpu.memory_space<vmem>>, vector<1x32xf32>
    %113 = vector.broadcast %112 : vector<1x32xf32> to vector<16x32xf32>
    %114 = arith.addf %111, %113 : vector<16x32xf32>
    %c0_45 = arith.constant 0 : index
    %c0_46 = arith.constant 0 : index
    %115 = vector.load %arg14[%c0_45, %c0_46] : memref<1x32xf32, #tpu.memory_space<vmem>>, vector<1x32xf32>
    %c0_47 = arith.constant 0 : index
    %c0_48 = arith.constant 0 : index
    %116 = vector.load %arg15[%c0_47, %c0_48] : memref<1x32xf32, #tpu.memory_space<vmem>>, vector<1x32xf32>
    %cst_49 = arith.constant dense<0.000000e+00> : vector<16xf32>
    %117 = vector.multi_reduction <add>, %114, %cst_49 [1] : vector<16x32xf32> to vector<16xf32>
    %118 = vector.shape_cast %117 : vector<16xf32> to vector<16x1xf32>
    %119 = arith.mulf %114, %114 : vector<16x32xf32>
    %cst_50 = arith.constant dense<0.000000e+00> : vector<16xf32>
    %120 = vector.multi_reduction <add>, %119, %cst_50 [1] : vector<16x32xf32> to vector<16xf32>
    %121 = vector.shape_cast %120 : vector<16xf32> to vector<16x1xf32>
    %cst_51 = arith.constant 3.125000e-02 : f32
    %122 = vector.broadcast %cst_51 : f32 to vector<16x1xf32>
    %123 = arith.mulf %118, %122 : vector<16x1xf32>
    %cst_52 = arith.constant 3.125000e-02 : f32
    %124 = vector.broadcast %cst_52 : f32 to vector<16x1xf32>
    %125 = arith.mulf %121, %124 : vector<16x1xf32>
    %126 = arith.mulf %123, %123 : vector<16x1xf32>
    %127 = arith.subf %125, %126 : vector<16x1xf32>
    %cst_53 = arith.constant 0.000000e+00 : f32
    %128 = vector.broadcast %cst_53 : f32 to vector<16x1xf32>
    %129 = arith.maximumf %127, %128 : vector<16x1xf32>
    %130 = vector.broadcast %123 : vector<16x1xf32> to vector<16x32xf32>
    %131 = arith.subf %114, %130 : vector<16x32xf32>
    %cst_54 = arith.constant 9.99999974E-6 : f32
    %132 = vector.broadcast %cst_54 : f32 to vector<16x1xf32>
    %133 = arith.addf %129, %132 : vector<16x1xf32>
    %134 = math.rsqrt %133 : vector<16x1xf32>
    %135 = vector.broadcast %134 : vector<16x1xf32> to vector<16x32xf32>
    %136 = arith.mulf %131, %135 : vector<16x32xf32>
    %137 = vector.broadcast %115 : vector<1x32xf32> to vector<16x32xf32>
    %138 = arith.mulf %136, %137 : vector<16x32xf32>
    %139 = vector.broadcast %116 : vector<1x32xf32> to vector<16x32xf32>
    %140 = arith.addf %138, %139 : vector<16x32xf32>
    %141 = arith.truncf %140 : vector<16x32xf32> to vector<16x32xbf16>
    %cst_55 = arith.constant 0.000000e+00 : f32
    %142 = vector.broadcast %cst_55 : f32 to vector<16x32xf32>
    %c0_56 = arith.constant 0 : index
    %c0_57 = arith.constant 0 : index
    %143 = vector.load %arg10[%c0_56, %c0_57] : memref<32x64xbf16, #tpu.memory_space<vmem>>, vector<32x64xbf16>
    %cst_58 = arith.constant dense<0.000000e+00> : vector<16x64xf32>
    %144 = tpu.matmul %141, %143, %cst_58 {dimension_numbers = #tpu.dot_dimension_numbers<[1], [0], [0], [1], [0, 0, 1, 1], [], []>} : vector<16x32xbf16>, vector<32x64xbf16>, vector<16x64xf32> -> vector<16x64xf32>
    %c0_59 = arith.constant 0 : index
    %c0_60 = arith.constant 0 : index
    %145 = vector.load %arg11[%c0_59, %c0_60] : memref<1x64xf32, #tpu.memory_space<vmem>>, vector<1x64xf32>
    %146 = vector.broadcast %145 : vector<1x64xf32> to vector<16x64xf32>
    %147 = arith.addf %144, %146 : vector<16x64xf32>
    %cst_61 = arith.constant 5.000000e-01 : f32
    %148 = vector.broadcast %cst_61 : f32 to vector<16x64xf32>
    %149 = arith.mulf %148, %147 : vector<16x64xf32>
    %cst_62 = arith.constant 0.707106769 : f32
    %150 = vector.broadcast %cst_62 : f32 to vector<16x64xf32>
    %151 = arith.mulf %147, %150 : vector<16x64xf32>
    %152 = math.erf %151 : vector<16x64xf32>
    %cst_63 = arith.constant 1.000000e+00 : f32
    %153 = vector.broadcast %cst_63 : f32 to vector<16x64xf32>
    %154 = arith.addf %153, %152 : vector<16x64xf32>
    %155 = arith.mulf %149, %154 : vector<16x64xf32>
    %156 = arith.truncf %155 : vector<16x64xf32> to vector<16x64xbf16>
    %c0_64 = arith.constant 0 : index
    %c0_65 = arith.constant 0 : index
    %157 = vector.load %arg12[%c0_64, %c0_65] : memref<64x32xbf16, #tpu.memory_space<vmem>>, vector<64x32xbf16>
    %cst_66 = arith.constant dense<0.000000e+00> : vector<16x32xf32>
    %158 = tpu.matmul %156, %157, %cst_66 {dimension_numbers = #tpu.dot_dimension_numbers<[1], [0], [0], [1], [0, 0, 1, 1], [], []>} : vector<16x64xbf16>, vector<64x32xbf16>, vector<16x32xf32> -> vector<16x32xf32>
    %159 = arith.addf %142, %158 : vector<16x32xf32>
    %160 = arith.addf %140, %159 : vector<16x32xf32>
    %c0_67 = arith.constant 0 : index
    %c0_68 = arith.constant 0 : index
    %161 = vector.load %arg13[%c0_67, %c0_68] : memref<1x32xf32, #tpu.memory_space<vmem>>, vector<1x32xf32>
    %162 = vector.broadcast %161 : vector<1x32xf32> to vector<16x32xf32>
    %163 = arith.addf %160, %162 : vector<16x32xf32>
    %c0_69 = arith.constant 0 : index
    %c0_70 = arith.constant 0 : index
    %164 = vector.load %arg16[%c0_69, %c0_70] : memref<1x32xf32, #tpu.memory_space<vmem>>, vector<1x32xf32>
    %c0_71 = arith.constant 0 : index
    %c0_72 = arith.constant 0 : index
    %165 = vector.load %arg17[%c0_71, %c0_72] : memref<1x32xf32, #tpu.memory_space<vmem>>, vector<1x32xf32>
    %cst_73 = arith.constant dense<0.000000e+00> : vector<16xf32>
    %166 = vector.multi_reduction <add>, %163, %cst_73 [1] : vector<16x32xf32> to vector<16xf32>
    %167 = vector.shape_cast %166 : vector<16xf32> to vector<16x1xf32>
    %168 = arith.mulf %163, %163 : vector<16x32xf32>
    %cst_74 = arith.constant dense<0.000000e+00> : vector<16xf32>
    %169 = vector.multi_reduction <add>, %168, %cst_74 [1] : vector<16x32xf32> to vector<16xf32>
    %170 = vector.shape_cast %169 : vector<16xf32> to vector<16x1xf32>
    %cst_75 = arith.constant 3.125000e-02 : f32
    %171 = vector.broadcast %cst_75 : f32 to vector<16x1xf32>
    %172 = arith.mulf %167, %171 : vector<16x1xf32>
    %cst_76 = arith.constant 3.125000e-02 : f32
    %173 = vector.broadcast %cst_76 : f32 to vector<16x1xf32>
    %174 = arith.mulf %170, %173 : vector<16x1xf32>
    %175 = arith.mulf %172, %172 : vector<16x1xf32>
    %176 = arith.subf %174, %175 : vector<16x1xf32>
    %cst_77 = arith.constant 0.000000e+00 : f32
    %177 = vector.broadcast %cst_77 : f32 to vector<16x1xf32>
    %178 = arith.maximumf %176, %177 : vector<16x1xf32>
    %179 = vector.broadcast %172 : vector<16x1xf32> to vector<16x32xf32>
    %180 = arith.subf %163, %179 : vector<16x32xf32>
    %cst_78 = arith.constant 9.99999974E-6 : f32
    %181 = vector.broadcast %cst_78 : f32 to vector<16x1xf32>
    %182 = arith.addf %178, %181 : vector<16x1xf32>
    %183 = math.rsqrt %182 : vector<16x1xf32>
    %184 = vector.broadcast %183 : vector<16x1xf32> to vector<16x32xf32>
    %185 = arith.mulf %180, %184 : vector<16x32xf32>
    %186 = vector.broadcast %164 : vector<1x32xf32> to vector<16x32xf32>
    %187 = arith.mulf %185, %186 : vector<16x32xf32>
    %188 = vector.broadcast %165 : vector<1x32xf32> to vector<16x32xf32>
    %189 = arith.addf %187, %188 : vector<16x32xf32>
    %190 = vector.shape_cast %189 : vector<16x32xf32> to vector<2x8x32xf32>
    %c0_79 = arith.constant 0 : index
    %c0_80 = arith.constant 0 : index
    %c0_81 = arith.constant 0 : index
    %191 = vector.load %arg18[%c0_79, %c0_80, %c0_81] : memref<2x8x32xf32, #tpu.memory_space<vmem>>, vector<2x8x32xf32>
    tpu.vector_store %arg18[%c0_79, %c0_80, %c0_81], %190 {strides = array<i32>} : memref<2x8x32xf32, #tpu.memory_space<vmem>>, vector<2x8x32xf32>,
    return
  }
  func.func @transform_0(%arg0: i32) -> (i32, i32, i32) {
    %c0_i32 = arith.constant 0 : i32
    %c0_i32_0 = arith.constant 0 : i32
    %c0_i32_1 = arith.constant 0 : i32
    return %arg0, %c0_i32, %c0_i32_0 : i32, i32, i32
  }
  func.func @transform_1(%arg0: i32) -> (i32, i32) {
    %c0_i32 = arith.constant 0 : i32
    %c0_i32_0 = arith.constant 0 : i32
    %c0_i32_1 = arith.constant 0 : i32
    return %c0_i32, %c0_i32_0 : i32, i32
  }
  func.func @transform_2(%arg0: i32) -> (i32, i32) {
    %c0_i32 = arith.constant 0 : i32
    %c0_i32_0 = arith.constant 0 : i32
    %c0_i32_1 = arith.constant 0 : i32
    return %c0_i32, %c0_i32_0 : i32, i32
  }
  func.func @transform_3(%arg0: i32) -> (i32, i32) {
    %c0_i32 = arith.constant 0 : i32
    %c0_i32_0 = arith.constant 0 : i32
    %c0_i32_1 = arith.constant 0 : i32
    return %c0_i32, %c0_i32_0 : i32, i32
  }
  func.func @transform_4(%arg0: i32) -> (i32, i32) {
    %c0_i32 = arith.constant 0 : i32
    %c0_i32_0 = arith.constant 0 : i32
    %c0_i32_1 = arith.constant 0 : i32
    return %c0_i32, %c0_i32_0 : i32, i32
  }
  func.func @transform_5(%arg0: i32) -> (i32, i32) {
    %c0_i32 = arith.constant 0 : i32
    %c0_i32_0 = arith.constant 0 : i32
    %c0_i32_1 = arith.constant 0 : i32
    return %c0_i32, %c0_i32_0 : i32, i32
  }
  func.func @transform_6(%arg0: i32) -> (i32, i32) {
    %c0_i32 = arith.constant 0 : i32
    %c0_i32_0 = arith.constant 0 : i32
    %c0_i32_1 = arith.constant 0 : i32
    return %c0_i32, %c0_i32_0 : i32, i32
  }
  func.func @transform_7(%arg0: i32) -> (i32, i32) {
    %c0_i32 = arith.constant 0 : i32
    %c0_i32_0 = arith.constant 0 : i32
    %c0_i32_1 = arith.constant 0 : i32
    return %c0_i32, %c0_i32_0 : i32, i32
  }
  func.func @transform_8(%arg0: i32) -> (i32, i32) {
    %c0_i32 = arith.constant 0 : i32
    %c0_i32_0 = arith.constant 0 : i32
    %c0_i32_1 = arith.constant 0 : i32
    return %c0_i32, %c0_i32_0 : i32, i32
  }
  func.func @transform_9(%arg0: i32) -> (i32, i32) {
    %c0_i32 = arith.constant 0 : i32
    %c0_i32_0 = arith.constant 0 : i32
    %c0_i32_1 = arith.constant 0 : i32
    return %c0_i32, %c0_i32_0 : i32, i32
  }
  func.func @transform_10(%arg0: i32) -> (i32, i32) {
    %c0_i32 = arith.constant 0 : i32
    %c0_i32_0 = arith.constant 0 : i32
    %c0_i32_1 = arith.constant 0 : i32
    return %c0_i32, %c0_i32_0 : i32, i32
  }
  func.func @transform_11(%arg0: i32) -> (i32, i32) {
    %c0_i32 = arith.constant 0 : i32
    %c0_i32_0 = arith.constant 0 : i32
    %c0_i32_1 = arith.constant 0 : i32
    return %c0_i32, %c0_i32_0 : i32, i32
  }
  func.func @transform_12(%arg0: i32) -> (i32, i32) {
    %c0_i32 = arith.constant 0 : i32
    %c0_i32_0 = arith.constant 0 : i32
    %c0_i32_1 = arith.constant 0 : i32
    return %c0_i32, %c0_i32_0 : i32, i32
  }
  func.func @transform_13(%arg0: i32) -> (i32, i32) {
    %c0_i32 = arith.constant 0 : i32
    %c0_i32_0 = arith.constant 0 : i32
    %c0_i32_1 = arith.constant 0 : i32
    return %c0_i32, %c0_i32_0 : i32, i32
  }
  func.func @transform_14(%arg0: i32) -> (i32, i32) {
    %c0_i32 = arith.constant 0 : i32
    %c0_i32_0 = arith.constant 0 : i32
    %c0_i32_1 = arith.constant 0 : i32
    return %c0_i32, %c0_i32_0 : i32, i32
  }
  func.func @transform_15(%arg0: i32) -> (i32, i32) {
    %c0_i32 = arith.constant 0 : i32
    %c0_i32_0 = arith.constant 0 : i32
    %c0_i32_1 = arith.constant 0 : i32
    return %c0_i32, %c0_i32_0 : i32, i32
  }
  func.func @transform_16(%arg0: i32) -> (i32, i32) {
    %c0_i32 = arith.constant 0 : i32
    %c0_i32_0 = arith.constant 0 : i32
    %c0_i32_1 = arith.constant 0 : i32
    return %c0_i32, %c0_i32_0 : i32, i32
  }
  func.func @transform_17(%arg0: i32) -> (i32, i32, i32) {
    %c0_i32 = arith.constant 0 : i32
    %c0_i32_0 = arith.constant 0 : i32
    %c0_i32_1 = arith.constant 0 : i32
    return %arg0, %c0_i32, %c0_i32_0 : i32, i32, i32
  }
}

</mosaic_0001>

<bundles_post_ra>
// kernel: tpu_custom_call.1
= control target key start
LH: loop header
LB: loop body
LE: loop exit
PB: predicated region body
PF: predicated region fallthrough
CT: control target
= control target key end

     0   :  { %s2625_s0 = inlined_call_operand.vmem [shape: f32[2,8,32], index: 0, kind: input, shape index: {}]   ;;  %s2626_s1 = inlined_call_operand.vmem [shape: bf16[32,32], index: 1, kind: input, shape index: {}]   ;;  %s2627_s2 = inlined_call_operand.vmem [shape: bf16[32,32], index: 2, kind: input, shape index: {}]   ;;  %s2628_s3 = inlined_call_operand.hbm [shape: bf16[32,32], index: 3, kind: input, shape index: {}]   ;;  %s2629_s4 = inlined_call_operand.vmem [shape: f32[1,32], index: 4, kind: input, shape index: {}]   ;;  %s2630_s5 = inlined_call_operand.vmem [shape: f32[1,32], index: 5, kind: input, shape index: {}]   ;;  %s2631_s6 = inlined_call_operand.hbm [shape: f32[1,32], index: 6, kind: input, shape index: {}]   ;;  %s2632_s7 = inlined_call_operand.hbm [shape: bf16[32,32], index: 7, kind: input, shape index: {}]   ;;  %s2633_s8 = inlined_call_operand.hbm [shape: f32[1,32], index: 8, kind: input, shape index: {}]   ;;  %s2634_s9 = inlined_call_operand.vmem [shape: bf16[32,64], index: 9, kind: input, shape index: {}]   ;;  %s2635_s10 = inlined_call_operand.vmem [shape: f32[1,64], index: 10, kind: input, shape index: {}]   ;;  %s2636_s11 = inlined_call_operand.vmem [shape: bf16[64,32], index: 11, kind: input, shape index: {}]   ;;  %s2637_s12 = inlined_call_operand.vmem [shape: f32[1,32], index: 12, kind: input, shape index: {}]   ;;  %s2638_s13 = inlined_call_operand.vmem [shape: f32[1,32], index: 13, kind: input, shape index: {}]   ;;  %s2639_s14 = inlined_call_operand.vmem [shape: f32[1,32], index: 14, kind: input, shape index: {}]   ;;  %s2640_s15 = inlined_call_operand.vmem [shape: f32[1,32], index: 15, kind: input, shape index: {}]   ;;  %s2641_s16 = inlined_call_operand.vmem [shape: f32[1,32], index: 16, kind: input, shape index: {}]   ;;  %s2642_s17 = inlined_call_operand.hbm [shape: f32[2,8,32], index: 17, kind: output, shape index: {}]  }
   0x1   :  { %2645 = sst [smem:[#allocation15_spill]] %s2625_s0 }
   0x2   :  { %2646 = sst [smem:[#allocation16_spill]] %s2626_s1 }
   0x3   :  { %22 = vsyncpa [#allocation3], 0 }
   0x4   :  { %23 = vsyncpa [#allocation6], 0 }
   0x5   :  { %24 = vsyncpa [#allocation9], 0 }
   0x6   :  { %25 = vsyncpa [#allocation4], 0  ;;  %s2165_s24 = smov [#allocation5]   ;;  %s2166_s26 = smov [#allocation2]  }
   0x7   :  { %s54_s25 = sshll.u32 %s2165_s24, 4  ;;  %s37_s27 = sshll.u32 %s2166_s26, 4  ;;  %s55_s25 = int_to_ptr.vmem [resolvable:$true] %s54_s25  ;;  %s2269_s27 = int_to_ptr.vmem [resolvable:$true] %s37_s27 }
   0x8   :  { %s2047_s0 = scalar_lea.hbm %s2631_s6, 16 }
   0x9   :  { %p2048_p0 = scmp.ne.s32.totalorder %s2631_s6, %s2047_s0  ;;  %p2051_p1 = scmp.lt.u32.totalorder %s2047_s0, %s2631_s6 }
   0xb   :  { %p2053_p2 = pnand %p2051_p1, %p2048_p0 }
   0xd   :  { %2056 = shalt.err (!%p2053_p2)
}
   0xe   :  { %s2057_s20 = scalar_lea.vmem %s55_s25, 16  ;;  %s2061_s21 = scalar_lea.vmem %s55_s25, 32 }
   0xf   :  { %p2058_p3 = scmp.ne.s32.totalorder %s55_s25, %s2057_s20  ;;  %p2062_p4 = scmp.lt.s32.totalorder %s55_s25, %s55_s25 }
  0x10   :  { %p2063_p5 = scmp.lt.s32.totalorder %s2061_s21, %s2057_s20 }
  0x12   :  { %p2064_p6 = por %p2063_p5, %p2062_p4 }
  0x14   :  { %p2065_p7 = pnand %p2064_p6, %p2058_p3 }
  0x16   :  { %2068 = shalt.err (!%p2065_p7)
}
  0x17   :  { %57 = dma.hbm_to_vmem [thread:$0]  %s2631_s6, 16, %s55_s25, [#allocation6]  }
  0x18   :  { %s2069_s28 = scalar_lea.hbm %s2628_s3, 256 }
  0x19   :  { %p2070_p8 = scmp.ne.s32.totalorder %s2628_s3, %s2069_s28  ;;  %p2073_p9 = scmp.lt.u32.totalorder %s2069_s28, %s2628_s3 }
  0x1b   :  { %p2075_p10 = pnand %p2073_p9, %p2070_p8 }
  0x1d   :  { %2078 = shalt.err (!%p2075_p10)
}
  0x1e   :  { %s2079_s19 = scalar_lea.vmem %s2269_s27, 256  ;;  %p2084_p12 = scmp.lt.s32.totalorder %s2269_s27, %s2269_s27 }
  0x1f   :  { %p2080_p11 = scmp.ne.s32.totalorder %s2269_s27, %s2079_s19  ;;  %p2085_p13 = scmp.lt.s32.totalorder %s2079_s19, %s2079_s19 }
  0x21   :  { %p2086_p0 = por %p2085_p13, %p2084_p12 }
  0x23   :  { %p2087_p1 = pnand %p2086_p0, %p2080_p11 }
  0x25   :  { %2090 = shalt.err (!%p2087_p1)
}
  0x26   :  { %s2167_s6 = smov 64   ;;  %s2168_s25 = smov 4  }
  0x27   :  { %43 = dma.hbm_to_vmem [thread:$0]  %s2628_s3, 256, %s2269_s27, [#allocation3], %s2167_s6, %s2167_s6, %s2168_s25  }
  0x28   :  { %s2169_s21 = smov [#allocation7]   ;;  %s2170_s23 = smov [#allocation8]  }
  0x29   :  { %s63_s22 = sshll.u32 %s2169_s21, 4  ;;  %s76_s24 = sshll.u32 %s2170_s23, 4  ;;  %s64_s22 = int_to_ptr.vmem [resolvable:$true] %s63_s22  ;;  %s77_s24 = int_to_ptr.vmem [resolvable:$true] %s76_s24 }
  0x2a   :  { %s2091_s29 = scalar_lea.hbm %s2632_s7, 256 }
  0x2b   :  { %p2092_p2 = scmp.ne.s32.totalorder %s2632_s7, %s2091_s29  ;;  %p2095_p3 = scmp.lt.u32.totalorder %s2091_s29, %s2632_s7 }
  0x2d   :  { %p2097_p4 = pnand %p2095_p3, %p2092_p2 }
  0x2f   :  { %2100 = shalt.err (!%p2097_p4)
}
  0x30   :  { %s2101_s3 = scalar_lea.vmem %s64_s22, 256  ;;  %p2106_p6 = scmp.lt.s32.totalorder %s64_s22, %s64_s22 }
  0x31   :  { %p2102_p5 = scmp.ne.s32.totalorder %s64_s22, %s2101_s3  ;;  %p2107_p7 = scmp.lt.s32.totalorder %s2101_s3, %s2101_s3 }
  0x33   :  { %p2108_p8 = por %p2107_p7, %p2106_p6 }
  0x35   :  { %p2109_p9 = pnand %p2108_p8, %p2102_p5 }
  0x37   :  { %2112 = shalt.err (!%p2109_p9)
}
  0x38   :  { %69 = dma.hbm_to_vmem [thread:$0]  %s2632_s7, 256, %s64_s22, [#allocation6], %s2167_s6, %s2167_s6, %s2168_s25  }
  0x39   :  { %s2113_s23 = scalar_lea.hbm %s2633_s8, 16 }
  0x3a   :  { %p2114_p10 = scmp.ne.s32.totalorder %s2633_s8, %s2113_s23  ;;  %p2117_p11 = scmp.lt.u32.totalorder %s2113_s23, %s2633_s8 }
  0x3c   :  { %p2119_p12 = pnand %p2117_p11, %p2114_p10 }
  0x3e   :  { %2122 = shalt.err (!%p2119_p12)
}
  0x3f   :  { %s2123_s30 = scalar_lea.vmem %s77_s24, 16  ;;  %s2127_s18 = scalar_lea.vmem %s77_s24, 32 }
  0x40   :  { %p2124_p13 = scmp.ne.s32.totalorder %s77_s24, %s2123_s30  ;;  %p2128_p0 = scmp.lt.s32.totalorder %s77_s24, %s77_s24 }
  0x41   :  { %p2129_p1 = scmp.lt.s32.totalorder %s2127_s18, %s2123_s30 }
  0x43   :  { %p2130_p2 = por %p2129_p1, %p2128_p0 }
  0x45   :  { %p2131_p3 = pnand %p2130_p2, %p2124_p13 }
  0x47   :  { %2134 = shalt.err (!%p2131_p3)
}
  0x48   :  { %79 = dma.hbm_to_vmem [thread:$0]  %s2633_s8, 16, %s77_s24, [#allocation9]  }
  0x49   :  { %2157 = dma.done.wait [#allocation3], 256  }
  0x4a   :  { %2158 = vsyncadd [#allocation3], 4294967040 }
  0x4b   :  { %2159 = dma.done.wait [#allocation6], 272  }
  0x4c   :  { %2160 = vsyncadd [#allocation6], 4294967024 }
  0x4d   :  { %2161 = dma.done.wait [#allocation9], 16  }
  0x4e   :  { %2162 = vsyncadd [#allocation9], 4294967280  ;;  %v2171_v0 = vmov 0.0   ;;  %vm2172_vm0 = vmmov 0   ;;  %s2647_s22 = sld [smem:[#allocation16_spill]]  ;;  %s2648_s1 = sld [smem:[#allocation15_spill]] }
  0x4f   :  { %1813 = vmatprep.subr.bf16.mxu1 %v2171_v0  ;;  %1817 = vmatprep.mubr.msk.bf16.mxu1 %vm2172_vm0, %v2171_v0  ;;  %vm135_vm1 = vcmask 261120   ;;  %v1993_v5 = vld [vmem:[%s2627_s2] sm:$0xff]   ;;  %v1994_v7 = vld [vmem:[%s2627_s2 + $0x8] sm:$0xff]   ;;  %vm328_vm2 = vcmask 64512   ;;  %v1705_v33 = vld [vmem:[#allocation5] ss:$0 sm:$0xff] }
  0x50   :  { %1829 = vmatprep.subr.bf16.mxu0 %v2171_v0  ;;  %1833 = vmatprep.mubr.msk.bf16.mxu0 %vm2172_vm0, %v2171_v0  ;;  %v1995_v8 = vld [vmem:[#allocation2] sm:$0xff]   ;;  %v1996_v9 = vld [vmem:[#allocation2 + $0x8] sm:$0xff]   ;;  %vm448_vm3 = vcmask 1043456   ;;  %s2175_s7 = smov 104   ;;  %vm1570_vm4 = vcmask 523264   ;;  %s2176_s18 = smov [#allocation10]  }
  0x51   :  { %1830 = vmatpush3.bf16.msra.mxu0 %v1995_v8  ;;  %v1701_v14 = vld [vmem:[%s2630_s5] ss:$0 sm:$0xff]  ;;  %s2173_s5 = smov 120  }
  0x52   :  { %1831 = vmatprep.subr.bf16.mxu0 %v2171_v0  ;;  %v1697_v15 = vld [vmem:[%s2629_s4] ss:$0 sm:$0xff]  ;;  %s2174_s4 = smov 112  }
  0x54   :  { %v1991_v1 = vld [vmem:[%s2647_s22] sm:$0xff]   ;;  %v1992_v2 = vld [vmem:[%s2647_s22 + $0x8] sm:$0xff]  }
  0x55   :  { %1814 = vmatpush3.bf16.msra.mxu1 %v1991_v1  ;;  %v2339_v3 = vld [vmem:[%s2648_s1] sm:$0xff]  ;;  %v2344_v4 = vld [vmem:[%s2648_s1 + $0x8] sm:$0xff]  ;;  %1832 = vmatpush3.bf16.msra.mxu0 %v1996_v9 }
  0x56   :  { %1815 = vmatprep.subr.bf16.mxu1 %v2171_v0  ;;  %v111_v6 = vpack.c.bf16 %v2344_v4, %v2339_v3  ;;  %1843 = vmatprep.subr.bf16.mxu0 %v2171_v0 }
  0x58   :  { %1834 = vmatmul.mubr.msk.bf16.vlgmr.msra.gmra.mrb[0].mxu0 %vm135_vm1, %v111_v6 }
  0x59   :  { %1816 = vmatpush3.bf16.msra.mxu1 %v1992_v2  ;;  %1845 = vmatprep.mubr.msk.bf16.mxu0 %vm2172_vm0, %v2171_v0 }
  0x5a   :  { %1821 = vmatprep.subr.bf16.mxu1 %v2171_v0 }
  0x5c   :  { %1818 = vmatmul.mubr.msk.bf16.vlgmr.msra.gmra.mrb[0].mxu1 %vm135_vm1, %v111_v6 }
  0x5d   :  { %1822 = vmatpush3.bf16.msra.mxu1 %v1993_v5  ;;  %1825 = vmatprep.mubr.msk.bf16.mxu1 %vm2172_vm0, %v2171_v0 }
  0x5e   :  { %1823 = vmatprep.subr.bf16.mxu1 %v2171_v0 }
  0x61   :  { %1824 = vmatpush3.bf16.msra.mxu1 %v1994_v7 }
  0x62   :  { %1837 = vmatprep.subr.bf16.mxu1 %v2171_v0 }
  0x64   :  { %1826 = vmatmul.mubr.msk.bf16.vlgmr.msra.gmra.mrb[4].mxu1 %vm135_vm1, %v111_v6 }
  0x65   :  { %1839 = vmatprep.mubr.msk.bf16.mxu1 %vm2172_vm0, %v2171_v0 }
 0x12b   :  { %v301_v32 = vpop.f32.mrb[0].mxu0 }
 0x12c   :  { %v1835_v34 = vpop.f32.mrb[1].mxu0  ;;  %v302_v37 = vadd.f32 %v1705_v33, %v301_v32 }
 0x12d   :  { %v304_v35 = vpop.f32.mrb[2].mxu0 }
 0x12e   :  { %v1836_v36 = vpop.f32.mrb[3].mxu0  ;;  %v305_v38 = vadd.f32 %v1705_v33, %v304_v35  ;;  %v2399_v39 = vpack.c.bf16 %v302_v37, %v302_v37 }
 0x12f   :  { %v173_v10 = vpop.f32.mrb[0].mxu1 }
 0x130   :  { %v1819_v11 = vpop.f32.mrb[1].mxu1  ;;  %v174_v20 = vadd.f32 %v1697_v15, %v173_v10  ;;  %v2401_v40 = vpack.c.bf16 %v305_v38, %v305_v38  ;;  %v450_v41 = vsel %vm448_vm3, %v2399_v39, 0 }
 0x131   :  { %v176_v12 = vpop.f32.mrb[2].mxu1 }
 0x132   :  { %v1820_v13 = vpop.f32.mrb[3].mxu1  ;;  %v177_v24 = vadd.f32 %v1697_v15, %v176_v12  ;;  %v308_v27 = vmul.f32 0.35355338, %v174_v20  ;;  %v496_v42 = vsel %vm448_vm3, %v2401_v40, 0 }
 0x134   :  { %v309_v29 = vmul.f32 0.35355338, %v177_v24  ;;  %v2387_v30 = vpack.c.bf16 %v308_v27, %v308_v27 }
 0x136   :  { %v2389_v31 = vpack.c.bf16 %v309_v29, %v309_v29 }
 0x137   :  { %v237_v16 = vpop.f32.mrb[4].mxu1 }
 0x138   :  { %v238_v17 = vadd.f32 %v1701_v14, %v237_v16  ;;  %v1827_v18 = vpop.f32.mrb[5].mxu1 }
 0x139   :  { %v240_v19 = vpop.f32.mrb[6].mxu1 }
 0x13a   :  { %v2375_v21 = vpack.c.bf16 %v238_v17, %v238_v17  ;;  %v241_v22 = vadd.f32 %v1701_v14, %v240_v19  ;;  %v1828_v23 = vpop.f32.mrb[7].mxu1 }
 0x13c   :  { %v2377_v25 = vpack.c.bf16 %v241_v22, %v241_v22  ;;  %v333_v26 = vsel %vm328_vm2, %v2375_v21, 0 }
 0x13d   :  { %1838 = vmatpush3.bf16.xpose.msra.mxu1 %v333_v26 }
 0x13e   :  { %592 = vrot.lane.b32.xlu1 %v2377_v25, %s2173_s5  ;;  %v379_v28 = vsel %vm328_vm2, %v2377_v25, 0  ;;  %1849 = vmatprep.subr.bf16.mxu1 %v2171_v0 }
 0x13f   :  { %1844 = vmatpush3.bf16.xpose.msra.mxu0 %v379_v28 }
 0x140   :  { %1855 = vmatprep.subr.bf16.mxu0 %v2171_v0 }
 0x144   :  { %1840 = vmatmul.mubr.msk.bf16.vlgmr.msra.gmra.mrb[8].mxu1 %vm328_vm2, %v2387_v30 }
 0x145   :  { %1851 = vmatprep.mubr.msk.bf16.mxu1 %vm2172_vm0, %v2171_v0  ;;  %1850 = vmatpush3.bf16.msra.mxu1 %v450_v41 }
 0x146   :  { %1846 = vmatmul.mubr.msk.bf16.vlgmr.msra.gmra.mrb[4].mxu0 %vm328_vm2, %v2389_v31  ;;  %1861 = vmatprep.subr.bf16.mxu1 %v2171_v0 }
 0x147   :  { %1857 = vmatprep.mubr.msk.bf16.mxu0 %vm2172_vm0, %v2171_v0  ;;  %1856 = vmatpush3.bf16.msra.mxu0 %v496_v42 }
 0x148   :  { %1867 = vmatprep.subr.bf16.mxu0 %v2171_v0 }
 0x1b0   :  { %v593_v63 = vpop.permute.xlu1 %592 }
 0x1b1   :  { %v598_v13 = vsel %vm328_vm2, %v593_v63, 0  ;;  %v539_v63 = vld [vmem:[#allocation7] sm:$0xf] }
 0x217   :  { %v369_v43 = vpop.f32.mrb[8].mxu1 }
 0x218   :  { %v1841_v44 = vpop.f32.mrb[9].mxu1  ;;  %v421_v45 = vsel %vm328_vm2, %v369_v43, -inf }
 0x219   :  { %v415_v46 = vpop.f32.mrb[4].mxu0  ;;  %422 = vmax.xlane.f32.xlu0 %v421_v45  ;;  %v372_v47 = vpop.f32.mrb[10].mxu1 }
 0x21a   :  { %v1842_v48 = vpop.f32.mrb[11].mxu1  ;;  %v1847_v49 = vpop.f32.mrb[5].mxu0  ;;  %v424_v52 = vsel %vm328_vm2, %v415_v46, -inf }
 0x21b   :  { %v418_v50 = vpop.f32.mrb[6].mxu0 }
 0x21c   :  { %v1848_v51 = vpop.f32.mrb[7].mxu0 }
 0x21d   :  { %425 = vmax.xlane.f32.xlu0 %v424_v52 }
 0x233   :  { %542 = vrot.lane.b32.xlu0 %v2375_v21, %s2173_s5 }
 0x2a6   :  { %v423_v53 = vpop.xlane.xlu0 %422 }
 0x2a7   :  { %v427_v54 = vsub.f32 %v369_v43, %v423_v53 }
 0x2a9   :  { %v429_v55 = vmul.f32 1.442695, %v427_v54 }
 0x2aa   :  { %v426_v56 = vpop.xlane.xlu0 %425 }
 0x2ab   :  { %2003 = vpow2.f32 %v429_v55  ;;  %v428_v57 = vsub.f32 %v415_v46, %v426_v56 }
 0x2ad   :  { %v431_v58 = vmul.f32 1.442695, %v428_v57 }
 0x2ae   :  { %v543_v7 = vpop.permute.xlu0 %542 }
 0x2af   :  { %2005 = vpow2.f32 %v431_v58  ;;  %v548_v10 = vsel %vm328_vm2, %v543_v7, 0  ;;  %v761_v58 = vld [vmem:[#allocation7 + $0x4] sm:$0xf] }
 0x2b5   :  { %v2004_v59 = vpop.eup %2003 }
 0x2b6   :  { %v433_v60 = vsel %vm328_vm2, %v2004_v59, 0.0 }
 0x2b7   :  { %434 = vadd.xlane.f32.xlu1 %v433_v60 }
 0x2b9   :  { %v2006_v61 = vpop.eup %2005 }
 0x2ba   :  { %v436_v62 = vsel %vm328_vm2, %v2006_v61, 0.0 }
 0x2bb   :  { %437 = vadd.xlane.f32.xlu1 %v436_v62 }
 0x2cc   :  { %540 = vrot.lane.b32.xlu1 %v2387_v30, %s2173_s5 }
 0x2d0   :  { %590 = vrot.lane.b32.xlu1 %v2389_v31, %s2173_s5 }
 0x344   :  { %v435_v1 = vpop.xlane.xlu1 %434 }
 0x345   :  { %2007 = vrcp.f32 %v435_v1 }
 0x348   :  { %v438_v2 = vpop.xlane.xlu1 %437 }
 0x349   :  { %2009 = vrcp.f32 %v438_v2 }
 0x34c   :  { %v541_v14 = vpop.permute.xlu1 %540 }
 0x34f   :  { %v2008_v5 = vpop.eup %2007 }
 0x350   :  { %v441_v6 = vmul.f32 %v2008_v5, %v2004_v59  ;;  %v591_v15 = vpop.permute.xlu1 %590  ;;  %v813_v5 = vsel %vm448_vm3, %v539_v63, 0 }
 0x352   :  { %v443_v8 = vpack.c.bf16 %v441_v6, %v441_v6 }
 0x353   :  { %v2010_v9 = vpop.eup %2009 }
 0x354   :  { %v442_v11 = vmul.f32 %v2010_v9, %v2006_v61  ;;  %1852 = vmatmul.mubr.msk.bf16.vlgmr.msra.gmra.mrb[12].mxu1 %vm328_vm2, %v443_v8  ;;  %v766_v61 = vsel %vm448_vm3, %v761_v58, 0 }
 0x355   :  { %1862 = vmatpush3.bf16.xpose.msra.mxu1 %v548_v10  ;;  %1863 = vmatprep.mubr.msk.bf16.mxu1 %vm2172_vm0, %v2171_v0 }
 0x356   :  { %v444_v12 = vpack.c.bf16 %v442_v11, %v442_v11  ;;  %1873 = vmatprep.subr.bf16.mxu1 %v2171_v0 }
 0x358   :  { %1858 = vmatmul.mubr.msk.bf16.vlgmr.msra.gmra.mrb[8].mxu0 %vm328_vm2, %v444_v12 }
 0x359   :  { %1868 = vmatpush3.bf16.xpose.msra.mxu0 %v598_v13  ;;  %1869 = vmatprep.mubr.msk.bf16.mxu0 %vm2172_vm0, %v2171_v0 }
 0x35a   :  { %1879 = vmatprep.subr.bf16.mxu0 %v2171_v0 }
 0x35c   :  { %1864 = vmatmul.mubr.msk.bf16.vlgmr.msra.gmra.mrb[16].mxu1 %vm328_vm2, %v541_v14 }
 0x35d   :  { %1875 = vmatprep.mubr.msk.bf16.mxu1 %vm2172_vm0, %v2171_v0 }
 0x360   :  { %1870 = vmatmul.mubr.msk.bf16.vlgmr.msra.gmra.mrb[12].mxu0 %vm328_vm2, %v591_v15 }
 0x361   :  { %1881 = vmatprep.mubr.msk.bf16.mxu0 %vm2172_vm0, %v2171_v0 }
 0x427   :  { %v2435_v16 = vpop.f32.mrb[12].mxu1 }
 0x428   :  { %v1853_v17 = vpop.f32.mrb[13].mxu1 }
 0x429   :  { %v489_v18 = vpop.f32.mrb[14].mxu1 }
 0x42a   :  { %v1854_v19 = vpop.f32.mrb[15].mxu1 }
 0x42b   :  { %v2437_v20 = vpop.f32.mrb[8].mxu0 }
 0x42c   :  { %v538_v22 = vpack.c.bf16 %v2437_v20, %v2435_v16  ;;  %v1859_v23 = vpop.f32.mrb[9].mxu0 }
 0x42d   :  { %v535_v24 = vpop.f32.mrb[10].mxu0 }
 0x42e   :  { %v1860_v26 = vpop.f32.mrb[11].mxu0 }
 0x42f   :  { %v584_v27 = vpop.f32.mrb[16].mxu1 }
 0x430   :  { %v1865_v28 = vpop.f32.mrb[17].mxu1  ;;  %v640_v29 = vsel %vm328_vm2, %v584_v27, -inf }
 0x431   :  { %641 = vmax.xlane.f32.xlu0 %v640_v29  ;;  %v587_v32 = vpop.f32.mrb[18].mxu1 }
 0x432   :  { %v1866_v33 = vpop.f32.mrb[19].mxu1 }
 0x433   :  { %v634_v34 = vpop.f32.mrb[12].mxu0 }
 0x434   :  { %v1871_v35 = vpop.f32.mrb[13].mxu0  ;;  %v643_v36 = vsel %vm328_vm2, %v634_v34, -inf }
 0x435   :  { %644 = vmax.xlane.f32.xlu1 %v643_v36  ;;  %v637_v37 = vpop.f32.mrb[14].mxu0 }
 0x436   :  { %v1872_v38 = vpop.f32.mrb[15].mxu0 }
 0x446   :  { %712 = vrot.lane.b32.xlu1 %v2401_v40, %s2173_s5 }
 0x44a   :  { %858 = vrot.lane.b32.xlu1 %v2375_v21, %s2174_s4 }
 0x44e   :  { %908 = vrot.lane.b32.xlu1 %v2377_v25, %s2174_s4 }
 0x452   :  { %906 = vrot.lane.b32.xlu1 %v2389_v31, %s2174_s4 }
 0x4be   :  { %v642_v41 = vpop.xlane.xlu0 %641 }
 0x4bf   :  { %v646_v42 = vsub.f32 %v584_v27, %v642_v41 }
 0x4c1   :  { %v648_v43 = vmul.f32 1.442695, %v646_v42 }
 0x4c2   :  { %v645_v44 = vpop.xlane.xlu1 %644 }
 0x4c3   :  { %2011 = vpow2.f32 %v648_v43  ;;  %v647_v45 = vsub.f32 %v634_v34, %v645_v44 }
 0x4c5   :  { %v650_v46 = vmul.f32 1.442695, %v647_v45 }
 0x4c6   :  { %v713_v47 = vpop.permute.xlu1 %712 }
 0x4c7   :  { %2013 = vpow2.f32 %v650_v46  ;;  %v718_v48 = vsel %vm448_vm3, %v713_v47, 0 }
 0x4c8   :  { %1880 = vmatpush3.bf16.msra.mxu0 %v718_v48 }
 0x4c9   :  { %1891 = vmatprep.subr.bf16.mxu0 %v2171_v0 }
 0x4ca   :  { %v859_v6 = vpop.permute.xlu1 %858 }
 0x4cb   :  { %v864_v18 = vsel %vm328_vm2, %v859_v6, 0 }
 0x4cd   :  { %v2012_v49 = vpop.eup %2011 }
 0x4ce   :  { %v652_v50 = vsel %vm328_vm2, %v2012_v49, 0.0  ;;  %v909_v7 = vpop.permute.xlu1 %908 }
 0x4cf   :  { %653 = vadd.xlane.f32.xlu0 %v652_v50  ;;  %v914_v8 = vsel %vm328_vm2, %v909_v7, 0 }
 0x4d1   :  { %v2014_v51 = vpop.eup %2013 }
 0x4d2   :  { %v655_v52 = vsel %vm328_vm2, %v2014_v51, 0.0  ;;  %v907_v9 = vpop.permute.xlu1 %906 }
 0x4d3   :  { %656 = vadd.xlane.f32.xlu0 %v655_v52 }
 0x4e9   :  { %664 = vrot.lane.b32.xlu0 %v2399_v39, %s2173_s5  ;;  %s1683_s5 = sshll.u32 %s2176_s18, 4  ;;  %s1684_s5 = int_to_ptr.vmem [resolvable:$true] %s1683_s5 }
 0x4ea   :  { %p2140_p5 = scmp.lt.s32.totalorder %s1684_s5, %s1684_s5 }
 0x4ed   :  { %856 = vrot.lane.b32.xlu0 %v2387_v30, %s2174_s4 }
 0x55c   :  { %v654_v53 = vpop.xlane.xlu0 %653 }
 0x55d   :  { %2015 = vrcp.f32 %v654_v53 }
 0x560   :  { %v657_v54 = vpop.xlane.xlu0 %656 }
 0x561   :  { %2017 = vrcp.f32 %v657_v54 }
 0x564   :  { %v665_v55 = vpop.permute.xlu0 %664 }
 0x565   :  { %v670_v56 = vsel %vm448_vm3, %v665_v55, 0 }
 0x566   :  { %1874 = vmatpush3.bf16.msra.mxu1 %v670_v56 }
 0x567   :  { %v2016_v57 = vpop.eup %2015  ;;  %1885 = vmatprep.subr.bf16.mxu1 %v2171_v0 }
 0x568   :  { %v660_v59 = vmul.f32 %v2016_v57, %v2012_v49  ;;  %v857_v23 = vpop.permute.xlu0 %856 }
 0x56a   :  { %v662_v60 = vpack.c.bf16 %v660_v59, %v660_v59 }
 0x56b   :  { %v2018_v62 = vpop.eup %2017 }
 0x56c   :  { %v661_v1 = vmul.f32 %v2018_v62, %v2014_v51  ;;  %1876 = vmatmul.mubr.msk.bf16.vlgmr.msra.gmra.mrb[20].mxu1 %vm328_vm2, %v662_v60 }
 0x56d   :  { %1886 = vmatpush3.bf16.msra.mxu1 %v766_v61  ;;  %1887 = vmatprep.mubr.msk.bf16.mxu1 %vm2172_vm0, %v2171_v0 }
 0x56e   :  { %v663_v2 = vpack.c.bf16 %v661_v1, %v661_v1  ;;  %1897 = vmatprep.subr.bf16.mxu1 %v2171_v0 }
 0x570   :  { %1882 = vmatmul.mubr.msk.bf16.vlgmr.msra.gmra.mrb[16].mxu0 %vm328_vm2, %v663_v2 }
 0x571   :  { %1892 = vmatpush3.bf16.msra.mxu0 %v813_v5  ;;  %1893 = vmatprep.mubr.msk.bf16.mxu0 %vm2172_vm0, %v2171_v0 }
 0x572   :  { %1903 = vmatprep.subr.bf16.mxu0 %v2171_v0 }
 0x578   :  { %1894 = vmatmul.mubr.msk.bf16.vlgmr.msra.gmra.mrb[20].mxu0 %vm328_vm2, %v538_v22 }
 0x579   :  { %1905 = vmatprep.mubr.msk.bf16.mxu0 %vm2172_vm0, %v2171_v0 }
 0x57a   :  { %1904 = vmatpush3.bf16.xpose.msra.mxu0 %v914_v8 }
 0x57b   :  { %1915 = vmatprep.subr.bf16.mxu0 %v2171_v0 }
 0x581   :  { %1906 = vmatmul.mubr.msk.bf16.vlgmr.msra.gmra.mrb[24].mxu0 %vm328_vm2, %v907_v9 }
 0x582   :  { %1917 = vmatprep.mubr.msk.bf16.mxu0 %vm2172_vm0, %v2171_v0 }
 0x63f   :  { %v706_v10 = vpop.f32.mrb[20].mxu1 }
 0x640   :  { %v1877_v11 = vpop.f32.mrb[21].mxu1 }
 0x641   :  { %v709_v12 = vpop.f32.mrb[22].mxu1  ;;  %v1077_v11 = vld [vmem:[#allocation7 + $0x8] sm:$0xf] }
 0x642   :  { %v1878_v13 = vpop.f32.mrb[23].mxu1  ;;  %v1082_v12 = vsel %vm448_vm3, %v1077_v11, 0 }
 0x643   :  { %v754_v14 = vpop.f32.mrb[16].mxu0 }
 0x644   :  { %v760_v15 = vpack.c.bf16 %v754_v14, %v706_v10  ;;  %v1883_v16 = vpop.f32.mrb[17].mxu0 }
 0x645   :  { %v757_v17 = vpop.f32.mrb[18].mxu0 }
 0x646   :  { %v1884_v19 = vpop.f32.mrb[19].mxu0  ;;  %1888 = vmatmul.mubr.msk.bf16.vlgmr.msra.gmra.mrb[24].mxu1 %vm328_vm2, %v760_v15 }
 0x647   :  { %1898 = vmatpush3.bf16.xpose.msra.mxu1 %v864_v18  ;;  %1899 = vmatprep.mubr.msk.bf16.mxu1 %vm2172_vm0, %v2171_v0 }
 0x648   :  { %1909 = vmatprep.subr.bf16.mxu1 %v2171_v0 }
 0x64b   :  { %v849_v20 = vpop.f32.mrb[20].mxu0 }
 0x64c   :  { %v1895_v22 = vpop.f32.mrb[21].mxu0 }
 0x64d   :  { %v852_v24 = vpop.f32.mrb[22].mxu0 }
 0x64e   :  { %v1896_v26 = vpop.f32.mrb[23].mxu0  ;;  %1900 = vmatmul.mubr.msk.bf16.vlgmr.msra.gmra.mrb[28].mxu1 %vm328_vm2, %v857_v23 }
 0x64f   :  { %1911 = vmatprep.mubr.msk.bf16.mxu1 %vm2172_vm0, %v2171_v0 }
 0x654   :  { %v950_v27 = vpop.f32.mrb[24].mxu0 }
 0x655   :  { %v1907_v28 = vpop.f32.mrb[25].mxu0  ;;  %v959_v29 = vsel %vm328_vm2, %v950_v27, -inf }
 0x656   :  { %960 = vmax.xlane.f32.xlu1 %v959_v29  ;;  %v953_v32 = vpop.f32.mrb[26].mxu0 }
 0x657   :  { %v1908_v33 = vpop.f32.mrb[27].mxu0 }
 0x667   :  { %1028 = vrot.lane.b32.xlu1 %v2401_v40, %s2174_s4 }
 0x66b   :  { %1129 = vrot.lane.b32.xlu1 %v2375_v21, %s2175_s7 }
 0x66f   :  { %1179 = vrot.lane.b32.xlu1 %v2377_v25, %s2175_s7 }
 0x673   :  { %1177 = vrot.lane.b32.xlu1 %v2389_v31, %s2175_s7 }
 0x6e3   :  { %v961_v34 = vpop.xlane.xlu1 %960 }
 0x6e4   :  { %v963_v37 = vsub.f32 %v950_v27, %v961_v34 }
 0x6e6   :  { %v966_v38 = vmul.f32 1.442695, %v963_v37 }
 0x6e7   :  { %v1029_v35 = vpop.permute.xlu1 %1028 }
 0x6e8   :  { %v1034_v36 = vsel %vm448_vm3, %v1029_v35, 0  ;;  %2019 = vpow2.f32 %v966_v38 }
 0x6e9   :  { %1916 = vmatpush3.bf16.msra.mxu0 %v1034_v36 }
 0x6ea   :  { %1927 = vmatprep.subr.bf16.mxu0 %v2171_v0 }
 0x6eb   :  { %v1130_v59 = vpop.permute.xlu1 %1129 }
 0x6ec   :  { %v1135_v61 = vsel %vm328_vm2, %v1130_v59, 0 }
 0x6ef   :  { %v1180_v18 = vpop.permute.xlu1 %1179 }
 0x6f2   :  { %v2020_v47 = vpop.eup %2019 }
 0x6f3   :  { %v971_v50 = vsel %vm328_vm2, %v2020_v47, 0.0  ;;  %v1178_v27 = vpop.permute.xlu1 %1177 }
 0x719   :  { %v802_v41 = vpop.f32.mrb[24].mxu1 }
 0x71a   :  { %v2501_v42 = vadd.f32 %v849_v20, %v802_v41  ;;  %v1889_v21 = vpop.f32.mrb[25].mxu1 }
 0x71b   :  { %v805_v43 = vpop.f32.mrb[26].mxu1 }
 0x71c   :  { %v2503_v44 = vadd.f32 %v852_v24, %v805_v43  ;;  %v1890_v25 = vpop.f32.mrb[27].mxu1  ;;  %v1185_v24 = vsel %vm328_vm2, %v1180_v18, 0 }
 0x721   :  { %v900_v45 = vpop.f32.mrb[28].mxu1 }
 0x722   :  { %v1901_v31 = vpop.f32.mrb[29].mxu1  ;;  %v956_v46 = vsel %vm328_vm2, %v900_v45, -inf }
 0x723   :  { %957 = vmax.xlane.f32.xlu0 %v956_v46  ;;  %v903_v48 = vpop.f32.mrb[30].mxu1 }
 0x724   :  { %v1902_v49 = vpop.f32.mrb[31].mxu1 }
 0x727   :  { %972 = vadd.xlane.f32.xlu0 %v971_v50 }
 0x7b0   :  { %v958_v51 = vpop.xlane.xlu0 %957 }
 0x7b1   :  { %v962_v52 = vsub.f32 %v900_v45, %v958_v51 }
 0x7b3   :  { %v964_v53 = vmul.f32 1.442695, %v962_v52 }
 0x7b4   :  { %v973_v54 = vpop.xlane.xlu0 %972 }
 0x7b5   :  { %2021 = vpow2.f32 %v964_v53 }
 0x7b6   :  { %2023 = vrcp.f32 %v973_v54 }
 0x7bf   :  { %v2022_v55 = vpop.eup %2021 }
 0x7c0   :  { %v2024_v56 = vpop.eup %2023  ;;  %v968_v57 = vsel %vm328_vm2, %v2022_v55, 0.0 }
 0x7c1   :  { %v977_v58 = vmul.f32 %v2024_v56, %v2020_v47  ;;  %969 = vadd.xlane.f32.xlu0 %v968_v57 }
 0x7c3   :  { %v979_v60 = vpack.c.bf16 %v977_v58, %v977_v58 }
 0x7c5   :  { %1918 = vmatmul.mubr.msk.bf16.vlgmr.msra.gmra.mrb[28].mxu0 %vm328_vm2, %v979_v60  ;;  %v1348_v60 = vld [vmem:[#allocation7 + $0xc] sm:$0xf] }
 0x7c6   :  { %1928 = vmatpush3.bf16.xpose.msra.mxu0 %v1135_v61  ;;  %1929 = vmatprep.mubr.msk.bf16.mxu0 %vm2172_vm0, %v2171_v0  ;;  %v1353_v61 = vsel %vm448_vm3, %v1348_v60, 0  ;;  %v1738_v60 = vld [vmem:[%s2635_s10] ss:$0 sm:$0xff] }
 0x7c7   :  { %1939 = vmatprep.subr.bf16.mxu0 %v2171_v0 }
 0x7d7   :  { %980 = vrot.lane.b32.xlu0 %v2399_v39, %s2174_s4 }
 0x7db   :  { %1127 = vrot.lane.b32.xlu0 %v2387_v30, %s2175_s7 }
 0x84e   :  { %v970_v62 = vpop.xlane.xlu0 %969 }
 0x84f   :  { %2025 = vrcp.f32 %v970_v62 }
 0x852   :  { %v981_v63 = vpop.permute.xlu0 %980 }
 0x853   :  { %v986_v1 = vsel %vm448_vm3, %v981_v63, 0 }
 0x854   :  { %1910 = vmatpush3.bf16.msra.mxu1 %v986_v1 }
 0x855   :  { %1921 = vmatprep.subr.bf16.mxu1 %v2171_v0 }
 0x856   :  { %v1128_v2 = vpop.permute.xlu0 %1127 }
 0x857   :  { %1930 = vmatmul.mubr.msk.bf16.vlgmr.msra.gmra.mrb[32].mxu0 %vm328_vm2, %v1128_v2 }
 0x858   :  { %1941 = vmatprep.mubr.msk.bf16.mxu0 %vm2172_vm0, %v2171_v0 }
 0x859   :  { %v2026_v5 = vpop.eup %2025 }
 0x85a   :  { %v976_v6 = vmul.f32 %v2026_v5, %v2022_v55 }
 0x85c   :  { %v978_v7 = vpack.c.bf16 %v976_v6, %v976_v6 }
 0x85e   :  { %1912 = vmatmul.mubr.msk.bf16.vlgmr.msra.gmra.mrb[32].mxu1 %vm328_vm2, %v978_v7 }
 0x85f   :  { %1923 = vmatprep.mubr.msk.bf16.mxu1 %vm2172_vm0, %v2171_v0  ;;  %1922 = vmatpush3.bf16.msra.mxu1 %v1082_v12  ;;  %v1735_v12 = vld [vmem:[#allocation8] ss:$0 sm:$0xff] }
 0x860   :  { %1933 = vmatprep.subr.bf16.mxu1 %v2171_v0 }
 0x898   :  { %v1070_v30 = vpop.f32.mrb[28].mxu0 }
 0x899   :  { %v1919_v8 = vpop.f32.mrb[29].mxu0 }
 0x89a   :  { %v1073_v9 = vpop.f32.mrb[30].mxu0 }
 0x89b   :  { %v1920_v10 = vpop.f32.mrb[31].mxu0 }
 0x92a   :  { %v1171_v13 = vpop.f32.mrb[32].mxu0 }
 0x92b   :  { %v1931_v14 = vpop.f32.mrb[33].mxu0  ;;  %v1227_v15 = vsel %vm328_vm2, %v1171_v13, -inf }
 0x92c   :  { %1228 = vmax.xlane.f32.xlu0 %v1227_v15  ;;  %v1174_v16 = vpop.f32.mrb[34].mxu0 }
 0x92d   :  { %v1932_v17 = vpop.f32.mrb[35].mxu0 }
 0x931   :  { %v1022_v19 = vpop.f32.mrb[32].mxu1 }
 0x932   :  { %v1076_v20 = vpack.c.bf16 %v1070_v30, %v1022_v19  ;;  %v1913_v22 = vpop.f32.mrb[33].mxu1 }
 0x933   :  { %v1025_v23 = vpop.f32.mrb[34].mxu1 }
 0x934   :  { %v1914_v26 = vpop.f32.mrb[35].mxu1  ;;  %1924 = vmatmul.mubr.msk.bf16.vlgmr.msra.gmra.mrb[36].mxu1 %vm328_vm2, %v1076_v20 }
 0x935   :  { %1934 = vmatpush3.bf16.xpose.msra.mxu1 %v1185_v24  ;;  %1935 = vmatprep.mubr.msk.bf16.mxu1 %vm2172_vm0, %v2171_v0 }
 0x936   :  { %1945 = vmatprep.subr.bf16.mxu1 %v2171_v0 }
 0x93c   :  { %1936 = vmatmul.mubr.msk.bf16.vlgmr.msra.gmra.mrb[40].mxu1 %vm328_vm2, %v1178_v27 }
 0x93d   :  { %1947 = vmatprep.mubr.msk.bf16.mxu1 %vm2172_vm0, %v2171_v0 }
 0x9b9   :  { %v1229_v28 = vpop.xlane.xlu0 %1228 }
 0x9ba   :  { %v1233_v29 = vsub.f32 %v1171_v13, %v1229_v28 }
 0x9bc   :  { %v1235_v32 = vmul.f32 1.442695, %v1233_v29 }
 0x9be   :  { %2027 = vpow2.f32 %v1235_v32 }
 0x9c8   :  { %v2028_v33 = vpop.eup %2027 }
 0x9c9   :  { %v1239_v34 = vsel %vm328_vm2, %v2028_v33, 0.0 }
 0x9ca   :  { %1240 = vadd.xlane.f32.xlu0 %v1239_v34 }
 0xa07   :  { %v1118_v35 = vpop.f32.mrb[36].mxu1 }
 0xa08   :  { %v1125_v36 = vadd.f32 %v1118_v35, %v2501_v42  ;;  %v1925_v37 = vpop.f32.mrb[37].mxu1 }
 0xa09   :  { %v1121_v38 = vpop.f32.mrb[38].mxu1 }
 0xa0a   :  { %v1126_v41 = vadd.f32 %v1121_v38, %v2503_v44  ;;  %v1926_v21 = vpop.f32.mrb[39].mxu1 }
 0xa0f   :  { %v1221_v43 = vpop.f32.mrb[40].mxu1 }
 0xa10   :  { %v1937_v25 = vpop.f32.mrb[41].mxu1  ;;  %v1230_v45 = vsel %vm328_vm2, %v1221_v43, -inf }
 0xa11   :  { %1231 = vmax.xlane.f32.xlu1 %v1230_v45  ;;  %v1224_v31 = vpop.f32.mrb[42].mxu1 }
 0xa12   :  { %v1938_v46 = vpop.f32.mrb[43].mxu1 }
 0xa22   :  { %1299 = vrot.lane.b32.xlu1 %v2401_v40, %s2175_s7 }
 0xa57   :  { %v1241_v52 = vpop.xlane.xlu0 %1240 }
 0xa9e   :  { %v1232_v47 = vpop.xlane.xlu1 %1231 }
 0xa9f   :  { %v1234_v48 = vsub.f32 %v1221_v43, %v1232_v47 }
 0xaa1   :  { %v1237_v49 = vmul.f32 1.442695, %v1234_v48 }
 0xaa2   :  { %v1300_v50 = vpop.permute.xlu1 %1299 }
 0xaa3   :  { %2029 = vpow2.f32 %v1237_v49  ;;  %v1305_v42 = vsel %vm448_vm3, %v1300_v50, 0  ;;  %v1736_v49 = vld [vmem:[%s2638_s13] ss:$0 sm:$0xff] }
 0xaa4   :  { %1946 = vmatpush3.bf16.msra.mxu1 %v1305_v42  ;;  %2031 = vrcp.f32 %v1241_v52 }
 0xaa5   :  { %1957 = vmatprep.subr.bf16.mxu1 %v2171_v0 }
 0xaad   :  { %v2030_v44 = vpop.eup %2029 }
 0xaae   :  { %v1242_v51 = vsel %vm328_vm2, %v2030_v44, 0.0  ;;  %v2032_v40 = vpop.eup %2031 }
 0xaaf   :  { %1243 = vadd.xlane.f32.xlu0 %v1242_v51  ;;  %v1247_v54 = vmul.f32 %v2032_v40, %v2028_v33  ;;  %v1737_v40 = vld [vmem:[%s2639_s14] ss:$0 sm:$0xff] }
 0xab1   :  { %v1249_v57 = vpack.c.bf16 %v1247_v54, %v1247_v54 }
 0xac5   :  { %1251 = vrot.lane.b32.xlu0 %v2399_v39, %s2175_s7 }
 0xb3c   :  { %v1244_v53 = vpop.xlane.xlu0 %1243 }
 0xb3d   :  { %2033 = vrcp.f32 %v1244_v53 }
 0xb40   :  { %v1252_v55 = vpop.permute.xlu0 %1251 }
 0xb41   :  { %v1257_v56 = vsel %vm448_vm3, %v1252_v55, 0 }
 0xb42   :  { %1940 = vmatpush3.bf16.msra.mxu0 %v1257_v56 }
 0xb43   :  { %1951 = vmatprep.subr.bf16.mxu0 %v2171_v0 }
 0xb45   :  { %1942 = vmatmul.mubr.msk.bf16.vlgmr.msra.gmra.mrb[36].mxu0 %vm328_vm2, %v1249_v57  ;;  %v1999_v57 = vld [vmem:[%s2636_s11] sm:$0xff]  }
 0xb46   :  { %1953 = vmatprep.mubr.msk.bf16.mxu0 %vm2172_vm0, %v2171_v0  ;;  %1952 = vmatpush3.bf16.msra.mxu0 %v1353_v61 }
 0xb47   :  { %v2034_v58 = vpop.eup %2033  ;;  %1965 = vmatprep.subr.bf16.mxu0 %v2171_v0 }
 0xb48   :  { %v1248_v39 = vmul.f32 %v2034_v58, %v2030_v44  ;;  %v2000_v58 = vld [vmem:[%s2636_s11 + $0x8] sm:$0xff]  }
 0xb4a   :  { %v1250_v59 = vpack.c.bf16 %v1248_v39, %v1248_v39  ;;  %v2001_v39 = vld [vmem:[%s2636_s11 + $0x10] sm:$0xff]  }
 0xb4c   :  { %1948 = vmatmul.mubr.msk.bf16.vlgmr.msra.gmra.mrb[44].mxu1 %vm328_vm2, %v1250_v59  ;;  %v2002_v59 = vld [vmem:[%s2636_s11 + $0x18] sm:$0xff]  }
 0xb4d   :  { %1961 = vmatprep.mubr.msk.bf16.mxu1 %vm2172_vm0, %v2171_v0 }
 0xc18   :  { %v1293_v62 = vpop.f32.mrb[36].mxu0 }
 0xc19   :  { %v1943_v63 = vpop.f32.mrb[37].mxu0 }
 0xc1a   :  { %v1296_v1 = vpop.f32.mrb[38].mxu0 }
 0xc1b   :  { %v1944_v2 = vpop.f32.mrb[39].mxu0 }
 0xc1f   :  { %v1341_v5 = vpop.f32.mrb[44].mxu1 }
 0xc20   :  { %v1347_v6 = vpack.c.bf16 %v1341_v5, %v1293_v62  ;;  %v1949_v7 = vpop.f32.mrb[45].mxu1 }
 0xc21   :  { %v1344_v30 = vpop.f32.mrb[46].mxu1 }
 0xc22   :  { %v1950_v8 = vpop.f32.mrb[47].mxu1  ;;  %1954 = vmatmul.mubr.msk.bf16.vlgmr.msra.gmra.mrb[40].mxu0 %vm328_vm2, %v1347_v6 }
 0xc23   :  { %1973 = vmatprep.mubr.msk.bf16.mxu0 %vm2172_vm0, %v2171_v0  ;;  %1966 = vmatpush3.bf16.msra.mxu0 %v1999_v57 }
 0xc24   :  { %1967 = vmatprep.subr.bf16.mxu0 %v2171_v0 }
 0xc27   :  { %1968 = vmatpush3.bf16.msra.mxu0 %v2000_v58 }
 0xc28   :  { %1969 = vmatprep.subr.bf16.mxu0 %v2171_v0 }
 0xc2b   :  { %1970 = vmatpush3.bf16.msra.mxu0 %v2001_v39 }
 0xc2c   :  { %1971 = vmatprep.subr.bf16.mxu0 %v2171_v0 }
 0xc2f   :  { %1972 = vmatpush3.bf16.msra.mxu0 %v2002_v59 }
 0xcf5   :  { %v1389_v9 = vpop.f32.mrb[40].mxu0 }
 0xcf6   :  { %v1396_v10 = vadd.f32 %v1389_v9, %v1125_v36  ;;  %v1955_v11 = vpop.f32.mrb[41].mxu0 }
 0xcf7   :  { %v1392_v13 = vpop.f32.mrb[42].mxu0 }
 0xcf8   :  { %v1398_v14 = vadd.f32 %v1396_v10, %v2339_v3  ;;  %v1397_v15 = vadd.f32 %v1392_v13, %v1126_v41  ;;  %v1956_v16 = vpop.f32.mrb[43].mxu0  ;;  %v1997_v3 = vld [vmem:[%s2634_s9] sm:$0xff]  }
 0xcf9   :  { %1958 = vmatpush3.bf16.msra.mxu1 %v1997_v3  ;;  %v1747_v16 = vld [vmem:[%s2637_s12] ss:$0 sm:$0xff] }
 0xcfa   :  { %v1407_v17 = vadd.f32 %v1735_v12, %v1398_v14  ;;  %v1399_v18 = vadd.f32 %v1397_v15, %v2344_v4  ;;  %v1998_v4 = vld [vmem:[%s2634_s9 + $0x8] sm:$0xff]   ;;  %1959 = vmatprep.subr.bf16.mxu1 %v2171_v0 }
 0xcfc   :  { %v1408_v19 = vadd.f32 %v1735_v12, %v1399_v18  ;;  %v1411_v20 = vsel %vm135_vm1, %v1407_v17, 0.0  ;;  %v1417_v24 = vmul.f32 %v1407_v17, %v1407_v17 }
 0xcfd   :  { %1412 = vadd.xlane.f32.xlu1 %v1411_v20  ;;  %1960 = vmatpush3.bf16.msra.mxu1 %v1998_v4 }
 0xcfe   :  { %v1414_v22 = vsel %vm135_vm1, %v1408_v19, 0.0  ;;  %v1418_v23 = vmul.f32 %v1408_v19, %v1408_v19  ;;  %v1419_v27 = vsel %vm135_vm1, %v1417_v24, 0.0 }
 0xcff   :  { %1415 = vadd.xlane.f32.xlu0 %v1414_v22 }
 0xd00   :  { %v1422_v26 = vsel %vm135_vm1, %v1418_v23, 0.0 }
 0xd01   :  { %1423 = vadd.xlane.f32.xlu1 %v1422_v26 }
 0xd03   :  { %1420 = vadd.xlane.f32.xlu0 %v1419_v27 }
 0xd8a   :  { %v1413_v28 = vpop.xlane.xlu1 %1412 }
 0xd8b   :  { %v1425_v32 = vmul.f32 0.03125, %v1413_v28 }
 0xd8c   :  { %v1416_v29 = vpop.xlane.xlu0 %1415 }
 0xd8d   :  { %v1426_v33 = vmul.f32 0.03125, %v1416_v29  ;;  %v1429_v38 = vmul.f32 %v1425_v32, %v1425_v32  ;;  %v1435_v50 = vsub.f32 %v1407_v17, %v1425_v32 }
 0xd8e   :  { %v1424_v34 = vpop.xlane.xlu1 %1423 }
 0xd8f   :  { %v1430_v35 = vmul.f32 %v1426_v33, %v1426_v33  ;;  %v1428_v36 = vmul.f32 0.03125, %v1424_v34  ;;  %v1436_v47 = vsub.f32 %v1408_v19, %v1426_v33 }
 0xd90   :  { %v1421_v37 = vpop.xlane.xlu0 %1420 }
 0xd91   :  { %v1432_v41 = vsub.f32 %v1428_v36, %v1430_v35  ;;  %v1427_v21 = vmul.f32 0.03125, %v1421_v37 }
 0xd93   :  { %v1434_v43 = vmax.f32 %v1432_v41, 0.0  ;;  %v1431_v25 = vsub.f32 %v1427_v21, %v1429_v38 }
 0xd95   :  { %v1438_v45 = vadd.f32 1e-05, %v1434_v43  ;;  %v1433_v31 = vmax.f32 %v1431_v25, 0.0 }
 0xd97   :  { %2035 = vrsqrt.f32 %v1438_v45  ;;  %v1437_v46 = vadd.f32 1e-05, %v1433_v31 }
 0xd99   :  { %2037 = vrsqrt.f32 %v1437_v46 }
 0xda1   :  { %v2036_v48 = vpop.eup %2035 }
 0xda2   :  { %v1442_v42 = vmul.f32 %v2036_v48, %v1436_v47 }
 0xda3   :  { %v2038_v44 = vpop.eup %2037 }
 0xda4   :  { %v1441_v51 = vmul.f32 %v2038_v44, %v1435_v50  ;;  %v1450_v52 = vmul.f32 %v1736_v49, %v1442_v42  ;;  %v1748_v42 = vld [vmem:[%s2640_s15] ss:$0 sm:$0xff]  ;;  %s2135_s15 = scalar_lea.vmem %s1684_s5, 256 }
 0xda5   :  { %p2136_p4 = scmp.ne.s32.totalorder %s1684_s5, %s2135_s15  ;;  %p2141_p6 = scmp.lt.s32.totalorder %s2135_s15, %s2135_s15 }
 0xda6   :  { %v1449_v53 = vmul.f32 %v1736_v49, %v1441_v51  ;;  %v1458_v55 = vadd.f32 %v1737_v40, %v1450_v52 }
 0xda7   :  { %p2142_p7 = por %p2141_p6, %p2140_p5 }
 0xda8   :  { %v1457_v54 = vadd.f32 %v1737_v40, %v1449_v53  ;;  %v1749_v40 = vld [vmem:[%s2641_s16] ss:$0 sm:$0xff] }
 0xda9   :  { %p2143_p8 = pnand %p2142_p7, %p2136_p4 }
 0xdaa   :  { %v1459_v56 = vpack.c.bf16 %v1458_v55, %v1457_v54 }
 0xdac   :  { %1962 = vmatmul.mubr.msk.bf16.vlgmr.msra.gmra.mrb[48].mxu1 %vm135_vm1, %v1459_v56 }
 0xe7f   :  { %v1520_v61 = vpop.f32.mrb[48].mxu1 }
 0xe80   :  { %v1521_v62 = vadd.f32 %v1738_v60, %v1520_v61  ;;  %v1963_v63 = vpop.f32.mrb[49].mxu1 }
 0xe81   :  { %v1523_v1 = vpop.f32.mrb[50].mxu1 }
 0xe82   :  { %v1529_v2 = vmul.f32 0.70710677, %v1521_v62  ;;  %v1524_v5 = vadd.f32 %v1738_v60, %v1523_v1  ;;  %v1964_v6 = vpop.f32.mrb[51].mxu1  ;;  %v1527_v9 = vmul.f32 0.5, %v1521_v62 }
 0xe84   :  { %2039 = verf.f32 %v1529_v2  ;;  %v1530_v7 = vmul.f32 0.70710677, %v1524_v5  ;;  %v1528_v10 = vmul.f32 0.5, %v1524_v5 }
 0xe86   :  { %2041 = verf.f32 %v1530_v7 }
 0xe8e   :  { %v2040_v0 = vpop.eup %2039 }
 0xe8f   :  { %v1533_v30 = vadd.f32 1.0, %v2040_v0 }
 0xe90   :  { %v2042_v8 = vpop.eup %2041 }
 0xe91   :  { %v1534_v11 = vadd.f32 1.0, %v2042_v8  ;;  %v1535_v12 = vmul.f32 %v1533_v30, %v1527_v9 }
 0xe93   :  { %v1536_v13 = vmul.f32 %v1534_v11, %v1528_v10 }
 0xe95   :  { %v1537_v14 = vpack.c.bf16 %v1536_v13, %v1535_v12 }
 0xe97   :  { %1974 = vmatmul.mubr.msk.bf16.vlgmr.msra.gmra.mrb[44].mxu0 %vm1570_vm4, %v1537_v14 }
 0xf6a   :  { %v1608_v15 = vpop.f32.mrb[44].mxu0 }
 0xf6b   :  { %v1615_v17 = vadd.f32 %v1608_v15, %v1457_v54  ;;  %v1975_v18 = vpop.f32.mrb[45].mxu0 }
 0xf6c   :  { %v1611_v19 = vpop.f32.mrb[46].mxu0 }
 0xf6d   :  { %v1624_v20 = vadd.f32 %v1747_v16, %v1615_v17  ;;  %v1616_v22 = vadd.f32 %v1611_v19, %v1458_v55  ;;  %v1976_v23 = vpop.f32.mrb[47].mxu0 }
 0xf6f   :  { %v1625_v24 = vadd.f32 %v1747_v16, %v1616_v22  ;;  %v1628_v26 = vsel %vm135_vm1, %v1624_v20, 0.0  ;;  %v1634_v27 = vmul.f32 %v1624_v20, %v1624_v20 }
 0xf70   :  { %1629 = vadd.xlane.f32.xlu0 %v1628_v26 }
 0xf71   :  { %v1631_v3 = vsel %vm135_vm1, %v1625_v24, 0.0  ;;  %v1635_v4 = vmul.f32 %v1625_v24, %v1625_v24  ;;  %v1636_v28 = vsel %vm135_vm1, %v1634_v27, 0.0 }
 0xf72   :  { %1632 = vadd.xlane.f32.xlu1 %v1631_v3 }
 0xf73   :  { %v1639_v29 = vsel %vm135_vm1, %v1635_v4, 0.0 }
 0xf74   :  { %1637 = vadd.xlane.f32.xlu0 %v1636_v28 }
 0xf76   :  { %1640 = vadd.xlane.f32.xlu1 %v1639_v29 }
 0xffd   :  { %v1630_v32 = vpop.xlane.xlu0 %1629 }
 0xffe   :  { %v1642_v33 = vmul.f32 0.03125, %v1630_v32 }
 0xfff   :  { %v1633_v34 = vpop.xlane.xlu1 %1632 }
0x1000   :  { %v1643_v35 = vmul.f32 0.03125, %v1633_v34  ;;  %v1646_v37 = vmul.f32 %v1642_v33, %v1642_v33  ;;  %v1652_v49 = vsub.f32 %v1624_v20, %v1642_v33 }
0x1001   :  { %v1638_v36 = vpop.xlane.xlu0 %1637 }
0x1002   :  { %v1644_v38 = vmul.f32 0.03125, %v1638_v36  ;;  %v1647_v21 = vmul.f32 %v1643_v35, %v1643_v35  ;;  %v1653_v44 = vsub.f32 %v1625_v24, %v1643_v35 }
0x1003   :  { %v1641_v41 = vpop.xlane.xlu1 %1640 }
0x1004   :  { %v1648_v43 = vsub.f32 %v1644_v38, %v1646_v37  ;;  %v1645_v25 = vmul.f32 0.03125, %v1641_v41 }
0x1006   :  { %v1650_v45 = vmax.f32 %v1648_v43, 0.0  ;;  %v1649_v31 = vsub.f32 %v1645_v25, %v1647_v21 }
0x1008   :  { %v1654_v46 = vadd.f32 1e-05, %v1650_v45  ;;  %v1651_v47 = vmax.f32 %v1649_v31, 0.0 }
0x100a   :  { %2043 = vrsqrt.f32 %v1654_v46  ;;  %v1655_v48 = vadd.f32 1e-05, %v1651_v47 }
0x100c   :  { %2045 = vrsqrt.f32 %v1655_v48 }
0x1014   :  { %v2044_v50 = vpop.eup %2043 }
0x1015   :  { %v1658_v51 = vmul.f32 %v2044_v50, %v1652_v49 }
0x1016   :  { %v2046_v52 = vpop.eup %2045 }
0x1017   :  { %v1659_v53 = vmul.f32 %v2046_v52, %v1653_v44  ;;  %v1666_v54 = vmul.f32 %v1748_v42, %v1658_v51 }
0x1019   :  { %v1667_v55 = vmul.f32 %v1748_v42, %v1659_v53  ;;  %v1674_v56 = vadd.f32 %v1749_v40, %v1666_v54 }
0x101b   :  { %v1675_v57 = vadd.f32 %v1749_v40, %v1667_v55  ;;  %1676 = vst.msk [vmem:[#allocation10] sm:$0xff] %vm135_vm1, %v1674_v56 }
0x101d   :  { %1677 = vst.msk [vmem:[#allocation10 + $0x8] sm:$0xff] %vm135_vm1, %v1675_v57 }
0x101e   :  { %2146 = shalt.err (!%p2143_p8)
}
0x101f   :  { %s2147_s7 = scalar_lea.hbm %s2642_s17, 256 }
0x1020   :  { %p2148_p9 = scmp.ne.s32.totalorder %s2642_s17, %s2147_s7  ;;  %p2151_p10 = scmp.lt.u32.totalorder %s2147_s7, %s2642_s17 }
0x1022   :  { %p2153_p11 = pnand %p2151_p10, %p2148_p9 }
0x1024   :  { %2156 = shalt.err (!%p2153_p11)
}
0x1025   :  { %s2177_s9 = smov 128   ;;  %s2178_s24 = smov 8  }
0x1026   :  { %1689 = dma.vmem_to_hbm [thread:$0]  %s1684_s5, 256, %s2642_s17, [#allocation4], %s2177_s9, %s2177_s9, %s2178_s24  }
0x1027   :  { %2163 = dma.done.wait [#allocation4], 256  }
0x1028   :  { %2164 = vsyncadd [#allocation4], 4294967040 }
0x1029   :  { %1693 = vsyncpa [#allocation3], 1 }
0x102a   :  { %1694 = vsyncpa [#allocation6], 1 }
0x102b   :  { %1695 = vsyncpa [#allocation9], 1 }
0x102c   :  { %1696 = vsyncpa [#allocation4], 1 }

// kernel: tpu_custom_call.1
= control target key start
LH: loop header
LB: loop body
LE: loop exit
PB: predicated region body
PF: predicated region fallthrough
CT: control target
= control target key end

     0   :  { %s2625_s0 = inlined_call_operand.vmem [shape: f32[2,8,32], index: 0, kind: input, shape index: {}]   ;;  %s2626_s1 = inlined_call_operand.vmem [shape: bf16[32,32], index: 1, kind: input, shape index: {}]   ;;  %s2627_s2 = inlined_call_operand.vmem [shape: bf16[32,32], index: 2, kind: input, shape index: {}]   ;;  %s2628_s3 = inlined_call_operand.hbm [shape: bf16[32,32], index: 3, kind: input, shape index: {}]   ;;  %s2629_s4 = inlined_call_operand.vmem [shape: f32[1,32], index: 4, kind: input, shape index: {}]   ;;  %s2630_s5 = inlined_call_operand.vmem [shape: f32[1,32], index: 5, kind: input, shape index: {}]   ;;  %s2631_s6 = inlined_call_operand.hbm [shape: f32[1,32], index: 6, kind: input, shape index: {}]   ;;  %s2632_s7 = inlined_call_operand.hbm [shape: bf16[32,32], index: 7, kind: input, shape index: {}]   ;;  %s2633_s8 = inlined_call_operand.hbm [shape: f32[1,32], index: 8, kind: input, shape index: {}]   ;;  %s2634_s9 = inlined_call_operand.vmem [shape: bf16[32,64], index: 9, kind: input, shape index: {}]   ;;  %s2635_s10 = inlined_call_operand.vmem [shape: f32[1,64], index: 10, kind: input, shape index: {}]   ;;  %s2636_s11 = inlined_call_operand.vmem [shape: bf16[64,32], index: 11, kind: input, shape index: {}]   ;;  %s2637_s12 = inlined_call_operand.vmem [shape: f32[1,32], index: 12, kind: input, shape index: {}]   ;;  %s2638_s13 = inlined_call_operand.vmem [shape: f32[1,32], index: 13, kind: input, shape index: {}]   ;;  %s2639_s14 = inlined_call_operand.vmem [shape: f32[1,32], index: 14, kind: input, shape index: {}]   ;;  %s2640_s15 = inlined_call_operand.vmem [shape: f32[1,32], index: 15, kind: input, shape index: {}]   ;;  %s2641_s16 = inlined_call_operand.vmem [shape: f32[1,32], index: 16, kind: input, shape index: {}]   ;;  %s2642_s17 = inlined_call_operand.hbm [shape: f32[2,8,32], index: 17, kind: output, shape index: {}]  }
   0x1   :  { %2645 = sst [smem:[#allocation15_spill]] %s2625_s0 }
   0x2   :  { %2646 = sst [smem:[#allocation16_spill]] %s2626_s1 }
   0x3   :  { %22 = vsyncpa [#allocation3], 0 }
   0x4   :  { %23 = vsyncpa [#allocation6], 0 }
   0x5   :  { %24 = vsyncpa [#allocation9], 0 }
   0x6   :  { %25 = vsyncpa [#allocation4], 0  ;;  %s2165_s24 = smov [#allocation5]   ;;  %s2166_s26 = smov [#allocation2]  }
   0x7   :  { %s54_s25 = sshll.u32 %s2165_s24, 4  ;;  %s37_s27 = sshll.u32 %s2166_s26, 4  ;;  %s55_s25 = int_to_ptr.vmem [resolvable:$true] %s54_s25  ;;  %s2269_s27 = int_to_ptr.vmem [resolvable:$true] %s37_s27 }
   0x8   :  { %s2047_s0 = scalar_lea.hbm %s2631_s6, 16 }
   0x9   :  { %p2048_p0 = scmp.ne.s32.totalorder %s2631_s6, %s2047_s0  ;;  %p2051_p1 = scmp.lt.u32.totalorder %s2047_s0, %s2631_s6 }
   0xb   :  { %p2053_p2 = pnand %p2051_p1, %p2048_p0 }
   0xd   :  { %2056 = shalt.err (!%p2053_p2)
}
   0xe   :  { %s2057_s20 = scalar_lea.vmem %s55_s25, 16  ;;  %s2061_s21 = scalar_lea.vmem %s55_s25, 32 }
   0xf   :  { %p2058_p3 = scmp.ne.s32.totalorder %s55_s25, %s2057_s20  ;;  %p2062_p4 = scmp.lt.s32.totalorder %s55_s25, %s55_s25 }
  0x10   :  { %p2063_p5 = scmp.lt.s32.totalorder %s2061_s21, %s2057_s20 }
  0x12   :  { %p2064_p6 = por %p2063_p5, %p2062_p4 }
  0x14   :  { %p2065_p7 = pnand %p2064_p6, %p2058_p3 }
  0x16   :  { %2068 = shalt.err (!%p2065_p7)
}
  0x17   :  { %57 = dma.hbm_to_vmem [thread:$0]  %s2631_s6, 16, %s55_s25, [#allocation6]  }
  0x18   :  { %s2069_s28 = scalar_lea.hbm %s2628_s3, 256 }
  0x19   :  { %p2070_p8 = scmp.ne.s32.totalorder %s2628_s3, %s2069_s28  ;;  %p2073_p9 = scmp.lt.u32.totalorder %s2069_s28, %s2628_s3 }
  0x1b   :  { %p2075_p10 = pnand %p2073_p9, %p2070_p8 }
  0x1d   :  { %2078 = shalt.err (!%p2075_p10)
}
  0x1e   :  { %s2079_s19 = scalar_lea.vmem %s2269_s27, 256  ;;  %p2084_p12 = scmp.lt.s32.totalorder %s2269_s27, %s2269_s27 }
  0x1f   :  { %p2080_p11 = scmp.ne.s32.totalorder %s2269_s27, %s2079_s19  ;;  %p2085_p13 = scmp.lt.s32.totalorder %s2079_s19, %s2079_s19 }
  0x21   :  { %p2086_p0 = por %p2085_p13, %p2084_p12 }
  0x23   :  { %p2087_p1 = pnand %p2086_p0, %p2080_p11 }
  0x25   :  { %2090 = shalt.err (!%p2087_p1)
}
  0x26   :  { %s2167_s6 = smov 64   ;;  %s2168_s25 = smov 4  }
  0x27   :  { %43 = dma.hbm_to_vmem [thread:$0]  %s2628_s3, 256, %s2269_s27, [#allocation3], %s2167_s6, %s2167_s6, %s2168_s25  }
  0x28   :  { %s2169_s21 = smov [#allocation7]   ;;  %s2170_s23 = smov [#allocation8]  }
  0x29   :  { %s63_s22 = sshll.u32 %s2169_s21, 4  ;;  %s76_s24 = sshll.u32 %s2170_s23, 4  ;;  %s64_s22 = int_to_ptr.vmem [resolvable:$true] %s63_s22  ;;  %s77_s24 = int_to_ptr.vmem [resolvable:$true] %s76_s24 }
  0x2a   :  { %s2091_s29 = scalar_lea.hbm %s2632_s7, 256 }
  0x2b   :  { %p2092_p2 = scmp.ne.s32.totalorder %s2632_s7, %s2091_s29  ;;  %p2095_p3 = scmp.lt.u32.totalorder %s2091_s29, %s2632_s7 }
  0x2d   :  { %p2097_p4 = pnand %p2095_p3, %p2092_p2 }
  0x2f   :  { %2100 = shalt.err (!%p2097_p4)
}
  0x30   :  { %s2101_s3 = scalar_lea.vmem %s64_s22, 256  ;;  %p2106_p6 = scmp.lt.s32.totalorder %s64_s22, %s64_s22 }
  0x31   :  { %p2102_p5 = scmp.ne.s32.totalorder %s64_s22, %s2101_s3  ;;  %p2107_p7 = scmp.lt.s32.totalorder %s2101_s3, %s2101_s3 }
  0x33   :  { %p2108_p8 = por %p2107_p7, %p2106_p6 }
  0x35   :  { %p2109_p9 = pnand %p2108_p8, %p2102_p5 }
  0x37   :  { %2112 = shalt.err (!%p2109_p9)
}
  0x38   :  { %69 = dma.hbm_to_vmem [thread:$0]  %s2632_s7, 256, %s64_s22, [#allocation6], %s2167_s6, %s2167_s6, %s2168_s25  }
  0x39   :  { %s2113_s23 = scalar_lea.hbm %s2633_s8, 16 }
  0x3a   :  { %p2114_p10 = scmp.ne.s32.totalorder %s2633_s8, %s2113_s23  ;;  %p2117_p11 = scmp.lt.u32.totalorder %s2113_s23, %s2633_s8 }
  0x3c   :  { %p2119_p12 = pnand %p2117_p11, %p2114_p10 }
  0x3e   :  { %2122 = shalt.err (!%p2119_p12)
}
  0x3f   :  { %s2123_s30 = scalar_lea.vmem %s77_s24, 16  ;;  %s2127_s18 = scalar_lea.vmem %s77_s24, 32 }
  0x40   :  { %p2124_p13 = scmp.ne.s32.totalorder %s77_s24, %s2123_s30  ;;  %p2128_p0 = scmp.lt.s32.totalorder %s77_s24, %s77_s24 }
  0x41   :  { %p2129_p1 = scmp.lt.s32.totalorder %s2127_s18, %s2123_s30 }
  0x43   :  { %p2130_p2 = por %p2129_p1, %p2128_p0 }
  0x45   :  { %p2131_p3 = pnand %p2130_p2, %p2124_p13 }
  0x47   :  { %2134 = shalt.err (!%p2131_p3)
}
  0x48   :  { %79 = dma.hbm_to_vmem [thread:$0]  %s2633_s8, 16, %s77_s24, [#allocation9]  }
  0x49   :  { %2157 = dma.done.wait [#allocation3], 256  }
  0x4a   :  { %2158 = vsyncadd [#allocation3], 4294967040 }
  0x4b   :  { %2159 = dma.done.wait [#allocation6], 272  }
  0x4c   :  { %2160 = vsyncadd [#allocation6], 4294967024 }
  0x4d   :  { %2161 = dma.done.wait [#allocation9], 16  }
  0x4e   :  { %2162 = vsyncadd [#allocation9], 4294967280  ;;  %v2171_v0 = vmov 0.0   ;;  %vm2172_vm0 = vmmov 0   ;;  %s2647_s22 = sld [smem:[#allocation16_spill]]  ;;  %s2648_s1 = sld [smem:[#allocation15_spill]] }
  0x4f   :  { %1813 = vmatprep.subr.bf16.mxu1 %v2171_v0  ;;  %1817 = vmatprep.mubr.msk.bf16.mxu1 %vm2172_vm0, %v2171_v0  ;;  %vm135_vm1 = vcmask 261120   ;;  %v1993_v5 = vld [vmem:[%s2627_s2] sm:$0xff]   ;;  %v1994_v7 = vld [vmem:[%s2627_s2 + $0x8] sm:$0xff]   ;;  %vm328_vm2 = vcmask 64512   ;;  %v1705_v33 = vld [vmem:[#allocation5] ss:$0 sm:$0xff] }
  0x50   :  { %1829 = vmatprep.subr.bf16.mxu0 %v2171_v0  ;;  %1833 = vmatprep.mubr.msk.bf16.mxu0 %vm2172_vm0, %v2171_v0  ;;  %v1995_v8 = vld [vmem:[#allocation2] sm:$0xff]   ;;  %v1996_v9 = vld [vmem:[#allocation2 + $0x8] sm:$0xff]   ;;  %vm448_vm3 = vcmask 1043456   ;;  %s2175_s7 = smov 104   ;;  %vm1570_vm4 = vcmask 523264   ;;  %s2176_s18 = smov [#allocation10]  }
  0x51   :  { %1830 = vmatpush3.bf16.msra.mxu0 %v1995_v8  ;;  %v1701_v14 = vld [vmem:[%s2630_s5] ss:$0 sm:$0xff]  ;;  %s2173_s5 = smov 120  }
  0x52   :  { %1831 = vmatprep.subr.bf16.mxu0 %v2171_v0  ;;  %v1697_v15 = vld [vmem:[%s2629_s4] ss:$0 sm:$0xff]  ;;  %s2174_s4 = smov 112  }
  0x54   :  { %v1991_v1 = vld [vmem:[%s2647_s22] sm:$0xff]   ;;  %v1992_v2 = vld [vmem:[%s2647_s22 + $0x8] sm:$0xff]  }
  0x55   :  { %1814 = vmatpush3.bf16.msra.mxu1 %v1991_v1  ;;  %v2339_v3 = vld [vmem:[%s2648_s1] sm:$0xff]  ;;  %v2344_v4 = vld [vmem:[%s2648_s1 + $0x8] sm:$0xff]  ;;  %1832 = vmatpush3.bf16.msra.mxu0 %v1996_v9 }
  0x56   :  { %1815 = vmatprep.subr.bf16.mxu1 %v2171_v0  ;;  %v111_v6 = vpack.c.bf16 %v2344_v4, %v2339_v3  ;;  %1843 = vmatprep.subr.bf16.mxu0 %v2171_v0 }
  0x58   :  { %1834 = vmatmul.mubr.msk.bf16.vlgmr.msra.gmra.mrb[0].mxu0 %vm135_vm1, %v111_v6 }
  0x59   :  { %1816 = vmatpush3.bf16.msra.mxu1 %v1992_v2  ;;  %1845 = vmatprep.mubr.msk.bf16.mxu0 %vm2172_vm0, %v2171_v0 }
  0x5a   :  { %1821 = vmatprep.subr.bf16.mxu1 %v2171_v0 }
  0x5c   :  { %1818 = vmatmul.mubr.msk.bf16.vlgmr.msra.gmra.mrb[0].mxu1 %vm135_vm1, %v111_v6 }
  0x5d   :  { %1822 = vmatpush3.bf16.msra.mxu1 %v1993_v5  ;;  %1825 = vmatprep.mubr.msk.bf16.mxu1 %vm2172_vm0, %v2171_v0 }
  0x5e   :  { %1823 = vmatprep.subr.bf16.mxu1 %v2171_v0 }
  0x61   :  { %1824 = vmatpush3.bf16.msra.mxu1 %v1994_v7 }
  0x62   :  { %1837 = vmatprep.subr.bf16.mxu1 %v2171_v0 }
  0x64   :  { %1826 = vmatmul.mubr.msk.bf16.vlgmr.msra.gmra.mrb[4].mxu1 %vm135_vm1, %v111_v6 }
  0x65   :  { %1839 = vmatprep.mubr.msk.bf16.mxu1 %vm2172_vm0, %v2171_v0 }
 0x12b   :  { %v301_v32 = vpop.f32.mrb[0].mxu0 }
 0x12c   :  { %v1835_v34 = vpop.f32.mrb[1].mxu0  ;;  %v302_v37 = vadd.f32 %v1705_v33, %v301_v32 }
 0x12d   :  { %v304_v35 = vpop.f32.mrb[2].mxu0 }
 0x12e   :  { %v1836_v36 = vpop.f32.mrb[3].mxu0  ;;  %v305_v38 = vadd.f32 %v1705_v33, %v304_v35  ;;  %v2399_v39 = vpack.c.bf16 %v302_v37, %v302_v37 }
 0x12f   :  { %v173_v10 = vpop.f32.mrb[0].mxu1 }
 0x130   :  { %v1819_v11 = vpop.f32.mrb[1].mxu1  ;;  %v174_v20 = vadd.f32 %v1697_v15, %v173_v10  ;;  %v2401_v40 = vpack.c.bf16 %v305_v38, %v305_v38  ;;  %v450_v41 = vsel %vm448_vm3, %v2399_v39, 0 }
 0x131   :  { %v176_v12 = vpop.f32.mrb[2].mxu1 }
 0x132   :  { %v1820_v13 = vpop.f32.mrb[3].mxu1  ;;  %v177_v24 = vadd.f32 %v1697_v15, %v176_v12  ;;  %v308_v27 = vmul.f32 0.35355338, %v174_v20  ;;  %v496_v42 = vsel %vm448_vm3, %v2401_v40, 0 }
 0x134   :  { %v309_v29 = vmul.f32 0.35355338, %v177_v24  ;;  %v2387_v30 = vpack.c.bf16 %v308_v27, %v308_v27 }
 0x136   :  { %v2389_v31 = vpack.c.bf16 %v309_v29, %v309_v29 }
 0x137   :  { %v237_v16 = vpop.f32.mrb[4].mxu1 }
 0x138   :  { %v238_v17 = vadd.f32 %v1701_v14, %v237_v16  ;;  %v1827_v18 = vpop.f32.mrb[5].mxu1 }
 0x139   :  { %v240_v19 = vpop.f32.mrb[6].mxu1 }
 0x13a   :  { %v2375_v21 = vpack.c.bf16 %v238_v17, %v238_v17  ;;  %v241_v22 = vadd.f32 %v1701_v14, %v240_v19  ;;  %v1828_v23 = vpop.f32.mrb[7].mxu1 }
 0x13c   :  { %v2377_v25 = vpack.c.bf16 %v241_v22, %v241_v22  ;;  %v333_v26 = vsel %vm328_vm2, %v2375_v21, 0 }
 0x13d   :  { %1838 = vmatpush3.bf16.xpose.msra.mxu1 %v333_v26 }
 0x13e   :  { %592 = vrot.lane.b32.xlu1 %v2377_v25, %s2173_s5  ;;  %v379_v28 = vsel %vm328_vm2, %v2377_v25, 0  ;;  %1849 = vmatprep.subr.bf16.mxu1 %v2171_v0 }
 0x13f   :  { %1844 = vmatpush3.bf16.xpose.msra.mxu0 %v379_v28 }
 0x140   :  { %1855 = vmatprep.subr.bf16.mxu0 %v2171_v0 }
 0x144   :  { %1840 = vmatmul.mubr.msk.bf16.vlgmr.msra.gmra.mrb[8].mxu1 %vm328_vm2, %v2387_v30 }
 0x145   :  { %1851 = vmatprep.mubr.msk.bf16.mxu1 %vm2172_vm0, %v2171_v0  ;;  %1850 = vmatpush3.bf16.msra.mxu1 %v450_v41 }
 0x146   :  { %1846 = vmatmul.mubr.msk.bf16.vlgmr.msra.gmra.mrb[4].mxu0 %vm328_vm2, %v2389_v31  ;;  %1861 = vmatprep.subr.bf16.mxu1 %v2171_v0 }
 0x147   :  { %1857 = vmatprep.mubr.msk.bf16.mxu0 %vm2172_vm0, %v2171_v0  ;;  %1856 = vmatpush3.bf16.msra.mxu0 %v496_v42 }
 0x148   :  { %1867 = vmatprep.subr.bf16.mxu0 %v2171_v0 }
 0x1b0   :  { %v593_v63 = vpop.permute.xlu1 %592 }
 0x1b1   :  { %v598_v13 = vsel %vm328_vm2, %v593_v63, 0  ;;  %v539_v63 = vld [vmem:[#allocation7] sm:$0xf] }
 0x217   :  { %v369_v43 = vpop.f32.mrb[8].mxu1 }
 0x218   :  { %v1841_v44 = vpop.f32.mrb[9].mxu1  ;;  %v421_v45 = vsel %vm328_vm2, %v369_v43, -inf }
 0x219   :  { %v415_v46 = vpop.f32.mrb[4].mxu0  ;;  %422 = vmax.xlane.f32.xlu0 %v421_v45  ;;  %v372_v47 = vpop.f32.mrb[10].mxu1 }
 0x21a   :  { %v1842_v48 = vpop.f32.mrb[11].mxu1  ;;  %v1847_v49 = vpop.f32.mrb[5].mxu0  ;;  %v424_v52 = vsel %vm328_vm2, %v415_v46, -inf }
 0x21b   :  { %v418_v50 = vpop.f32.mrb[6].mxu0 }
 0x21c   :  { %v1848_v51 = vpop.f32.mrb[7].mxu0 }
 0x21d   :  { %425 = vmax.xlane.f32.xlu0 %v424_v52 }
 0x233   :  { %542 = vrot.lane.b32.xlu0 %v2375_v21, %s2173_s5 }
 0x2a6   :  { %v423_v53 = vpop.xlane.xlu0 %422 }
 0x2a7   :  { %v427_v54 = vsub.f32 %v369_v43, %v423_v53 }
 0x2a9   :  { %v429_v55 = vmul.f32 1.442695, %v427_v54 }
 0x2aa   :  { %v426_v56 = vpop.xlane.xlu0 %425 }
 0x2ab   :  { %2003 = vpow2.f32 %v429_v55  ;;  %v428_v57 = vsub.f32 %v415_v46, %v426_v56 }
 0x2ad   :  { %v431_v58 = vmul.f32 1.442695, %v428_v57 }
 0x2ae   :  { %v543_v7 = vpop.permute.xlu0 %542 }
 0x2af   :  { %2005 = vpow2.f32 %v431_v58  ;;  %v548_v10 = vsel %vm328_vm2, %v543_v7, 0  ;;  %v761_v58 = vld [vmem:[#allocation7 + $0x4] sm:$0xf] }
 0x2b5   :  { %v2004_v59 = vpop.eup %2003 }
 0x2b6   :  { %v433_v60 = vsel %vm328_vm2, %v2004_v59, 0.0 }
 0x2b7   :  { %434 = vadd.xlane.f32.xlu1 %v433_v60 }
 0x2b9   :  { %v2006_v61 = vpop.eup %2005 }
 0x2ba   :  { %v436_v62 = vsel %vm328_vm2, %v2006_v61, 0.0 }
 0x2bb   :  { %437 = vadd.xlane.f32.xlu1 %v436_v62 }
 0x2cc   :  { %540 = vrot.lane.b32.xlu1 %v2387_v30, %s2173_s5 }
 0x2d0   :  { %590 = vrot.lane.b32.xlu1 %v2389_v31, %s2173_s5 }
 0x344   :  { %v435_v1 = vpop.xlane.xlu1 %434 }
 0x345   :  { %2007 = vrcp.f32 %v435_v1 }
 0x348   :  { %v438_v2 = vpop.xlane.xlu1 %437 }
 0x349   :  { %2009 = vrcp.f32 %v438_v2 }
 0x34c   :  { %v541_v14 = vpop.permute.xlu1 %540 }
 0x34f   :  { %v2008_v5 = vpop.eup %2007 }
 0x350   :  { %v441_v6 = vmul.f32 %v2008_v5, %v2004_v59  ;;  %v591_v15 = vpop.permute.xlu1 %590  ;;  %v813_v5 = vsel %vm448_vm3, %v539_v63, 0 }
 0x352   :  { %v443_v8 = vpack.c.bf16 %v441_v6, %v441_v6 }
 0x353   :  { %v2010_v9 = vpop.eup %2009 }
 0x354   :  { %v442_v11 = vmul.f32 %v2010_v9, %v2006_v61  ;;  %1852 = vmatmul.mubr.msk.bf16.vlgmr.msra.gmra.mrb[12].mxu1 %vm328_vm2, %v443_v8  ;;  %v766_v61 = vsel %vm448_vm3, %v761_v58, 0 }
 0x355   :  { %1862 = vmatpush3.bf16.xpose.msra.mxu1 %v548_v10  ;;  %1863 = vmatprep.mubr.msk.bf16.mxu1 %vm2172_vm0, %v2171_v0 }
 0x356   :  { %v444_v12 = vpack.c.bf16 %v442_v11, %v442_v11  ;;  %1873 = vmatprep.subr.bf16.mxu1 %v2171_v0 }
 0x358   :  { %1858 = vmatmul.mubr.msk.bf16.vlgmr.msra.gmra.mrb[8].mxu0 %vm328_vm2, %v444_v12 }
 0x359   :  { %1868 = vmatpush3.bf16.xpose.msra.mxu0 %v598_v13  ;;  %1869 = vmatprep.mubr.msk.bf16.mxu0 %vm2172_vm0, %v2171_v0 }
 0x35a   :  { %1879 = vmatprep.subr.bf16.mxu0 %v2171_v0 }
 0x35c   :  { %1864 = vmatmul.mubr.msk.bf16.vlgmr.msra.gmra.mrb[16].mxu1 %vm328_vm2, %v541_v14 }
 0x35d   :  { %1875 = vmatprep.mubr.msk.bf16.mxu1 %vm2172_vm0, %v2171_v0 }
 0x360   :  { %1870 = vmatmul.mubr.msk.bf16.vlgmr.msra.gmra.mrb[12].mxu0 %vm328_vm2, %v591_v15 }
 0x361   :  { %1881 = vmatprep.mubr.msk.bf16.mxu0 %vm2172_vm0, %v2171_v0 }
 0x427   :  { %v2435_v16 = vpop.f32.mrb[12].mxu1 }
 0x428   :  { %v1853_v17 = vpop.f32.mrb[13].mxu1 }
 0x429   :  { %v489_v18 = vpop.f32.mrb[14].mxu1 }
 0x42a   :  { %v1854_v19 = vpop.f32.mrb[15].mxu1 }
 0x42b   :  { %v2437_v20 = vpop.f32.mrb[8].mxu0 }
 0x42c   :  { %v538_v22 = vpack.c.bf16 %v2437_v20, %v2435_v16  ;;  %v1859_v23 = vpop.f32.mrb[9].mxu0 }
 0x42d   :  { %v535_v24 = vpop.f32.mrb[10].mxu0 }
 0x42e   :  { %v1860_v26 = vpop.f32.mrb[11].mxu0 }
 0x42f   :  { %v584_v27 = vpop.f32.mrb[16].mxu1 }
 0x430   :  { %v1865_v28 = vpop.f32.mrb[17].mxu1  ;;  %v640_v29 = vsel %vm328_vm2, %v584_v27, -inf }
 0x431   :  { %641 = vmax.xlane.f32.xlu0 %v640_v29  ;;  %v587_v32 = vpop.f32.mrb[18].mxu1 }
 0x432   :  { %v1866_v33 = vpop.f32.mrb[19].mxu1 }
 0x433   :  { %v634_v34 = vpop.f32.mrb[12].mxu0 }
 0x434   :  { %v1871_v35 = vpop.f32.mrb[13].mxu0  ;;  %v643_v36 = vsel %vm328_vm2, %v634_v34, -inf }
 0x435   :  { %644 = vmax.xlane.f32.xlu1 %v643_v36  ;;  %v637_v37 = vpop.f32.mrb[14].mxu0 }
 0x436   :  { %v1872_v38 = vpop.f32.mrb[15].mxu0 }
 0x446   :  { %712 = vrot.lane.b32.xlu1 %v2401_v40, %s2173_s5 }
 0x44a   :  { %858 = vrot.lane.b32.xlu1 %v2375_v21, %s2174_s4 }
 0x44e   :  { %908 = vrot.lane.b32.xlu1 %v2377_v25, %s2174_s4 }
 0x452   :  { %906 = vrot.lane.b32.xlu1 %v2389_v31, %s2174_s4 }
 0x4be   :  { %v642_v41 = vpop.xlane.xlu0 %641 }
 0x4bf   :  { %v646_v42 = vsub.f32 %v584_v27, %v642_v41 }
 0x4c1   :  { %v648_v43 = vmul.f32 1.442695, %v646_v42 }
 0x4c2   :  { %v645_v44 = vpop.xlane.xlu1 %644 }
 0x4c3   :  { %2011 = vpow2.f32 %v648_v43  ;;  %v647_v45 = vsub.f32 %v634_v34, %v645_v44 }
 0x4c5   :  { %v650_v46 = vmul.f32 1.442695, %v647_v45 }
 0x4c6   :  { %v713_v47 = vpop.permute.xlu1 %712 }
 0x4c7   :  { %2013 = vpow2.f32 %v650_v46  ;;  %v718_v48 = vsel %vm448_vm3, %v713_v47, 0 }
 0x4c8   :  { %1880 = vmatpush3.bf16.msra.mxu0 %v718_v48 }
 0x4c9   :  { %1891 = vmatprep.subr.bf16.mxu0 %v2171_v0 }
 0x4ca   :  { %v859_v6 = vpop.permute.xlu1 %858 }
 0x4cb   :  { %v864_v18 = vsel %vm328_vm2, %v859_v6, 0 }
 0x4cd   :  { %v2012_v49 = vpop.eup %2011 }
 0x4ce   :  { %v652_v50 = vsel %vm328_vm2, %v2012_v49, 0.0  ;;  %v909_v7 = vpop.permute.xlu1 %908 }
 0x4cf   :  { %653 = vadd.xlane.f32.xlu0 %v652_v50  ;;  %v914_v8 = vsel %vm328_vm2, %v909_v7, 0 }
 0x4d1   :  { %v2014_v51 = vpop.eup %2013 }
 0x4d2   :  { %v655_v52 = vsel %vm328_vm2, %v2014_v51, 0.0  ;;  %v907_v9 = vpop.permute.xlu1 %906 }
 0x4d3   :  { %656 = vadd.xlane.f32.xlu0 %v655_v52 }
 0x4e9   :  { %664 = vrot.lane.b32.xlu0 %v2399_v39, %s2173_s5  ;;  %s1683_s5 = sshll.u32 %s2176_s18, 4  ;;  %s1684_s5 = int_to_ptr.vmem [resolvable:$true] %s1683_s5 }
 0x4ea   :  { %p2140_p5 = scmp.lt.s32.totalorder %s1684_s5, %s1684_s5 }
 0x4ed   :  { %856 = vrot.lane.b32.xlu0 %v2387_v30, %s2174_s4 }
 0x55c   :  { %v654_v53 = vpop.xlane.xlu0 %653 }
 0x55d   :  { %2015 = vrcp.f32 %v654_v53 }
 0x560   :  { %v657_v54 = vpop.xlane.xlu0 %656 }
 0x561   :  { %2017 = vrcp.f32 %v657_v54 }
 0x564   :  { %v665_v55 = vpop.permute.xlu0 %664 }
 0x565   :  { %v670_v56 = vsel %vm448_vm3, %v665_v55, 0 }
 0x566   :  { %1874 = vmatpush3.bf16.msra.mxu1 %v670_v56 }
 0x567   :  { %v2016_v57 = vpop.eup %2015  ;;  %1885 = vmatprep.subr.bf16.mxu1 %v2171_v0 }
 0x568   :  { %v660_v59 = vmul.f32 %v2016_v57, %v2012_v49  ;;  %v857_v23 = vpop.permute.xlu0 %856 }
 0x56a   :  { %v662_v60 = vpack.c.bf16 %v660_v59, %v660_v59 }
 0x56b   :  { %v2018_v62 = vpop.eup %2017 }
 0x56c   :  { %v661_v1 = vmul.f32 %v2018_v62, %v2014_v51  ;;  %1876 = vmatmul.mubr.msk.bf16.vlgmr.msra.gmra.mrb[20].mxu1 %vm328_vm2, %v662_v60 }
 0x56d   :  { %1886 = vmatpush3.bf16.msra.mxu1 %v766_v61  ;;  %1887 = vmatprep.mubr.msk.bf16.mxu1 %vm2172_vm0, %v2171_v0 }
 0x56e   :  { %v663_v2 = vpack.c.bf16 %v661_v1, %v661_v1  ;;  %1897 = vmatprep.subr.bf16.mxu1 %v2171_v0 }
 0x570   :  { %1882 = vmatmul.mubr.msk.bf16.vlgmr.msra.gmra.mrb[16].mxu0 %vm328_vm2, %v663_v2 }
 0x571   :  { %1892 = vmatpush3.bf16.msra.mxu0 %v813_v5  ;;  %1893 = vmatprep.mubr.msk.bf16.mxu0 %vm2172_vm0, %v2171_v0 }
 0x572   :  { %1903 = vmatprep.subr.bf16.mxu0 %v2171_v0 }
 0x578   :  { %1894 = vmatmul.mubr.msk.bf16.vlgmr.msra.gmra.mrb[20].mxu0 %vm328_vm2, %v538_v22 }
 0x579   :  { %1905 = vmatprep.mubr.msk.bf16.mxu0 %vm2172_vm0, %v2171_v0 }
 0x57a   :  { %1904 = vmatpush3.bf16.xpose.msra.mxu0 %v914_v8 }
 0x57b   :  { %1915 = vmatprep.subr.bf16.mxu0 %v2171_v0 }
 0x581   :  { %1906 = vmatmul.mubr.msk.bf16.vlgmr.msra.gmra.mrb[24].mxu0 %vm328_vm2, %v907_v9 }
 0x582   :  { %1917 = vmatprep.mubr.msk.bf16.mxu0 %vm2172_vm0, %v2171_v0 }
 0x63f   :  { %v706_v10 = vpop.f32.mrb[20].mxu1 }
 0x640   :  { %v1877_v11 = vpop.f32.mrb[21].mxu1 }
 0x641   :  { %v709_v12 = vpop.f32.mrb[22].mxu1  ;;  %v1077_v11 = vld [vmem:[#allocation7 + $0x8] sm:$0xf] }
 0x642   :  { %v1878_v13 = vpop.f32.mrb[23].mxu1  ;;  %v1082_v12 = vsel %vm448_vm3, %v1077_v11, 0 }
 0x643   :  { %v754_v14 = vpop.f32.mrb[16].mxu0 }
 0x644   :  { %v760_v15 = vpack.c.bf16 %v754_v14, %v706_v10  ;;  %v1883_v16 = vpop.f32.mrb[17].mxu0 }
 0x645   :  { %v757_v17 = vpop.f32.mrb[18].mxu0 }
 0x646   :  { %v1884_v19 = vpop.f32.mrb[19].mxu0  ;;  %1888 = vmatmul.mubr.msk.bf16.vlgmr.msra.gmra.mrb[24].mxu1 %vm328_vm2, %v760_v15 }
 0x647   :  { %1898 = vmatpush3.bf16.xpose.msra.mxu1 %v864_v18  ;;  %1899 = vmatprep.mubr.msk.bf16.mxu1 %vm2172_vm0, %v2171_v0 }
 0x648   :  { %1909 = vmatprep.subr.bf16.mxu1 %v2171_v0 }
 0x64b   :  { %v849_v20 = vpop.f32.mrb[20].mxu0 }
 0x64c   :  { %v1895_v22 = vpop.f32.mrb[21].mxu0 }
 0x64d   :  { %v852_v24 = vpop.f32.mrb[22].mxu0 }
 0x64e   :  { %v1896_v26 = vpop.f32.mrb[23].mxu0  ;;  %1900 = vmatmul.mubr.msk.bf16.vlgmr.msra.gmra.mrb[28].mxu1 %vm328_vm2, %v857_v23 }
 0x64f   :  { %1911 = vmatprep.mubr.msk.bf16.mxu1 %vm2172_vm0, %v2171_v0 }
 0x654   :  { %v950_v27 = vpop.f32.mrb[24].mxu0 }
 0x655   :  { %v1907_v28 = vpop.f32.mrb[25].mxu0  ;;  %v959_v29 = vsel %vm328_vm2, %v950_v27, -inf }
 0x656   :  { %960 = vmax.xlane.f32.xlu1 %v959_v29  ;;  %v953_v32 = vpop.f32.mrb[26].mxu0 }
 0x657   :  { %v1908_v33 = vpop.f32.mrb[27].mxu0 }
 0x667   :  { %1028 = vrot.lane.b32.xlu1 %v2401_v40, %s2174_s4 }
 0x66b   :  { %1129 = vrot.lane.b32.xlu1 %v2375_v21, %s2175_s7 }
 0x66f   :  { %1179 = vrot.lane.b32.xlu1 %v2377_v25, %s2175_s7 }
 0x673   :  { %1177 = vrot.lane.b32.xlu1 %v2389_v31, %s2175_s7 }
 0x6e3   :  { %v961_v34 = vpop.xlane.xlu1 %960 }
 0x6e4   :  { %v963_v37 = vsub.f32 %v950_v27, %v961_v34 }
 0x6e6   :  { %v966_v38 = vmul.f32 1.442695, %v963_v37 }
 0x6e7   :  { %v1029_v35 = vpop.permute.xlu1 %1028 }
 0x6e8   :  { %v1034_v36 = vsel %vm448_vm3, %v1029_v35, 0  ;;  %2019 = vpow2.f32 %v966_v38 }
 0x6e9   :  { %1916 = vmatpush3.bf16.msra.mxu0 %v1034_v36 }
 0x6ea   :  { %1927 = vmatprep.subr.bf16.mxu0 %v2171_v0 }
 0x6eb   :  { %v1130_v59 = vpop.permute.xlu1 %1129 }
 0x6ec   :  { %v1135_v61 = vsel %vm328_vm2, %v1130_v59, 0 }
 0x6ef   :  { %v1180_v18 = vpop.permute.xlu1 %1179 }
 0x6f2   :  { %v2020_v47 = vpop.eup %2019 }
 0x6f3   :  { %v971_v50 = vsel %vm328_vm2, %v2020_v47, 0.0  ;;  %v1178_v27 = vpop.permute.xlu1 %1177 }
 0x719   :  { %v802_v41 = vpop.f32.mrb[24].mxu1 }
 0x71a   :  { %v2501_v42 = vadd.f32 %v849_v20, %v802_v41  ;;  %v1889_v21 = vpop.f32.mrb[25].mxu1 }
 0x71b   :  { %v805_v43 = vpop.f32.mrb[26].mxu1 }
 0x71c   :  { %v2503_v44 = vadd.f32 %v852_v24, %v805_v43  ;;  %v1890_v25 = vpop.f32.mrb[27].mxu1  ;;  %v1185_v24 = vsel %vm328_vm2, %v1180_v18, 0 }
 0x721   :  { %v900_v45 = vpop.f32.mrb[28].mxu1 }
 0x722   :  { %v1901_v31 = vpop.f32.mrb[29].mxu1  ;;  %v956_v46 = vsel %vm328_vm2, %v900_v45, -inf }
 0x723   :  { %957 = vmax.xlane.f32.xlu0 %v956_v46  ;;  %v903_v48 = vpop.f32.mrb[30].mxu1 }
 0x724   :  { %v1902_v49 = vpop.f32.mrb[31].mxu1 }
 0x727   :  { %972 = vadd.xlane.f32.xlu0 %v971_v50 }
 0x7b0   :  { %v958_v51 = vpop.xlane.xlu0 %957 }
 0x7b1   :  { %v962_v52 = vsub.f32 %v900_v45, %v958_v51 }
 0x7b3   :  { %v964_v53 = vmul.f32 1.442695, %v962_v52 }
 0x7b4   :  { %v973_v54 = vpop.xlane.xlu0 %972 }
 0x7b5   :  { %2021 = vpow2.f32 %v964_v53 }
 0x7b6   :  { %2023 = vrcp.f32 %v973_v54 }
 0x7bf   :  { %v2022_v55 = vpop.eup %2021 }
 0x7c0   :  { %v2024_v56 = vpop.eup %2023  ;;  %v968_v57 = vsel %vm328_vm2, %v2022_v55, 0.0 }
 0x7c1   :  { %v977_v58 = vmul.f32 %v2024_v56, %v2020_v47  ;;  %969 = vadd.xlane.f32.xlu0 %v968_v57 }
 0x7c3   :  { %v979_v60 = vpack.c.bf16 %v977_v58, %v977_v58 }
 0x7c5   :  { %1918 = vmatmul.mubr.msk.bf16.vlgmr.msra.gmra.mrb[28].mxu0 %vm328_vm2, %v979_v60  ;;  %v1348_v60 = vld [vmem:[#allocation7 + $0xc] sm:$0xf] }
 0x7c6   :  { %1928 = vmatpush3.bf16.xpose.msra.mxu0 %v1135_v61  ;;  %1929 = vmatprep.mubr.msk.bf16.mxu0 %vm2172_vm0, %v2171_v0  ;;  %v1353_v61 = vsel %vm448_vm3, %v1348_v60, 0  ;;  %v1738_v60 = vld [vmem:[%s2635_s10] ss:$0 sm:$0xff] }
 0x7c7   :  { %1939 = vmatprep.subr.bf16.mxu0 %v2171_v0 }
 0x7d7   :  { %980 = vrot.lane.b32.xlu0 %v2399_v39, %s2174_s4 }
 0x7db   :  { %1127 = vrot.lane.b32.xlu0 %v2387_v30, %s2175_s7 }
 0x84e   :  { %v970_v62 = vpop.xlane.xlu0 %969 }
 0x84f   :  { %2025 = vrcp.f32 %v970_v62 }
 0x852   :  { %v981_v63 = vpop.permute.xlu0 %980 }
 0x853   :  { %v986_v1 = vsel %vm448_vm3, %v981_v63, 0 }
 0x854   :  { %1910 = vmatpush3.bf16.msra.mxu1 %v986_v1 }
 0x855   :  { %1921 = vmatprep.subr.bf16.mxu1 %v2171_v0 }
 0x856   :  { %v1128_v2 = vpop.permute.xlu0 %1127 }
 0x857   :  { %1930 = vmatmul.mubr.msk.bf16.vlgmr.msra.gmra.mrb[32].mxu0 %vm328_vm2, %v1128_v2 }
 0x858   :  { %1941 = vmatprep.mubr.msk.bf16.mxu0 %vm2172_vm0, %v2171_v0 }
 0x859   :  { %v2026_v5 = vpop.eup %2025 }
 0x85a   :  { %v976_v6 = vmul.f32 %v2026_v5, %v2022_v55 }
 0x85c   :  { %v978_v7 = vpack.c.bf16 %v976_v6, %v976_v6 }
 0x85e   :  { %1912 = vmatmul.mubr.msk.bf16.vlgmr.msra.gmra.mrb[32].mxu1 %vm328_vm2, %v978_v7 }
 0x85f   :  { %1923 = vmatprep.mubr.msk.bf16.mxu1 %vm2172_vm0, %v2171_v0  ;;  %1922 = vmatpush3.bf16.msra.mxu1 %v1082_v12  ;;  %v1735_v12 = vld [vmem:[#allocation8] ss:$0 sm:$0xff] }
 0x860   :  { %1933 = vmatprep.subr.bf16.mxu1 %v2171_v0 }
 0x898   :  { %v1070_v30 = vpop.f32.mrb[28].mxu0 }
 0x899   :  { %v1919_v8 = vpop.f32.mrb[29].mxu0 }
 0x89a   :  { %v1073_v9 = vpop.f32.mrb[30].mxu0 }
 0x89b   :  { %v1920_v10 = vpop.f32.mrb[31].mxu0 }
 0x92a   :  { %v1171_v13 = vpop.f32.mrb[32].mxu0 }
 0x92b   :  { %v1931_v14 = vpop.f32.mrb[33].mxu0  ;;  %v1227_v15 = vsel %vm328_vm2, %v1171_v13, -inf }
 0x92c   :  { %1228 = vmax.xlane.f32.xlu0 %v1227_v15  ;;  %v1174_v16 = vpop.f32.mrb[34].mxu0 }
 0x92d   :  { %v1932_v17 = vpop.f32.mrb[35].mxu0 }
 0x931   :  { %v1022_v19 = vpop.f32.mrb[32].mxu1 }
 0x932   :  { %v1076_v20 = vpack.c.bf16 %v1070_v30, %v1022_v19  ;;  %v1913_v22 = vpop.f32.mrb[33].mxu1 }
 0x933   :  { %v1025_v23 = vpop.f32.mrb[34].mxu1 }
 0x934   :  { %v1914_v26 = vpop.f32.mrb[35].mxu1  ;;  %1924 = vmatmul.mubr.msk.bf16.vlgmr.msra.gmra.mrb[36].mxu1 %vm328_vm2, %v1076_v20 }
 0x935   :  { %1934 = vmatpush3.bf16.xpose.msra.mxu1 %v1185_v24  ;;  %1935 = vmatprep.mubr.msk.bf16.mxu1 %vm2172_vm0, %v2171_v0 }
 0x936   :  { %1945 = vmatprep.subr.bf16.mxu1 %v2171_v0 }
 0x93c   :  { %1936 = vmatmul.mubr.msk.bf16.vlgmr.msra.gmra.mrb[40].mxu1 %vm328_vm2, %v1178_v27 }
 0x93d   :  { %1947 = vmatprep.mubr.msk.bf16.mxu1 %vm2172_vm0, %v2171_v0 }
 0x9b9   :  { %v1229_v28 = vpop.xlane.xlu0 %1228 }
 0x9ba   :  { %v1233_v29 = vsub.f32 %v1171_v13, %v1229_v28 }
 0x9bc   :  { %v1235_v32 = vmul.f32 1.442695, %v1233_v29 }
 0x9be   :  { %2027 = vpow2.f32 %v1235_v32 }
 0x9c8   :  { %v2028_v33 = vpop.eup %2027 }
 0x9c9   :  { %v1239_v34 = vsel %vm328_vm2, %v2028_v33, 0.0 }
 0x9ca   :  { %1240 = vadd.xlane.f32.xlu0 %v1239_v34 }
 0xa07   :  { %v1118_v35 = vpop.f32.mrb[36].mxu1 }
 0xa08   :  { %v1125_v36 = vadd.f32 %v1118_v35, %v2501_v42  ;;  %v1925_v37 = vpop.f32.mrb[37].mxu1 }
 0xa09   :  { %v1121_v38 = vpop.f32.mrb[38].mxu1 }
 0xa0a   :  { %v1126_v41 = vadd.f32 %v1121_v38, %v2503_v44  ;;  %v1926_v21 = vpop.f32.mrb[39].mxu1 }
 0xa0f   :  { %v1221_v43 = vpop.f32.mrb[40].mxu1 }
 0xa10   :  { %v1937_v25 = vpop.f32.mrb[41].mxu1  ;;  %v1230_v45 = vsel %vm328_vm2, %v1221_v43, -inf }
 0xa11   :  { %1231 = vmax.xlane.f32.xlu1 %v1230_v45  ;;  %v1224_v31 = vpop.f32.mrb[42].mxu1 }
 0xa12   :  { %v1938_v46 = vpop.f32.mrb[43].mxu1 }
 0xa22   :  { %1299 = vrot.lane.b32.xlu1 %v2401_v40, %s2175_s7 }
 0xa57   :  { %v1241_v52 = vpop.xlane.xlu0 %1240 }
 0xa9e   :  { %v1232_v47 = vpop.xlane.xlu1 %1231 }
 0xa9f   :  { %v1234_v48 = vsub.f32 %v1221_v43, %v1232_v47 }
 0xaa1   :  { %v1237_v49 = vmul.f32 1.442695, %v1234_v48 }
 0xaa2   :  { %v1300_v50 = vpop.permute.xlu1 %1299 }
 0xaa3   :  { %2029 = vpow2.f32 %v1237_v49  ;;  %v1305_v42 = vsel %vm448_vm3, %v1300_v50, 0  ;;  %v1736_v49 = vld [vmem:[%s2638_s13] ss:$0 sm:$0xff] }
 0xaa4   :  { %1946 = vmatpush3.bf16.msra.mxu1 %v1305_v42  ;;  %2031 = vrcp.f32 %v1241_v52 }
 0xaa5   :  { %1957 = vmatprep.subr.bf16.mxu1 %v2171_v0 }
 0xaad   :  { %v2030_v44 = vpop.eup %2029 }
 0xaae   :  { %v1242_v51 = vsel %vm328_vm2, %v2030_v44, 0.0  ;;  %v2032_v40 = vpop.eup %2031 }
 0xaaf   :  { %1243 = vadd.xlane.f32.xlu0 %v1242_v51  ;;  %v1247_v54 = vmul.f32 %v2032_v40, %v2028_v33  ;;  %v1737_v40 = vld [vmem:[%s2639_s14] ss:$0 sm:$0xff] }
 0xab1   :  { %v1249_v57 = vpack.c.bf16 %v1247_v54, %v1247_v54 }
 0xac5   :  { %1251 = vrot.lane.b32.xlu0 %v2399_v39, %s2175_s7 }
 0xb3c   :  { %v1244_v53 = vpop.xlane.xlu0 %1243 }
 0xb3d   :  { %2033 = vrcp.f32 %v1244_v53 }
 0xb40   :  { %v1252_v55 = vpop.permute.xlu0 %1251 }
 0xb41   :  { %v1257_v56 = vsel %vm448_vm3, %v1252_v55, 0 }
 0xb42   :  { %1940 = vmatpush3.bf16.msra.mxu0 %v1257_v56 }
 0xb43   :  { %1951 = vmatprep.subr.bf16.mxu0 %v2171_v0 }
 0xb45   :  { %1942 = vmatmul.mubr.msk.bf16.vlgmr.msra.gmra.mrb[36].mxu0 %vm328_vm2, %v1249_v57  ;;  %v1999_v57 = vld [vmem:[%s2636_s11] sm:$0xff]  }
 0xb46   :  { %1953 = vmatprep.mubr.msk.bf16.mxu0 %vm2172_vm0, %v2171_v0  ;;  %1952 = vmatpush3.bf16.msra.mxu0 %v1353_v61 }
 0xb47   :  { %v2034_v58 = vpop.eup %2033  ;;  %1965 = vmatprep.subr.bf16.mxu0 %v2171_v0 }
 0xb48   :  { %v1248_v39 = vmul.f32 %v2034_v58, %v2030_v44  ;;  %v2000_v58 = vld [vmem:[%s2636_s11 + $0x8] sm:$0xff]  }
 0xb4a   :  { %v1250_v59 = vpack.c.bf16 %v1248_v39, %v1248_v39  ;;  %v2001_v39 = vld [vmem:[%s2636_s11 + $0x10] sm:$0xff]  }
 0xb4c   :  { %1948 = vmatmul.mubr.msk.bf16.vlgmr.msra.gmra.mrb[44].mxu1 %vm328_vm2, %v1250_v59  ;;  %v2002_v59 = vld [vmem:[%s2636_s11 + $0x18] sm:$0xff]  }
 0xb4d   :  { %1961 = vmatprep.mubr.msk.bf16.mxu1 %vm2172_vm0, %v2171_v0 }
 0xc18   :  { %v1293_v62 = vpop.f32.mrb[36].mxu0 }
 0xc19   :  { %v1943_v63 = vpop.f32.mrb[37].mxu0 }
 0xc1a   :  { %v1296_v1 = vpop.f32.mrb[38].mxu0 }
 0xc1b   :  { %v1944_v2 = vpop.f32.mrb[39].mxu0 }
 0xc1f   :  { %v1341_v5 = vpop.f32.mrb[44].mxu1 }
 0xc20   :  { %v1347_v6 = vpack.c.bf16 %v1341_v5, %v1293_v62  ;;  %v1949_v7 = vpop.f32.mrb[45].mxu1 }
 0xc21   :  { %v1344_v30 = vpop.f32.mrb[46].mxu1 }
 0xc22   :  { %v1950_v8 = vpop.f32.mrb[47].mxu1  ;;  %1954 = vmatmul.mubr.msk.bf16.vlgmr.msra.gmra.mrb[40].mxu0 %vm328_vm2, %v1347_v6 }
 0xc23   :  { %1973 = vmatprep.mubr.msk.bf16.mxu0 %vm2172_vm0, %v2171_v0  ;;  %1966 = vmatpush3.bf16.msra.mxu0 %v1999_v57 }
 0xc24   :  { %1967 = vmatprep.subr.bf16.mxu0 %v2171_v0 }
 0xc27   :  { %1968 = vmatpush3.bf16.msra.mxu0 %v2000_v58 }
 0xc28   :  { %1969 = vmatprep.subr.bf16.mxu0 %v2171_v0 }
 0xc2b   :  { %1970 = vmatpush3.bf16.msra.mxu0 %v2001_v39 }
 0xc2c   :  { %1971 = vmatprep.subr.bf16.mxu0 %v2171_v0 }
 0xc2f   :  { %1972 = vmatpush3.bf16.msra.mxu0 %v2002_v59 }
 0xcf5   :  { %v1389_v9 = vpop.f32.mrb[40].mxu0 }
 0xcf6   :  { %v1396_v10 = vadd.f32 %v1389_v9, %v1125_v36  ;;  %v1955_v11 = vpop.f32.mrb[41].mxu0 }
 0xcf7   :  { %v1392_v13 = vpop.f32.mrb[42].mxu0 }
 0xcf8   :  { %v1398_v14 = vadd.f32 %v1396_v10, %v2339_v3  ;;  %v1397_v15 = vadd.f32 %v1392_v13, %v1126_v41  ;;  %v1956_v16 = vpop.f32.mrb[43].mxu0  ;;  %v1997_v3 = vld [vmem:[%s2634_s9] sm:$0xff]  }
 0xcf9   :  { %1958 = vmatpush3.bf16.msra.mxu1 %v1997_v3  ;;  %v1747_v16 = vld [vmem:[%s2637_s12] ss:$0 sm:$0xff] }
 0xcfa   :  { %v1407_v17 = vadd.f32 %v1735_v12, %v1398_v14  ;;  %v1399_v18 = vadd.f32 %v1397_v15, %v2344_v4  ;;  %v1998_v4 = vld [vmem:[%s2634_s9 + $0x8] sm:$0xff]   ;;  %1959 = vmatprep.subr.bf16.mxu1 %v2171_v0 }
 0xcfc   :  { %v1408_v19 = vadd.f32 %v1735_v12, %v1399_v18  ;;  %v1411_v20 = vsel %vm135_vm1, %v1407_v17, 0.0  ;;  %v1417_v24 = vmul.f32 %v1407_v17, %v1407_v17 }
 0xcfd   :  { %1412 = vadd.xlane.f32.xlu1 %v1411_v20  ;;  %1960 = vmatpush3.bf16.msra.mxu1 %v1998_v4 }
 0xcfe   :  { %v1414_v22 = vsel %vm135_vm1, %v1408_v19, 0.0  ;;  %v1418_v23 = vmul.f32 %v1408_v19, %v1408_v19  ;;  %v1419_v27 = vsel %vm135_vm1, %v1417_v24, 0.0 }
 0xcff   :  { %1415 = vadd.xlane.f32.xlu0 %v1414_v22 }
 0xd00   :  { %v1422_v26 = vsel %vm135_vm1, %v1418_v23, 0.0 }
 0xd01   :  { %1423 = vadd.xlane.f32.xlu1 %v1422_v26 }
 0xd03   :  { %1420 = vadd.xlane.f32.xlu0 %v1419_v27 }
 0xd8a   :  { %v1413_v28 = vpop.xlane.xlu1 %1412 }
 0xd8b   :  { %v1425_v32 = vmul.f32 0.03125, %v1413_v28 }
 0xd8c   :  { %v1416_v29 = vpop.xlane.xlu0 %1415 }
 0xd8d   :  { %v1426_v33 = vmul.f32 0.03125, %v1416_v29  ;;  %v1429_v38 = vmul.f32 %v1425_v32, %v1425_v32  ;;  %v1435_v50 = vsub.f32 %v1407_v17, %v1425_v32 }
 0xd8e   :  { %v1424_v34 = vpop.xlane.xlu1 %1423 }
 0xd8f   :  { %v1430_v35 = vmul.f32 %v1426_v33, %v1426_v33  ;;  %v1428_v36 = vmul.f32 0.03125, %v1424_v34  ;;  %v1436_v47 = vsub.f32 %v1408_v19, %v1426_v33 }
 0xd90   :  { %v1421_v37 = vpop.xlane.xlu0 %1420 }
 0xd91   :  { %v1432_v41 = vsub.f32 %v1428_v36, %v1430_v35  ;;  %v1427_v21 = vmul.f32 0.03125, %v1421_v37 }
 0xd93   :  { %v1434_v43 = vmax.f32 %v1432_v41, 0.0  ;;  %v1431_v25 = vsub.f32 %v1427_v21, %v1429_v38 }
 0xd95   :  { %v1438_v45 = vadd.f32 1e-05, %v1434_v43  ;;  %v1433_v31 = vmax.f32 %v1431_v25, 0.0 }
 0xd97   :  { %2035 = vrsqrt.f32 %v1438_v45  ;;  %v1437_v46 = vadd.f32 1e-05, %v1433_v31 }
 0xd99   :  { %2037 = vrsqrt.f32 %v1437_v46 }
 0xda1   :  { %v2036_v48 = vpop.eup %2035 }
 0xda2   :  { %v1442_v42 = vmul.f32 %v2036_v48, %v1436_v47 }
 0xda3   :  { %v2038_v44 = vpop.eup %2037 }
 0xda4   :  { %v1441_v51 = vmul.f32 %v2038_v44, %v1435_v50  ;;  %v1450_v52 = vmul.f32 %v1736_v49, %v1442_v42  ;;  %v1748_v42 = vld [vmem:[%s2640_s15] ss:$0 sm:$0xff]  ;;  %s2135_s15 = scalar_lea.vmem %s1684_s5, 256 }
 0xda5   :  { %p2136_p4 = scmp.ne.s32.totalorder %s1684_s5, %s2135_s15  ;;  %p2141_p6 = scmp.lt.s32.totalorder %s2135_s15, %s2135_s15 }
 0xda6   :  { %v1449_v53 = vmul.f32 %v1736_v49, %v1441_v51  ;;  %v1458_v55 = vadd.f32 %v1737_v40, %v1450_v52 }
 0xda7   :  { %p2142_p7 = por %p2141_p6, %p2140_p5 }
 0xda8   :  { %v1457_v54 = vadd.f32 %v1737_v40, %v1449_v53  ;;  %v1749_v40 = vld [vmem:[%s2641_s16] ss:$0 sm:$0xff] }
 0xda9   :  { %p2143_p8 = pnand %p2142_p7, %p2136_p4 }
 0xdaa   :  { %v1459_v56 = vpack.c.bf16 %v1458_v55, %v1457_v54 }
 0xdac   :  { %1962 = vmatmul.mubr.msk.bf16.vlgmr.msra.gmra.mrb[48].mxu1 %vm135_vm1, %v1459_v56 }
 0xe7f   :  { %v1520_v61 = vpop.f32.mrb[48].mxu1 }
 0xe80   :  { %v1521_v62 = vadd.f32 %v1738_v60, %v1520_v61  ;;  %v1963_v63 = vpop.f32.mrb[49].mxu1 }
 0xe81   :  { %v1523_v1 = vpop.f32.mrb[50].mxu1 }
 0xe82   :  { %v1529_v2 = vmul.f32 0.70710677, %v1521_v62  ;;  %v1524_v5 = vadd.f32 %v1738_v60, %v1523_v1  ;;  %v1964_v6 = vpop.f32.mrb[51].mxu1  ;;  %v1527_v9 = vmul.f32 0.5, %v1521_v62 }
 0xe84   :  { %2039 = verf.f32 %v1529_v2  ;;  %v1530_v7 = vmul.f32 0.70710677, %v1524_v5  ;;  %v1528_v10 = vmul.f32 0.5, %v1524_v5 }
 0xe86   :  { %2041 = verf.f32 %v1530_v7 }
 0xe8e   :  { %v2040_v0 = vpop.eup %2039 }
 0xe8f   :  { %v1533_v30 = vadd.f32 1.0, %v2040_v0 }
 0xe90   :  { %v2042_v8 = vpop.eup %2041 }
 0xe91   :  { %v1534_v11 = vadd.f32 1.0, %v2042_v8  ;;  %v1535_v12 = vmul.f32 %v1533_v30, %v1527_v9 }
 0xe93   :  { %v1536_v13 = vmul.f32 %v1534_v11, %v1528_v10 }
 0xe95   :  { %v1537_v14 = vpack.c.bf16 %v1536_v13, %v1535_v12 }
 0xe97   :  { %1974 = vmatmul.mubr.msk.bf16.vlgmr.msra.gmra.mrb[44].mxu0 %vm1570_vm4, %v1537_v14 }
 0xf6a   :  { %v1608_v15 = vpop.f32.mrb[44].mxu0 }
 0xf6b   :  { %v1615_v17 = vadd.f32 %v1608_v15, %v1457_v54  ;;  %v1975_v18 = vpop.f32.mrb[45].mxu0 }
 0xf6c   :  { %v1611_v19 = vpop.f32.mrb[46].mxu0 }
 0xf6d   :  { %v1624_v20 = vadd.f32 %v1747_v16, %v1615_v17  ;;  %v1616_v22 = vadd.f32 %v1611_v19, %v1458_v55  ;;  %v1976_v23 = vpop.f32.mrb[47].mxu0 }
 0xf6f   :  { %v1625_v24 = vadd.f32 %v1747_v16, %v1616_v22  ;;  %v1628_v26 = vsel %vm135_vm1, %v1624_v20, 0.0  ;;  %v1634_v27 = vmul.f32 %v1624_v20, %v1624_v20 }
 0xf70   :  { %1629 = vadd.xlane.f32.xlu0 %v1628_v26 }
 0xf71   :  { %v1631_v3 = vsel %vm135_vm1, %v1625_v24, 0.0  ;;  %v1635_v4 = vmul.f32 %v1625_v24, %v1625_v24  ;;  %v1636_v28 = vsel %vm135_vm1, %v1634_v27, 0.0 }
 0xf72   :  { %1632 = vadd.xlane.f32.xlu1 %v1631_v3 }
 0xf73   :  { %v1639_v29 = vsel %vm135_vm1, %v1635_v4, 0.0 }
 0xf74   :  { %1637 = vadd.xlane.f32.xlu0 %v1636_v28 }
 0xf76   :  { %1640 = vadd.xlane.f32.xlu1 %v1639_v29 }
 0xffd   :  { %v1630_v32 = vpop.xlane.xlu0 %1629 }
 0xffe   :  { %v1642_v33 = vmul.f32 0.03125, %v1630_v32 }
 0xfff   :  { %v1633_v34 = vpop.xlane.xlu1 %1632 }
0x1000   :  { %v1643_v35 = vmul.f32 0.03125, %v1633_v34  ;;  %v1646_v37 = vmul.f32 %v1642_v33, %v1642_v33  ;;  %v1652_v49 = vsub.f32 %v1624_v20, %v1642_v33 }
0x1001   :  { %v1638_v36 = vpop.xlane.xlu0 %1637 }
0x1002   :  { %v1644_v38 = vmul.f32 0.03125, %v1638_v36  ;;  %v1647_v21 = vmul.f32 %v1643_v35, %v1643_v35  ;;  %v1653_v44 = vsub.f32 %v1625_v24, %v1643_v35 }
0x1003   :  { %v1641_v41 = vpop.xlane.xlu1 %1640 }
0x1004   :  { %v1648_v43 = vsub.f32 %v1644_v38, %v1646_v37  ;;  %v1645_v25 = vmul.f32 0.03125, %v1641_v41 }
0x1006   :  { %v1650_v45 = vmax.f32 %v1648_v43, 0.0  ;;  %v1649_v31 = vsub.f32 %v1645_v25, %v1647_v21 }
0x1008   :  { %v1654_v46 = vadd.f32 1e-05, %v1650_v45  ;;  %v1651_v47 = vmax.f32 %v1649_v31, 0.0 }
0x100a   :  { %2043 = vrsqrt.f32 %v1654_v46  ;;  %v1655_v48 = vadd.f32 1e-05, %v1651_v47 }
0x100c   :  { %2045 = vrsqrt.f32 %v1655_v48 }
0x1014   :  { %v2044_v50 = vpop.eup %2043 }
0x1015   :  { %v1658_v51 = vmul.f32 %v2044_v50, %v1652_v49 }
0x1016   :  { %v2046_v52 = vpop.eup %2045 }
0x1017   :  { %v1659_v53 = vmul.f32 %v2046_v52, %v1653_v44  ;;  %v1666_v54 = vmul.f32 %v1748_v42, %v1658_v51 }
0x1019   :  { %v1667_v55 = vmul.f32 %v1748_v42, %v1659_v53  ;;  %v1674_v56 = vadd.f32 %v1749_v40, %v1666_v54 }
0x101b   :  { %v1675_v57 = vadd.f32 %v1749_v40, %v1667_v55  ;;  %1676 = vst.msk [vmem:[#allocation10] sm:$0xff] %vm135_vm1, %v1674_v56 }
0x101d   :  { %1677 = vst.msk [vmem:[#allocation10 + $0x8] sm:$0xff] %vm135_vm1, %v1675_v57 }
0x101e   :  { %2146 = shalt.err (!%p2143_p8)
}
0x101f   :  { %s2147_s7 = scalar_lea.hbm %s2642_s17, 256 }
0x1020   :  { %p2148_p9 = scmp.ne.s32.totalorder %s2642_s17, %s2147_s7  ;;  %p2151_p10 = scmp.lt.u32.totalorder %s2147_s7, %s2642_s17 }
0x1022   :  { %p2153_p11 = pnand %p2151_p10, %p2148_p9 }
0x1024   :  { %2156 = shalt.err (!%p2153_p11)
}
0x1025   :  { %s2177_s9 = smov 128   ;;  %s2178_s24 = smov 8  }
0x1026   :  { %1689 = dma.vmem_to_hbm [thread:$0]  %s1684_s5, 256, %s2642_s17, [#allocation4], %s2177_s9, %s2177_s9, %s2178_s24  }
0x1027   :  { %2163 = dma.done.wait [#allocation4], 256  }
0x1028   :  { %2164 = vsyncadd [#allocation4], 4294967040 }
0x1029   :  { %1693 = vsyncpa [#allocation3], 1 }
0x102a   :  { %1694 = vsyncpa [#allocation6], 1 }
0x102b   :  { %1695 = vsyncpa [#allocation9], 1 }
0x102c   :  { %1696 = vsyncpa [#allocation4], 1 }

</bundles_post_ra>
